<compile_context>
chip_gen: v7x
topology: tpu7x:2x2x1
jax: 0.10.0
libtpu: 0.0.40
codegen_flags: <defaults>
</compile_context>

<pallas_src>
import functools

import jax
import jax.numpy as jnp
from jax import lax
from jax.experimental import pallas as pl
from jax.experimental.pallas import tpu as pltpu


def _round_up(a, b):
    return (a + b - 1) // b * b


def _pick_ff_tile(d_ff, target=512):
    """Largest multiple-of-128 divisor of d_ff that is <= target (else d_ff)."""
    if d_ff <= target:
        return d_ff
    t = (target // 128) * 128
    while t >= 128:
        if d_ff % t == 0:
            return t
        t -= 128
    return d_ff


# ----------------------------- gate kernel ---------------------------------
def _gate_kernel(x_ref, wg_ref, bg_ref,
                 sel_ref, scale_ref, load_ref, z_ref,
                 ind_acc, p_acc, z_acc,
                 *, topk, n_experts, n_tokens, alpha, beta):
    i = pl.program_id(0)

    @pl.when(i == 0)
    def _init():
        ind_acc[...] = jnp.zeros_like(ind_acc)
        p_acc[...] = jnp.zeros_like(p_acc)
        z_acc[...] = jnp.zeros_like(z_acc)

    # x streamed from HBM as bf16 (halves gate HBM traffic); compute in f32 so
    # softmax / top-k tie behaviour stays equality-exact.
    x = x_ref[...].astype(jnp.float32)
    logits = jnp.dot(x, wg_ref[...], preferred_element_type=jnp.float32) + bg_ref[...]

    m = jnp.max(logits, axis=-1, keepdims=True)
    ex = jnp.exp(logits - m)
    probs = ex / jnp.sum(ex, axis=-1, keepdims=True)            # [tile, E]

    tile = probs.shape[0]
    eiota = lax.broadcasted_iota(jnp.int32, (tile, n_experts), 1)

    # iterative top-k (descending values, first-occurrence tie break like torch)
    masked = probs
    vals, idxs = [], []
    for _ in range(topk):
        v = jnp.max(masked, axis=-1, keepdims=True)             # [tile,1]
        idx = jnp.min(jnp.where(masked == v, eiota, n_experts),
                      axis=-1, keepdims=True)                   # [tile,1]
        vals.append(v)
        idxs.append(idx)
        masked = jnp.where(eiota == idx, -1.0, masked)

    vsum = vals[0]
    for v in vals[1:]:
        vsum = vsum + v

    # surviving expert = largest selected index (torch per-expert overwrite)
    sel = idxs[0]
    for idx in idxs[1:]:
        sel = jnp.maximum(sel, idx)
    scale = jnp.zeros_like(vsum)
    for v, idx in zip(vals, idxs):
        scale = scale + jnp.where(idx == sel, v / vsum, 0.0)

    # lane-dense outputs: one (1,1,tile) row per grid step (no width-1 stores)
    sel_ref[...] = sel.astype(jnp.float32).reshape(1, 1, tile)
    scale_ref[...] = scale.reshape(1, 1, tile)

    # ---- loss partial sums (mask rows past the real token count) ----
    row = i * tile + lax.broadcasted_iota(jnp.int32, (tile, 1), 0)
    valid = (row < n_tokens).astype(jnp.float32)                # [tile,1]

    maxp = jnp.max(probs, axis=-1, keepdims=True)
    ind = (probs == maxp).astype(jnp.float32) * valid
    ind_acc[...] += jnp.sum(ind, axis=0, keepdims=True)
    p_acc[...] += jnp.sum(probs * valid, axis=0, keepdims=True)

    # z-router loss on softmaxed scores (matches reference quirk)
    lse = maxp + jnp.log(jnp.sum(jnp.exp(probs - maxp), axis=-1, keepdims=True))
    z_acc[...] += jnp.sum(lse * lse * valid, axis=0, keepdims=True)

    @pl.when(i == pl.num_programs(0) - 1)
    def _finalize():
        inv_n = 1.0 / float(n_tokens)
        f = ind_acc[...] * inv_n
        p = p_acc[...] * inv_n
        load_ref[...] = alpha * jnp.mean(f * p, axis=-1, keepdims=True)
        z_ref[...] = beta * z_acc[...] * inv_n


def gate_pallas(flat_x, wg, bg, *, topk, alpha, beta, tile=512):
    """flat_x is expected in the low-precision streaming dtype (e.g. bf16)."""
    n_tokens, d = flat_x.shape
    n_experts = wg.shape[1]
    tile = min(tile, _round_up(n_tokens, 8))
    n_pad = _round_up(n_tokens, tile)
    if n_pad != n_tokens:
        flat_x = jnp.pad(flat_x, ((0, n_pad - n_tokens), (0, 0)))
    n_tiles = n_pad // tile

    wg = wg.astype(jnp.float32)
    bg = bg.reshape(1, n_experts).astype(jnp.float32)

    kernel = functools.partial(_gate_kernel, topk=topk, n_experts=n_experts,
                               n_tokens=n_tokens, alpha=alpha, beta=beta)
    sel, scale, load_l, z_l = pl.pallas_call(
        kernel,
        out_shape=(jax.ShapeDtypeStruct((n_tiles, 1, tile), jnp.float32),
                   jax.ShapeDtypeStruct((n_tiles, 1, tile), jnp.float32),
                   jax.ShapeDtypeStruct((1, 1), jnp.float32),
                   jax.ShapeDtypeStruct((1, 1), jnp.float32)),
        grid=(n_tiles,),
        in_specs=[pl.BlockSpec((tile, d), lambda i: (i, 0)),
                  pl.BlockSpec((d, n_experts), lambda i: (0, 0)),
                  pl.BlockSpec((1, n_experts), lambda i: (0, 0))],
        out_specs=(pl.BlockSpec((1, 1, tile), lambda i: (i, 0, 0)),
                   pl.BlockSpec((1, 1, tile), lambda i: (i, 0, 0)),
                   pl.BlockSpec((1, 1), lambda i: (0, 0)),
                   pl.BlockSpec((1, 1), lambda i: (0, 0))),
        scratch_shapes=[pltpu.VMEM((1, n_experts), jnp.float32),
                        pltpu.VMEM((1, n_experts), jnp.float32),
                        pltpu.VMEM((1, 1), jnp.float32)],
        compiler_params=pltpu.CompilerParams(
            dimension_semantics=("arbitrary",)),   # loss reduction over tokens
        cost_estimate=pl.CostEstimate(
            flops=2 * n_pad * d * n_experts,
            transcendentals=2 * n_pad * n_experts,
            bytes_accessed=n_pad * d * flat_x.dtype.itemsize
                           + d * n_experts * 4 + 2 * n_pad * 4),
    )(flat_x, wg, bg)

    sel = sel.reshape(-1)[:n_tokens].astype(jnp.int32)
    scale = scale.reshape(-1)[:n_tokens]
    return sel, scale, load_l[0, 0], z_l[0, 0]


# ---------------------------- expert kernel ---------------------------------
def _expert_kernel(be_ref, valid_ref, x_ref, s_ref, w1_ref, b1_ref, w2_ref,
                   b2_ref, out_ref, acc_ref):
    del be_ref  # only consumed by the BlockSpec index maps
    b = pl.program_id(0)
    kf = pl.program_id(1)
    n_ff = pl.num_programs(1)

    @pl.when(valid_ref[b] > 0)         # skip all-padding blocks entirely
    def _compute():
        @pl.when(kf == 0)
        def _():
            acc_ref[...] = jnp.zeros_like(acc_ref)

        # layer 1 chunk: bf16 MXU matmul, f32 accumulation, f32 bias + GELU
        h = jnp.dot(x_ref[...], w1_ref[...], preferred_element_type=jnp.float32)
        h = jax.nn.gelu(h + b1_ref[...], approximate=True)
        # layer 2 partial sum over the d_ff chunk
        acc_ref[...] += jnp.dot(h.astype(w2_ref.dtype), w2_ref[...],
                                preferred_element_type=jnp.float32)

        @pl.when(kf == n_ff - 1)
        def _():
            y = acc_ref[...] + b2_ref[...]
            out_ref[...] = (s_ref[...] * y).astype(out_ref.dtype)


def experts_pallas(block_expert, block_valid, x_pad, scale_pad, w1, b1, w2, b2,
                   *, tile_n, tk_ff):
    p_tokens, d = x_pad.shape
    n_experts, _, d_ff = w1.shape
    num_blocks = p_tokens // tile_n
    n_ff = d_ff // tk_ff

    grid_spec = pltpu.PrefetchScalarGridSpec(
        num_scalar_prefetch=2,              # block->expert, block->valid (SMEM)
        grid=(num_blocks, n_ff),
        in_specs=[
            pl.BlockSpec((tile_n, d), lambda b, kf, be, va: (b, 0)),
            pl.BlockSpec((tile_n, 1), lambda b, kf, be, va: (b, 0)),
            # invalid blocks freeze kf at 0 (and reuse the previous expert id),
            # so skipped blocks do not trigger fresh weight DMAs.
            pl.BlockSpec((pl.Squeezed(), d, tk_ff),
                         lambda b, kf, be, va: (be[b], 0, kf * va[b])),
            pl.BlockSpec((pl.Squeezed(), 1, tk_ff),
                         lambda b, kf, be, va: (be[b], 0, kf * va[b])),
            pl.BlockSpec((pl.Squeezed(), tk_ff, d),
                         lambda b, kf, be, va: (be[b], kf * va[b], 0)),
            pl.BlockSpec((pl.Squeezed(), 1, d),
                         lambda b, kf, be, va: (be[b], 0, 0)),
        ],
        out_specs=pl.BlockSpec((tile_n, d), lambda b, kf, be, va: (b, 0)),
        scratch_shapes=[pltpu.VMEM((tile_n, d), jnp.float32)],
    )
    return pl.pallas_call(
        _expert_kernel,
        out_shape=jax.ShapeDtypeStruct((p_tokens, d), jnp.float32),
        grid_spec=grid_spec,
        compiler_params=pltpu.CompilerParams(
            dimension_semantics=("parallel", "arbitrary"),
            vmem_limit_bytes=64 * 1024 * 1024),
        cost_estimate=pl.CostEstimate(
            flops=4 * p_tokens * d * d_ff,
            transcendentals=p_tokens * d_ff,
            bytes_accessed=(p_tokens * d * (x_pad.dtype.itemsize + 4)
                            + num_blocks * 2 * d * d_ff * w1.dtype.itemsize)),
    )(block_expert, block_valid, x_pad, scale_pad, w1, b1, w2, b2)


# ------------------------------ routing (JAX) -------------------------------
def _route(sel, n_experts, tile_n, num_blocks):
    """Sort tokens by surviving expert; emit token->row map and per-block
    (expert, valid) tables for the scalar-prefetched expert kernel."""
    n = sel.shape[0]
    order = jnp.argsort(sel, stable=True).astype(jnp.int32)   # stable required
    sorted_sel = sel[order]
    counts = jnp.bincount(sel, length=n_experts)               # [E]
    blocks_per_expert = (counts + tile_n - 1) // tile_n
    block_end = jnp.cumsum(blocks_per_expert)
    block_start = block_end - blocks_per_expert
    group_start = jnp.cumsum(counts) - counts
    rank = jnp.arange(n, dtype=jnp.int32) - group_start[sorted_sel].astype(jnp.int32)
    dest = block_start[sorted_sel].astype(jnp.int32) * tile_n + rank
    total_valid = block_end[-1]
    blk = jnp.arange(num_blocks, dtype=jnp.int32)
    be = jnp.minimum(jnp.searchsorted(block_end, blk, side="right"),
                     n_experts - 1).astype(jnp.int32)
    valid = (blk < total_valid).astype(jnp.int32)
    # padding blocks reuse the last valid block's expert (no fresh weight DMA);
    # their output rows are never gathered (dest only targets valid blocks).
    last_be = jnp.minimum(
        jnp.searchsorted(block_end, total_valid - 1, side="right"),
        n_experts - 1).astype(jnp.int32)
    block_expert = jnp.where(valid == 1, be, last_be)
    return order, dest, block_expert, valid


# ------------------------------- wrapper ------------------------------------
def sparse_moe_forward(x, params, *, topk=1, alpha=0.01, beta=0.1,
                       matmul_dtype=jnp.bfloat16, tile_n=256, tk_ff=512):
    b, t, d = x.shape
    n = b * t
    flat = x.reshape(n, d)
    flat_lp = flat.astype(matmul_dtype)          # shared by gate + expert paths
    n_experts, _, d_ff = params["w1"].shape

    sel, scale, load_l, z_l = gate_pallas(flat_lp, params["wg"], params["bg"],
                                          topk=topk, alpha=alpha, beta=beta)

    # MXU-aligned token blocks; do NOT shrink for small n — padding blocks are
    # skipped inside the kernel via the per-block valid flag.
    tile_n = _round_up(max(tile_n, 8), 8)
    tk_ff = _pick_ff_tile(d_ff, tk_ff)
    num_blocks = n // tile_n + n_experts                    # static worst case
    p_tokens = num_blocks * tile_n

    order, dest, block_expert, block_valid = _route(sel, n_experts, tile_n,
                                                    num_blocks)

    # Gather-based packing: only small int32 index vectors are scattered; the
    # d-wide activation rows move once via a gather (row index n -> zero row).
    src_idx = jnp.full((p_tokens,), n, jnp.int32).at[dest].set(order)
    flat_ext = jnp.concatenate([flat_lp, jnp.zeros((1, d), matmul_dtype)], axis=0)
    x_pad = flat_ext[src_idx]
    scale_ext = jnp.concatenate([scale, jnp.zeros((1,), jnp.float32)], axis=0)
    scale_pad = scale_ext[src_idx][:, None]

    w1 = params["w1"].astype(matmul_dtype)
    w2 = params["w2"].astype(matmul_dtype)
    b1 = params["b1"].reshape(n_experts, 1, d_ff).astype(jnp.float32)
    b2 = params["b2"].reshape(n_experts, 1, d).astype(jnp.float32)

    out_pad = experts_pallas(block_expert, block_valid, x_pad, scale_pad,
                             w1, b1, w2, b2, tile_n=tile_n, tk_ff=tk_ff)

    # Single composed gather for the un-sort, fused with the residual add.
    row_of_token = jnp.zeros((n,), jnp.int32).at[order].set(dest)
    y = flat + out_pad[row_of_token].astype(flat.dtype)
    return y.reshape(b, t, d).astype(x.dtype), load_l, z_l


# ----------------------- pure-JAX reference (checking) ----------------------
def sparse_moe_reference(x, params, *, topk=1, alpha=0.01, beta=0.1):
    b, t, d = x.shape
    flat = x.reshape(b * t, d)
    logits = flat @ params["wg"] + params["bg"][0]
    probs = jax.nn.softmax(logits, axis=-1)
    vals, idxs = lax.top_k(probs, topk)
    combine = vals / vals.sum(-1, keepdims=True)
    n_experts = params["w1"].shape[0]
    out = jnp.zeros_like(flat)
    for e in range(n_experts):
        h = jax.nn.gelu(flat @ params["w1"][e] + params["b1"][e], approximate=True)
        ye = h @ params["w2"][e] + params["b2"][e]
        match = idxs == e
        routed = match.any(-1)
        sc = (combine * match).sum(-1)
        out = jnp.where(routed[:, None], ye * sc[:, None], out)
    y = x + out.reshape(b, t, d)
    maxp = probs.max(-1, keepdims=True)
    f = (probs == maxp).astype(jnp.float32).mean(0)
    p = probs.mean(0)
    load = alpha * (f * p).mean()
    lse = jax.nn.logsumexp(probs, axis=-1)
    z = beta * (lse ** 2).mean()
    return y, load, z


# --------------------------------- main --------------------------------------
if __name__ == "__main__":
    B, T, D, D_FF, N_EXPERTS = 2, 8, 32, 64, 4

    key = jax.random.PRNGKey(0)
    k = jax.random.split(key, 8)
    params = {
        "wg": jax.random.normal(k[0], (D, N_EXPERTS), jnp.float32) * 0.1,
        "bg": jax.random.normal(k[1], (1, N_EXPERTS), jnp.float32) * 0.1,
        "w1": jax.random.normal(k[2], (N_EXPERTS, D, D_FF), jnp.float32) * 0.1,
        "b1": jax.random.normal(k[3], (N_EXPERTS, D_FF), jnp.float32) * 0.1,
        "w2": jax.random.normal(k[4], (N_EXPERTS, D_FF, D), jnp.float32) * 0.1,
        "b2": jax.random.normal(k[5], (N_EXPERTS, D), jnp.float32) * 0.1,
    }
    # Snap x to the bf16 grid so the wrapper's bf16 streaming cast of the gate
    # input is exact and router decisions / losses match the f32 reference.
    x = jax.random.normal(k[6], (B, T, D), jnp.float32)
    x = x.astype(jnp.bfloat16).astype(jnp.float32)

    for topk in (1, 2):
        fwd = jax.jit(functools.partial(sparse_moe_forward, topk=topk))
        y, load_loss, z_loss = fwd(x, params)
        y = jax.block_until_ready(y)
        load_loss = jax.block_until_ready(load_loss)
        z_loss = jax.block_until_ready(z_loss)

        y_ref, load_ref, z_ref = sparse_moe_reference(x, params, topk=topk)
        assert y.shape == (B, T, D)
        assert jnp.all(jnp.isfinite(y))
        assert jnp.allclose(y, y_ref, atol=2e-2, rtol=2e-2), f"y mismatch topk={topk}"
        assert jnp.allclose(load_loss, load_ref, atol=1e-4), f"load mismatch topk={topk}"
        assert jnp.allclose(z_loss, z_ref, atol=1e-4), f"z mismatch topk={topk}"

    print("KERNEL_OK")
</pallas_src>

<mosaic_0001>
module attributes {stable_mosaic.version = 11 : i64} {
  func.func private @main(%arg0: i32) attributes {dimension_semantics = [#tpu.dimension_semantics<core_parallel>], iteration_bounds = array<i64: 2>, tpu.core_type = #tpu.core_type<sc_scalar_subcore>, window_params = []} {
    return
  }
}

module attributes {stable_mosaic.version = 11 : i64} {
  func.func private @main(%arg0: i32) attributes {dimension_semantics = [#tpu.dimension_semantics<core_parallel>], iteration_bounds = array<i64: 2>, tpu.core_type = #tpu.core_type<sc_scalar_subcore>, window_params = []} {
    return
  }
}

module attributes {stable_mosaic.version = 11 : i64} {
  func.func @_gate_kernel(%arg0: i32, %arg1: memref<16x32xbf16, #tpu.memory_space<vmem>>, %arg2: memref<32x4xf32, #tpu.memory_space<vmem>>, %arg3: memref<1x4xf32, #tpu.memory_space<vmem>>, %arg4: memref<1x1x16xf32, #tpu.memory_space<vmem>>, %arg5: memref<1x1x16xf32, #tpu.memory_space<vmem>>, %arg6: memref<1x1xf32, #tpu.memory_space<vmem>>, %arg7: memref<1x1xf32, #tpu.memory_space<vmem>>, %arg8: memref<1x4xf32, #tpu.memory_space<vmem>>, %arg9: memref<1x4xf32, #tpu.memory_space<vmem>>, %arg10: memref<1x1xf32, #tpu.memory_space<vmem>>) attributes {dimension_semantics = [#tpu.dimension_semantics<arbitrary>], iteration_bounds = array<i64: 1>, scalar_prefetch = 0 : i64, scratch_operands = 3 : i64, tpu.core_type = #tpu.core_type<tc>, window_params = [{transform_indices = @transform_0, window_bounds = array<i64: 16, 32>}, {pipeline_mode = #tpu.pipeline_mode<synchronous>, transform_indices = @transform_1, window_bounds = array<i64: 32, 4>}, {pipeline_mode = #tpu.pipeline_mode<synchronous>, transform_indices = @transform_2, window_bounds = array<i64: 1, 4>}, {transform_indices = @transform_3, window_bounds = array<i64: 1, 1, 16>}, {transform_indices = @transform_4, window_bounds = array<i64: 1, 1, 16>}, {pipeline_mode = #tpu.pipeline_mode<synchronous>, transform_indices = @transform_5, window_bounds = array<i64: 1, 1>}, {pipeline_mode = #tpu.pipeline_mode<synchronous>, transform_indices = @transform_6, window_bounds = array<i64: 1, 1>}]} {
    %c0_i32 = arith.constant 0 : i32
    %0 = arith.cmpi eq, %arg0, %c0_i32 : i32
    %1 = arith.extui %0 : i1 to i32
    %c0_i32_0 = arith.constant 0 : i32
    %2 = arith.cmpi ne, %1, %c0_i32_0 : i32
    scf.if %2 {
      %cst_38 = arith.constant 0.000000e+00 : f32
      %84 = vector.broadcast %cst_38 : f32 to vector<1x4xf32>
      %c0_39 = arith.constant 0 : index
      %c0_40 = arith.constant 0 : index
      %85 = vector.load %arg8[%c0_39, %c0_40] : memref<1x4xf32, #tpu.memory_space<vmem>>, vector<1x4xf32>
      tpu.vector_store %arg8[%c0_39, %c0_40], %84 {strides = array<i32>} : memref<1x4xf32, #tpu.memory_space<vmem>>, vector<1x4xf32>,
      %cst_41 = arith.constant 0.000000e+00 : f32
      %86 = vector.broadcast %cst_41 : f32 to vector<1x4xf32>
      %c0_42 = arith.constant 0 : index
      %c0_43 = arith.constant 0 : index
      %87 = vector.load %arg9[%c0_42, %c0_43] : memref<1x4xf32, #tpu.memory_space<vmem>>, vector<1x4xf32>
      tpu.vector_store %arg9[%c0_42, %c0_43], %86 {strides = array<i32>} : memref<1x4xf32, #tpu.memory_space<vmem>>, vector<1x4xf32>,
      %cst_44 = arith.constant 0.000000e+00 : f32
      %88 = vector.broadcast %cst_44 : f32 to vector<1x1xf32>
      %c0_45 = arith.constant 0 : index
      %c0_46 = arith.constant 0 : index
      %89 = vector.load %arg10[%c0_45, %c0_46] : memref<1x1xf32, #tpu.memory_space<vmem>>, vector<1x1xf32>
      tpu.vector_store %arg10[%c0_45, %c0_46], %88 {strides = array<i32>} : memref<1x1xf32, #tpu.memory_space<vmem>>, vector<1x1xf32>,
    } else {
    }
    %c0 = arith.constant 0 : index
    %c0_1 = arith.constant 0 : index
    %3 = vector.load %arg1[%c0, %c0_1] : memref<16x32xbf16, #tpu.memory_space<vmem>>, vector<16x32xbf16>
    %4 = arith.extf %3 : vector<16x32xbf16> to vector<16x32xf32>
    %c0_2 = arith.constant 0 : index
    %c0_3 = arith.constant 0 : index
    %5 = vector.load %arg2[%c0_2, %c0_3] : memref<32x4xf32, #tpu.memory_space<vmem>>, vector<32x4xf32>
    %cst = arith.constant dense<0.000000e+00> : vector<16x4xf32>
    %6 = tpu.matmul %4, %5, %cst {dimension_numbers = #tpu.dot_dimension_numbers<[1], [0], [0], [1], [0, 0, 1, 1], [], []>} : vector<16x32xf32>, vector<32x4xf32>, vector<16x4xf32> -> vector<16x4xf32>
    %c0_4 = arith.constant 0 : index
    %c0_5 = arith.constant 0 : index
    %7 = vector.load %arg3[%c0_4, %c0_5] : memref<1x4xf32, #tpu.memory_space<vmem>>, vector<1x4xf32>
    %8 = vector.broadcast %7 : vector<1x4xf32> to vector<16x4xf32>
    %9 = arith.addf %6, %8 : vector<16x4xf32>
    %cst_6 = arith.constant dense<0xFF800000> : vector<16xf32>
    %10 = vector.multi_reduction <maximumf>, %9, %cst_6 [1] : vector<16x4xf32> to vector<16xf32>
    %11 = vector.shape_cast %10 : vector<16xf32> to vector<16x1xf32>
    %12 = vector.broadcast %11 : vector<16x1xf32> to vector<16x4xf32>
    %13 = arith.subf %9, %12 : vector<16x4xf32>
    %14 = math.exp %13 : vector<16x4xf32>
    %cst_7 = arith.constant dense<0.000000e+00> : vector<16xf32>
    %15 = vector.multi_reduction <add>, %14, %cst_7 [1] : vector<16x4xf32> to vector<16xf32>
    %16 = vector.shape_cast %15 : vector<16xf32> to vector<16x1xf32>
    %17 = vector.broadcast %16 : vector<16x1xf32> to vector<16x4xf32>
    %18 = arith.divf %14, %17 : vector<16x4xf32>
    %19 = tpu.iota {dimensions = array<i32: 1>} : vector<16x4xi32>
    %cst_8 = arith.constant dense<0xFF800000> : vector<16xf32>
    %20 = vector.multi_reduction <maximumf>, %18, %cst_8 [1] : vector<16x4xf32> to vector<16xf32>
    %21 = vector.shape_cast %20 : vector<16xf32> to vector<16x1xf32>
    %22 = vector.broadcast %21 : vector<16x1xf32> to vector<16x4xf32>
    %23 = arith.cmpf oeq, %18, %22 : vector<16x4xf32>
    %c4_i32 = arith.constant 4 : i32
    %24 = vector.broadcast %c4_i32 : i32 to vector<16x4xi32>
    %25 = arith.select %23, %19, %24 : vector<16x4xi1>, vector<16x4xi32>
    %cst_9 = arith.constant dense<2147483647> : vector<16xi32>
    %26 = vector.multi_reduction <minsi>, %25, %cst_9 [1] : vector<16x4xi32> to vector<16xi32>
    %27 = vector.shape_cast %26 : vector<16xi32> to vector<16x1xi32>
    %cst_10 = arith.constant 0.000000e+00 : f32
    %28 = vector.broadcast %cst_10 : f32 to vector<16x1xf32>
    %29 = arith.cmpi eq, %27, %27 : vector<16x1xi32>
    %30 = arith.divf %21, %21 : vector<16x1xf32>
    %cst_11 = arith.constant 0.000000e+00 : f32
    %31 = vector.broadcast %cst_11 : f32 to vector<16x1xf32>
    %32 = arith.select %29, %30, %31 : vector<16x1xi1>, vector<16x1xf32>
    %33 = arith.addf %28, %32 : vector<16x1xf32>
    %34 = arith.sitofp %27 : vector<16x1xi32> to vector<16x1xf32>
    %35 = vector.shape_cast %34 : vector<16x1xf32> to vector<1x1x16xf32>
    %c0_12 = arith.constant 0 : index
    %c0_13 = arith.constant 0 : index
    %c0_14 = arith.constant 0 : index
    %36 = vector.load %arg4[%c0_12, %c0_13, %c0_14] : memref<1x1x16xf32, #tpu.memory_space<vmem>>, vector<1x1x16xf32>
    tpu.vector_store %arg4[%c0_12, %c0_13, %c0_14], %35 {strides = array<i32>} : memref<1x1x16xf32, #tpu.memory_space<vmem>>, vector<1x1x16xf32>,
    %37 = vector.shape_cast %33 : vector<16x1xf32> to vector<1x1x16xf32>
    %c0_15 = arith.constant 0 : index
    %c0_16 = arith.constant 0 : index
    %c0_17 = arith.constant 0 : index
    %38 = vector.load %arg5[%c0_15, %c0_16, %c0_17] : memref<1x1x16xf32, #tpu.memory_space<vmem>>, vector<1x1x16xf32>
    tpu.vector_store %arg5[%c0_15, %c0_16, %c0_17], %37 {strides = array<i32>} : memref<1x1x16xf32, #tpu.memory_space<vmem>>, vector<1x1x16xf32>,
    %c16_i32 = arith.constant 16 : i32
    %39 = arith.muli %arg0, %c16_i32 : i32
    %40 = tpu.iota {dimensions = array<i32: 0>} : vector<16x1xi32>
    %41 = vector.broadcast %39 : i32 to vector<16x1xi32>
    %42 = arith.addi %41, %40 : vector<16x1xi32>
    %c16_i32_18 = arith.constant 16 : i32
    %43 = vector.broadcast %c16_i32_18 : i32 to vector<16x1xi32>
    %44 = arith.cmpi slt, %42, %43 : vector<16x1xi32>
    %45 = arith.extui %44 : vector<16x1xi1> to vector<16x1xi32>
    %46 = arith.sitofp %45 : vector<16x1xi32> to vector<16x1xf32>
    %cst_19 = arith.constant dense<0xFF800000> : vector<16xf32>
    %47 = vector.multi_reduction <maximumf>, %18, %cst_19 [1] : vector<16x4xf32> to vector<16xf32>
    %48 = vector.shape_cast %47 : vector<16xf32> to vector<16x1xf32>
    %49 = vector.broadcast %48 : vector<16x1xf32> to vector<16x4xf32>
    %50 = arith.cmpf oeq, %18, %49 : vector<16x4xf32>
    %51 = arith.extui %50 : vector<16x4xi1> to vector<16x4xi32>
    %52 = arith.sitofp %51 : vector<16x4xi32> to vector<16x4xf32>
    %53 = vector.broadcast %46 : vector<16x1xf32> to vector<16x4xf32>
    %54 = arith.mulf %52, %53 : vector<16x4xf32>
    %c0_20 = arith.constant 0 : index
    %c0_21 = arith.constant 0 : index
    %55 = vector.load %arg8[%c0_20, %c0_21] : memref<1x4xf32, #tpu.memory_space<vmem>>, vector<1x4xf32>
    %cst_22 = arith.constant dense<0.000000e+00> : vector<4xf32>
    %56 = vector.multi_reduction <add>, %54, %cst_22 [0] : vector<16x4xf32> to vector<4xf32>
    %57 = vector.shape_cast %56 : vector<4xf32> to vector<1x4xf32>
    %58 = arith.addf %55, %57 : vector<1x4xf32>
    %c0_23 = arith.constant 0 : index
    %c0_24 = arith.constant 0 : index
    %59 = vector.load %arg8[%c0_23, %c0_24] : memref<1x4xf32, #tpu.memory_space<vmem>>, vector<1x4xf32>
    tpu.vector_store %arg8[%c0_23, %c0_24], %58 {strides = array<i32>} : memref<1x4xf32, #tpu.memory_space<vmem>>, vector<1x4xf32>,
    %c0_25 = arith.constant 0 : index
    %c0_26 = arith.constant 0 : index
    %60 = vector.load %arg9[%c0_25, %c0_26] : memref<1x4xf32, #tpu.memory_space<vmem>>, vector<1x4xf32>
    %61 = vector.broadcast %46 : vector<16x1xf32> to vector<16x4xf32>
    %62 = arith.mulf %18, %61 : vector<16x4xf32>
    %cst_27 = arith.constant dense<0.000000e+00> : vector<4xf32>
    %63 = vector.multi_reduction <add>, %62, %cst_27 [0] : vector<16x4xf32> to vector<4xf32>
    %64 = vector.shape_cast %63 : vector<4xf32> to vector<1x4xf32>
    %65 = arith.addf %60, %64 : vector<1x4xf32>
    %c0_28 = arith.constant 0 : index
    %c0_29 = arith.constant 0 : index
    %66 = vector.load %arg9[%c0_28, %c0_29] : memref<1x4xf32, #tpu.memory_space<vmem>>, vector<1x4xf32>
    tpu.vector_store %arg9[%c0_28, %c0_29], %65 {strides = array<i32>} : memref<1x4xf32, #tpu.memory_space<vmem>>, vector<1x4xf32>,
    %67 = vector.broadcast %48 : vector<16x1xf32> to vector<16x4xf32>
    %68 = arith.subf %18, %67 : vector<16x4xf32>
    %69 = math.exp %68 : vector<16x4xf32>
    %cst_30 = arith.constant dense<0.000000e+00> : vector<16xf32>
    %70 = vector.multi_reduction <add>, %69, %cst_30 [1] : vector<16x4xf32> to vector<16xf32>
    %71 = vector.shape_cast %70 : vector<16xf32> to vector<16x1xf32>
    %72 = math.log %71 : vector<16x1xf32>
    %73 = arith.addf %48, %72 : vector<16x1xf32>
    %c0_31 = arith.constant 0 : index
    %c0_32 = arith.constant 0 : index
    %74 = vector.load %arg10[%c0_31, %c0_32] : memref<1x1xf32, #tpu.memory_space<vmem>>, vector<1x1xf32>
    %75 = arith.mulf %73, %73 : vector<16x1xf32>
    %76 = arith.mulf %75, %46 : vector<16x1xf32>
    %cst_33 = arith.constant dense<0.000000e+00> : vector<1xf32>
    %77 = vector.multi_reduction <add>, %76, %cst_33 [0] : vector<16x1xf32> to vector<1xf32>
    %78 = vector.shape_cast %77 : vector<1xf32> to vector<1x1xf32>
    %79 = arith.addf %74, %78 : vector<1x1xf32>
    %c0_34 = arith.constant 0 : index
    %c0_35 = arith.constant 0 : index
    %80 = vector.load %arg10[%c0_34, %c0_35] : memref<1x1xf32, #tpu.memory_space<vmem>>, vector<1x1xf32>
    tpu.vector_store %arg10[%c0_34, %c0_35], %79 {strides = array<i32>} : memref<1x1xf32, #tpu.memory_space<vmem>>, vector<1x1xf32>,
    %c0_i32_36 = arith.constant 0 : i32
    %81 = arith.cmpi eq, %arg0, %c0_i32_36 : i32
    %82 = arith.extui %81 : i1 to i32
    %c0_i32_37 = arith.constant 0 : i32
    %83 = arith.cmpi ne, %82, %c0_i32_37 : i32
    scf.if %83 {
      %c0_38 = arith.constant 0 : index
      %c0_39 = arith.constant 0 : index
      %84 = vector.load %arg8[%c0_38, %c0_39] : memref<1x4xf32, #tpu.memory_space<vmem>>, vector<1x4xf32>
      %cst_40 = arith.constant 6.250000e-02 : f32
      %85 = vector.broadcast %cst_40 : f32 to vector<1x4xf32>
      %86 = arith.mulf %84, %85 : vector<1x4xf32>
      %c0_41 = arith.constant 0 : index
      %c0_42 = arith.constant 0 : index
      %87 = vector.load %arg9[%c0_41, %c0_42] : memref<1x4xf32, #tpu.memory_space<vmem>>, vector<1x4xf32>
      %cst_43 = arith.constant 6.250000e-02 : f32
      %88 = vector.broadcast %cst_43 : f32 to vector<1x4xf32>
      %89 = arith.mulf %87, %88 : vector<1x4xf32>
      %90 = arith.mulf %86, %89 : vector<1x4xf32>
      %cst_44 = arith.constant dense<0.000000e+00> : vector<1xf32>
      %91 = vector.multi_reduction <add>, %90, %cst_44 [1] : vector<1x4xf32> to vector<1xf32>
      %92 = vector.shape_cast %91 : vector<1xf32> to vector<1x1xf32>
      %cst_45 = arith.constant 4.000000e+00 : f32
      %93 = vector.broadcast %cst_45 : f32 to vector<1x1xf32>
      %94 = arith.divf %92, %93 : vector<1x1xf32>
      %cst_46 = arith.constant 0.00999999977 : f32
      %95 = vector.broadcast %cst_46 : f32 to vector<1x1xf32>
      %96 = arith.mulf %95, %94 : vector<1x1xf32>
      %c0_47 = arith.constant 0 : index
      %c0_48 = arith.constant 0 : index
      %97 = vector.load %arg6[%c0_47, %c0_48] : memref<1x1xf32, #tpu.memory_space<vmem>>, vector<1x1xf32>
      tpu.vector_store %arg6[%c0_47, %c0_48], %96 {strides = array<i32>} : memref<1x1xf32, #tpu.memory_space<vmem>>, vector<1x1xf32>,
      %c0_49 = arith.constant 0 : index
      %c0_50 = arith.constant 0 : index
      %98 = vector.load %arg10[%c0_49, %c0_50] : memref<1x1xf32, #tpu.memory_space<vmem>>, vector<1x1xf32>
      %cst_51 = arith.constant 1.000000e-01 : f32
      %99 = vector.broadcast %cst_51 : f32 to vector<1x1xf32>
      %100 = arith.mulf %99, %98 : vector<1x1xf32>
      %cst_52 = arith.constant 6.250000e-02 : f32
      %101 = vector.broadcast %cst_52 : f32 to vector<1x1xf32>
      %102 = arith.mulf %100, %101 : vector<1x1xf32>
      %c0_53 = arith.constant 0 : index
      %c0_54 = arith.constant 0 : index
      %103 = vector.load %arg7[%c0_53, %c0_54] : memref<1x1xf32, #tpu.memory_space<vmem>>, vector<1x1xf32>
      tpu.vector_store %arg7[%c0_53, %c0_54], %102 {strides = array<i32>} : memref<1x1xf32, #tpu.memory_space<vmem>>, vector<1x1xf32>,
    } else {
    }
    return
  }
  func.func @transform_0(%arg0: i32) -> (i32, i32) {
    %c0_i32 = arith.constant 0 : i32
    %c0_i32_0 = arith.constant 0 : i32
    return %arg0, %c0_i32 : i32, i32
  }
  func.func @transform_1(%arg0: i32) -> (i32, i32) {
    %c0_i32 = arith.constant 0 : i32
    %c0_i32_0 = arith.constant 0 : i32
    %c0_i32_1 = arith.constant 0 : i32
    return %c0_i32, %c0_i32_0 : i32, i32
  }
  func.func @transform_2(%arg0: i32) -> (i32, i32) {
    %c0_i32 = arith.constant 0 : i32
    %c0_i32_0 = arith.constant 0 : i32
    %c0_i32_1 = arith.constant 0 : i32
    return %c0_i32, %c0_i32_0 : i32, i32
  }
  func.func @transform_3(%arg0: i32) -> (i32, i32, i32) {
    %c0_i32 = arith.constant 0 : i32
    %c0_i32_0 = arith.constant 0 : i32
    %c0_i32_1 = arith.constant 0 : i32
    return %arg0, %c0_i32, %c0_i32_0 : i32, i32, i32
  }
  func.func @transform_4(%arg0: i32) -> (i32, i32, i32) {
    %c0_i32 = arith.constant 0 : i32
    %c0_i32_0 = arith.constant 0 : i32
    %c0_i32_1 = arith.constant 0 : i32
    return %arg0, %c0_i32, %c0_i32_0 : i32, i32, i32
  }
  func.func @transform_5(%arg0: i32) -> (i32, i32) {
    %c0_i32 = arith.constant 0 : i32
    %c0_i32_0 = arith.constant 0 : i32
    %c0_i32_1 = arith.constant 0 : i32
    return %c0_i32, %c0_i32_0 : i32, i32
  }
  func.func @transform_6(%arg0: i32) -> (i32, i32) {
    %c0_i32 = arith.constant 0 : i32
    %c0_i32_0 = arith.constant 0 : i32
    %c0_i32_1 = arith.constant 0 : i32
    return %c0_i32, %c0_i32_0 : i32, i32
  }
}

module attributes {stable_mosaic.version = 11 : i64} {
  func.func @_expert_kernel(%arg0: i32, %arg1: i32, %arg2: memref<4xi32, #tpu.memory_space<smem>>, %arg3: memref<4xi32, #tpu.memory_space<smem>>, %arg4: memref<256x32xbf16, #tpu.memory_space<vmem>>, %arg5: memref<256x1xf32, #tpu.memory_space<vmem>>, %arg6: memref<1x32x64xbf16, #tpu.memory_space<vmem>>, %arg7: memref<1x1x64xf32, #tpu.memory_space<vmem>>, %arg8: memref<1x64x32xbf16, #tpu.memory_space<vmem>>, %arg9: memref<1x1x32xf32, #tpu.memory_space<vmem>>, %arg10: memref<256x32xf32, #tpu.memory_space<vmem>>, %arg11: memref<256x32xf32, #tpu.memory_space<vmem>>) attributes {dimension_semantics = [#tpu.dimension_semantics<parallel>, #tpu.dimension_semantics<arbitrary>], iteration_bounds = array<i64: 4, 1>, scalar_prefetch = 2 : i64, scratch_operands = 1 : i64, tpu.core_type = #tpu.core_type<tc>, window_params = [{transform_indices = @transform_0, window_bounds = array<i64: 256, 32>}, {transform_indices = @transform_1, window_bounds = array<i64: 256, 1>}, {transform_indices = @transform_2, window_bounds = array<i64: 1, 32, 64>}, {transform_indices = @transform_3, window_bounds = array<i64: 1, 1, 64>}, {transform_indices = @transform_4, window_bounds = array<i64: 1, 64, 32>}, {transform_indices = @transform_5, window_bounds = array<i64: 1, 1, 32>}, {transform_indices = @transform_6, window_bounds = array<i64: 256, 32>}]} {
    %0 = arith.index_cast %arg0 : i32 to index
    %1 = memref.load %arg3[%0] : memref<4xi32, #tpu.memory_space<smem>>
    %c0_i32 = arith.constant 0 : i32
    %2 = arith.cmpi sgt, %1, %c0_i32 : i32
    %3 = arith.extui %2 : i1 to i32
    %c0_i32_0 = arith.constant 0 : i32
    %4 = arith.cmpi ne, %3, %c0_i32_0 : i32
    scf.if %4 {
      %c0_i32_1 = arith.constant 0 : i32
      %5 = arith.cmpi eq, %arg1, %c0_i32_1 : i32
      %6 = arith.extui %5 : i1 to i32
      %c0_i32_2 = arith.constant 0 : i32
      %7 = arith.cmpi ne, %6, %c0_i32_2 : i32
      scf.if %7 {
        %cst_24 = arith.constant 0.000000e+00 : f32
        %39 = vector.broadcast %cst_24 : f32 to vector<256x32xf32>
        %c0_25 = arith.constant 0 : index
        %c0_26 = arith.constant 0 : index
        %40 = vector.load %arg11[%c0_25, %c0_26] : memref<256x32xf32, #tpu.memory_space<vmem>>, vector<256x32xf32>
        tpu.vector_store %arg11[%c0_25, %c0_26], %39 {strides = array<i32>} : memref<256x32xf32, #tpu.memory_space<vmem>>, vector<256x32xf32>,
      } else {
      }
      %c0 = arith.constant 0 : index
      %c0_3 = arith.constant 0 : index
      %8 = vector.load %arg4[%c0, %c0_3] : memref<256x32xbf16, #tpu.memory_space<vmem>>, vector<256x32xbf16>
      %c0_4 = arith.constant 0 : index
      %c0_5 = arith.constant 0 : index
      %c0_6 = arith.constant 0 : index
      %9 = vector.load %arg6[%c0_4, %c0_5, %c0_6] : memref<1x32x64xbf16, #tpu.memory_space<vmem>>, vector<1x32x64xbf16>
      %10 = vector.shape_cast %9 : vector<1x32x64xbf16> to vector<32x64xbf16>
      %cst = arith.constant dense<0.000000e+00> : vector<256x64xf32>
      %11 = tpu.matmul %8, %10, %cst {dimension_numbers = #tpu.dot_dimension_numbers<[1], [0], [0], [1], [0, 0, 1, 1], [], []>} : vector<256x32xbf16>, vector<32x64xbf16>, vector<256x64xf32> -> vector<256x64xf32>
      %c0_7 = arith.constant 0 : index
      %c0_8 = arith.constant 0 : index
      %c0_9 = arith.constant 0 : index
      %12 = vector.load %arg7[%c0_7, %c0_8, %c0_9] : memref<1x1x64xf32, #tpu.memory_space<vmem>>, vector<1x1x64xf32>
      %13 = vector.shape_cast %12 : vector<1x1x64xf32> to vector<1x64xf32>
      %14 = vector.broadcast %13 : vector<1x64xf32> to vector<256x64xf32>
      %15 = arith.addf %11, %14 : vector<256x64xf32>
      %16 = arith.mulf %15, %15 : vector<256x64xf32>
      %17 = arith.mulf %15, %16 : vector<256x64xf32>
      %cst_10 = arith.constant 4.471500e-02 : f32
      %18 = vector.broadcast %cst_10 : f32 to vector<256x64xf32>
      %19 = arith.mulf %18, %17 : vector<256x64xf32>
      %20 = arith.addf %15, %19 : vector<256x64xf32>
      %cst_11 = arith.constant 0.797884583 : f32
      %21 = vector.broadcast %cst_11 : f32 to vector<256x64xf32>
      %22 = arith.mulf %21, %20 : vector<256x64xf32>
      %23 = math.tanh %22 : vector<256x64xf32>
      %cst_12 = arith.constant 1.000000e+00 : f32
      %24 = vector.broadcast %cst_12 : f32 to vector<256x64xf32>
      %25 = arith.addf %24, %23 : vector<256x64xf32>
      %cst_13 = arith.constant 5.000000e-01 : f32
      %26 = vector.broadcast %cst_13 : f32 to vector<256x64xf32>
      %27 = arith.mulf %26, %25 : vector<256x64xf32>
      %28 = arith.mulf %15, %27 : vector<256x64xf32>
      %c0_14 = arith.constant 0 : index
      %c0_15 = arith.constant 0 : index
      %29 = vector.load %arg11[%c0_14, %c0_15] : memref<256x32xf32, #tpu.memory_space<vmem>>, vector<256x32xf32>
      %30 = arith.truncf %28 : vector<256x64xf32> to vector<256x64xbf16>
      %c0_16 = arith.constant 0 : index
      %c0_17 = arith.constant 0 : index
      %c0_18 = arith.constant 0 : index
      %31 = vector.load %arg8[%c0_16, %c0_17, %c0_18] : memref<1x64x32xbf16, #tpu.memory_space<vmem>>, vector<1x64x32xbf16>
      %32 = vector.shape_cast %31 : vector<1x64x32xbf16> to vector<64x32xbf16>
      %cst_19 = arith.constant dense<0.000000e+00> : vector<256x32xf32>
      %33 = tpu.matmul %30, %32, %cst_19 {dimension_numbers = #tpu.dot_dimension_numbers<[1], [0], [0], [1], [0, 0, 1, 1], [], []>} : vector<256x64xbf16>, vector<64x32xbf16>, vector<256x32xf32> -> vector<256x32xf32>
      %34 = arith.addf %29, %33 : vector<256x32xf32>
      %c0_20 = arith.constant 0 : index
      %c0_21 = arith.constant 0 : index
      %35 = vector.load %arg11[%c0_20, %c0_21] : memref<256x32xf32, #tpu.memory_space<vmem>>, vector<256x32xf32>
      tpu.vector_store %arg11[%c0_20, %c0_21], %34 {strides = array<i32>} : memref<256x32xf32, #tpu.memory_space<vmem>>, vector<256x32xf32>,
      %c0_i32_22 = arith.constant 0 : i32
      %36 = arith.cmpi eq, %arg1, %c0_i32_22 : i32
      %37 = arith.extui %36 : i1 to i32
      %c0_i32_23 = arith.constant 0 : i32
      %38 = arith.cmpi ne, %37, %c0_i32_23 : i32
      scf.if %38 {
        %c0_24 = arith.constant 0 : index
        %c0_25 = arith.constant 0 : index
        %39 = vector.load %arg11[%c0_24, %c0_25] : memref<256x32xf32, #tpu.memory_space<vmem>>, vector<256x32xf32>
        %c0_26 = arith.constant 0 : index
        %c0_27 = arith.constant 0 : index
        %c0_28 = arith.constant 0 : index
        %40 = vector.load %arg9[%c0_26, %c0_27, %c0_28] : memref<1x1x32xf32, #tpu.memory_space<vmem>>, vector<1x1x32xf32>
        %41 = vector.shape_cast %40 : vector<1x1x32xf32> to vector<1x32xf32>
        %42 = vector.broadcast %41 : vector<1x32xf32> to vector<256x32xf32>
        %43 = arith.addf %39, %42 : vector<256x32xf32>
        %c0_29 = arith.constant 0 : index
        %c0_30 = arith.constant 0 : index
        %44 = vector.load %arg5[%c0_29, %c0_30] : memref<256x1xf32, #tpu.memory_space<vmem>>, vector<256x1xf32>
        %45 = vector.broadcast %44 : vector<256x1xf32> to vector<256x32xf32>
        %46 = arith.mulf %45, %43 : vector<256x32xf32>
        %c0_31 = arith.constant 0 : index
        %c0_32 = arith.constant 0 : index
        %47 = vector.load %arg10[%c0_31, %c0_32] : memref<256x32xf32, #tpu.memory_space<vmem>>, vector<256x32xf32>
        tpu.vector_store %arg10[%c0_31, %c0_32], %46 {strides = array<i32>} : memref<256x32xf32, #tpu.memory_space<vmem>>, vector<256x32xf32>,
      } else {
      }
    } else {
    }
    return
  }
  func.func @transform_0(%arg0: i32, %arg1: i32, %arg2: memref<4xi32, #tpu.memory_space<smem>>, %arg3: memref<4xi32, #tpu.memory_space<smem>>) -> (i32, i32) {
    %c0_i32 = arith.constant 0 : i32
    %c0_i32_0 = arith.constant 0 : i32
    return %arg0, %c0_i32 : i32, i32
  }
  func.func @transform_1(%arg0: i32, %arg1: i32, %arg2: memref<4xi32, #tpu.memory_space<smem>>, %arg3: memref<4xi32, #tpu.memory_space<smem>>) -> (i32, i32) {
    %c0_i32 = arith.constant 0 : i32
    %c0_i32_0 = arith.constant 0 : i32
    return %arg0, %c0_i32 : i32, i32
  }
  func.func @transform_2(%arg0: i32, %arg1: i32, %arg2: memref<4xi32, #tpu.memory_space<smem>>, %arg3: memref<4xi32, #tpu.memory_space<smem>>) -> (i32, i32, i32) {
    %0 = arith.index_cast %arg0 : i32 to index
    %1 = memref.load %arg2[%0] : memref<4xi32, #tpu.memory_space<smem>>
    %2 = arith.index_cast %arg0 : i32 to index
    %3 = memref.load %arg3[%2] : memref<4xi32, #tpu.memory_space<smem>>
    %4 = arith.muli %arg1, %3 : i32
    %c0_i32 = arith.constant 0 : i32
    %c0_i32_0 = arith.constant 0 : i32
    return %1, %c0_i32, %4 : i32, i32, i32
  }
  func.func @transform_3(%arg0: i32, %arg1: i32, %arg2: memref<4xi32, #tpu.memory_space<smem>>, %arg3: memref<4xi32, #tpu.memory_space<smem>>) -> (i32, i32, i32) {
    %0 = arith.index_cast %arg0 : i32 to index
    %1 = memref.load %arg2[%0] : memref<4xi32, #tpu.memory_space<smem>>
    %2 = arith.index_cast %arg0 : i32 to index
    %3 = memref.load %arg3[%2] : memref<4xi32, #tpu.memory_space<smem>>
    %4 = arith.muli %arg1, %3 : i32
    %c0_i32 = arith.constant 0 : i32
    %c0_i32_0 = arith.constant 0 : i32
    return %1, %c0_i32, %4 : i32, i32, i32
  }
  func.func @transform_4(%arg0: i32, %arg1: i32, %arg2: memref<4xi32, #tpu.memory_space<smem>>, %arg3: memref<4xi32, #tpu.memory_space<smem>>) -> (i32, i32, i32) {
    %0 = arith.index_cast %arg0 : i32 to index
    %1 = memref.load %arg2[%0] : memref<4xi32, #tpu.memory_space<smem>>
    %2 = arith.index_cast %arg0 : i32 to index
    %3 = memref.load %arg3[%2] : memref<4xi32, #tpu.memory_space<smem>>
    %4 = arith.muli %arg1, %3 : i32
    %c0_i32 = arith.constant 0 : i32
    %c0_i32_0 = arith.constant 0 : i32
    return %1, %4, %c0_i32 : i32, i32, i32
  }
  func.func @transform_5(%arg0: i32, %arg1: i32, %arg2: memref<4xi32, #tpu.memory_space<smem>>, %arg3: memref<4xi32, #tpu.memory_space<smem>>) -> (i32, i32, i32) {
    %0 = arith.index_cast %arg0 : i32 to index
    %1 = memref.load %arg2[%0] : memref<4xi32, #tpu.memory_space<smem>>
    %c0_i32 = arith.constant 0 : i32
    %c0_i32_0 = arith.constant 0 : i32
    %c0_i32_1 = arith.constant 0 : i32
    return %1, %c0_i32, %c0_i32_0 : i32, i32, i32
  }
  func.func @transform_6(%arg0: i32, %arg1: i32, %arg2: memref<4xi32, #tpu.memory_space<smem>>, %arg3: memref<4xi32, #tpu.memory_space<smem>>) -> (i32, i32) {
    %c0_i32 = arith.constant 0 : i32
    %c0_i32_0 = arith.constant 0 : i32
    return %arg0, %c0_i32 : i32, i32
  }
}

</mosaic_0001>

<bundles_post_ra>
// kernel: custom-call
= control target key start
LH: loop header
LB: loop body
LE: loop exit
PB: predicated region body
PF: predicated region fallthrough
CT: control target
= control target key end

     0   :  { %s6_s0 = inlined_call_operand.vmem [shape: u32[4], index: 0, kind: output, shape index: {}]  }

// kernel: sparse_moe_forward.2
= control target key start
LH: loop header
LB: loop body
LE: loop exit
PB: predicated region body
PF: predicated region fallthrough
CT: control target
= control target key end

     0   :  { %12 = vsyncpa [#allocation6], 0  ;;  %vm44_vm0 = vcmask 261120   ;;  %s607_s0 = inlined_call_operand.vmem [shape: bf16[16,32], index: 0, kind: input, shape index: {}]   ;;  %s608_s1 = inlined_call_operand.vmem [shape: f32[32,4], index: 1, kind: input, shape index: {}]   ;;  %s609_s2 = inlined_call_operand.vmem [shape: f32[1,4], index: 2, kind: input, shape index: {}]   ;;  %s610_s3 = inlined_call_operand.vmem [shape: f32[1,1,16], index: 3, kind: output, shape index: {0}]   ;;  %s611_s4 = inlined_call_operand.vmem [shape: f32[1,1,16], index: 4, kind: output, shape index: {1}]   ;;  %s612_s5 = inlined_call_operand.hbm [shape: f32[1,1], index: 5, kind: output, shape index: {2}]   ;;  %s613_s6 = inlined_call_operand.hbm [shape: f32[1,1], index: 6, kind: output, shape index: {3}]  }
   0x1   :  { %v33_v0 = vld [vmem:[%s608_s1] sm:$0xff]  ;;  %v34_v1 = vld [vmem:[%s608_s1 + $0x8] sm:$0xff]  ;;  %v35_v2 = vld [vmem:[%s608_s1 + $0x10] sm:$0xff] }
   0x2   :  { %v388_v3 = vpack.c.bf16 %v34_v1, %v33_v0  ;;  %v36_v4 = vld [vmem:[%s608_s1 + $0x18] sm:$0xff]  ;;  %v368_v5 = vld [vmem:[%s607_s0] sm:$0xff]  }
   0x3   :  { %13 = vsyncpa [#allocation8], 0  ;;  %v392_v6 = vpack.c.bf16 %v36_v4, %v35_v2  ;;  %v369_v7 = vunpack.c.l.bf16 %v368_v5  ;;  %v370_v8 = vunpack.c.h.bf16 %v368_v5  ;;  %v362_v9 = vld [vmem:[%s609_s2] ss:$0 sm:$0xff]  ;;  %vm126_vm1 = vcmask 31744   ;;  %s468_s2 = smov [#allocation7]  }
   0x4   :  { %389 = vmatprep.subr.bf16.mxu0 %v388_v3  ;;  %vm24_vm2 = vcmask 24576   ;;  %v467_v26 = vmov 0.0   ;;  %v149_v46 = vlaneseq  ;;  %vm210_vm5 = vcmask 130112  }
   0x5   :  { %391 = vmatpush3.bf16.msra.mxu0 %v388_v3  ;;  %385 = vmatprep.mubr.msk.f32.mxu0 %vm44_vm0, %v369_v7  ;;  %25 = vst.msk [vmem:[#allocation2] sm:$0x1] %vm24_vm2, %v467_v26  ;;  %26 = vst.msk [vmem:[#allocation3] sm:$0x1] %vm24_vm2, %v467_v26  ;;  %vm213_vm6 = vcmask 122880   ;;  %vm27_vm7 = vcmask 0  }
   0x6   :  { %393 = vmatprep.subr.bf16.mxu0 %v392_v6  ;;  %v150_v47 = vand.u32 127, %v149_v46  ;;  %v202_v4 = vshrl.u32 %v149_v46, 7  ;;  %28 = vst.msk [vmem:[#allocation4] sm:$0x1] %vm27_vm7, %v467_v26 }
   0x8   :  { %v205_v5 = vadd.s32 4294967288, %v150_v47 }
   0x9   :  { %395 = vmatpush3.bf16.msra.mxu0 %v392_v6 }
   0xc   :  { %386 = vmatmul.mubr.msk.f32.vlgmr.msra.gmra.mrb[0].mxu0 %vm44_vm0, %v370_v8  ;;  %v260_v43 = vld [vmem:[#allocation3] sm:$0x1] }
  0xdf   :  { %v387_v10 = vpop.f32.mrb[0].mxu0 }
  0xe0   :  { %v117_v11 = vpop.f32.mrb[1].mxu0  ;;  %v123_v13 = vadd.f32 %v387_v10, %v362_v9 }
  0xe1   :  { %v118_v12 = vadd.f32 %v362_v9, %v117_v11  ;;  %v553_v11 = vsub.s32 %v150_v47, %v202_v4 }
  0xe2   :  { %v130_v15 = vsel %vm126_vm1, %v123_v13, -inf }
  0xe3   :  { %v127_v14 = vsel %vm126_vm1, %v118_v12, -inf }
  0xe4   :  { %128 = vmax.xlane.f32.xlu0 %v127_v14 }
  0xe8   :  { %131 = vmax.xlane.f32.xlu0 %v130_v15 }
 0x171   :  { %v129_v16 = vpop.xlane.xlu0 %128 }
 0x172   :  { %v133_v17 = vsub.f32 %v118_v12, %v129_v16  ;;  %v555_v12 = vsub.s32 %v205_v5, %v202_v4 }
 0x174   :  { %v135_v18 = vmul.f32 1.442695, %v133_v17 }
 0x175   :  { %v132_v19 = vpop.xlane.xlu0 %131 }
 0x176   :  { %399 = vpow2.f32 %v135_v18  ;;  %v134_v20 = vsub.f32 %v123_v13, %v132_v19  ;;  %v247_v19 = vld [vmem:[#allocation2] sm:$0x1] }
 0x178   :  { %v137_v21 = vmul.f32 1.442695, %v134_v20 }
 0x17a   :  { %401 = vpow2.f32 %v137_v21 }
 0x180   :  { %v400_v22 = vpop.eup %399 }
 0x181   :  { %v139_v23 = vsel %vm126_vm1, %v400_v22, 0.0 }
 0x182   :  { %140 = vadd.xlane.f32.xlu1 %v139_v23 }
 0x184   :  { %v402_v24 = vpop.eup %401 }
 0x185   :  { %v142_v25 = vsel %vm126_vm1, %v402_v24, 0.0 }
 0x186   :  { %143 = vadd.xlane.f32.xlu1 %v142_v25 }
 0x20f   :  { %v141_v27 = vpop.xlane.xlu1 %140 }
 0x210   :  { %403 = vrcp.f32 %v141_v27 }
 0x213   :  { %v144_v28 = vpop.xlane.xlu1 %143 }
 0x214   :  { %405 = vrcp.f32 %v144_v28 }
 0x21a   :  { %v404_v29 = vpop.eup %403 }
 0x21b   :  { %v146_v30 = vmul.f32 %v404_v29, %v400_v22 }
 0x21d   :  { %v151_v31 = vsel %vm126_vm1, %v146_v30, -inf  ;;  %v263_v34 = vsel %vm126_vm1, %v146_v30, 0.0 }
 0x21e   :  { %v406_v32 = vpop.eup %405  ;;  %152 = vmax.xlane.f32.xlu0 %v151_v31 }
 0x21f   :  { %v148_v33 = vmul.f32 %v406_v32, %v402_v24 }
 0x221   :  { %v154_v35 = vsel %vm126_vm1, %v148_v33, -inf  ;;  %v264_v36 = vsel %vm126_vm1, %v148_v33, 0.0 }
 0x222   :  { %v265_v37 = vadd.f32 %v264_v36, %v263_v34  ;;  %155 = vmax.xlane.f32.xlu1 %v154_v35 }
 0x224   :  { %v266_v38 = vrot.slane %v265_v37, 4 }
 0x226   :  { %v267_v39 = vadd.f32 %v266_v38, %v265_v37 }
 0x228   :  { %v268_v40 = vrot.slane %v267_v39, 2 }
 0x22a   :  { %v269_v41 = vadd.f32 %v268_v40, %v267_v39 }
 0x22c   :  { %v270_v42 = vrot.slane %v269_v41, 1 }
 0x22e   :  { %v271_v44 = vadd.f32 %v270_v42, %v269_v41 }
 0x230   :  { %v272_v45 = vadd.f32 %v271_v44, %v260_v43 }
 0x232   :  { %273 = vst.msk [vmem:[#allocation3] sm:$0x1] %vm24_vm2, %v272_v45 }
 0x239   :  { %v312_v29 = vld [vmem:[#allocation3] sm:$0x1] }
 0x23a   :  { %v313_v34 = vmul.f32 0.0625, %v312_v29 }
 0x2ab   :  { %v536_v48 = vpop.xlane.xlu0 %152 }
 0x2ac   :  { %v274_v49 = vsub.f32 %v146_v30, %v536_v48  ;;  %vm157_vm3 = vcmp.eq.f32.partialorder %v146_v30, %v536_v48  ;;  %407 = vrcp.f32 %v536_v48 }
 0x2ad   :  { %v159_v50 = vsel %vm157_vm3, %v150_v47, 4  ;;  %v365_v55 = vsel %vm157_vm3, 1.0, %v467_v26 }
 0x2ae   :  { %v276_v51 = vmul.f32 1.442695, %v274_v49  ;;  %v161_v52 = vsel %vm126_vm1, %v159_v50, 2147483647  ;;  %v248_v61 = vsel %vm126_vm1, %v365_v55, 0.0 }
 0x2af   :  { %v542_v53 = vpop.xlane.xlu1 %155  ;;  %v163_v54 = vshra.s32 %v161_v52, 16  ;;  %v162_v28 = vand.u32 65535, %v161_v52 }
 0x2b0   :  { %409 = vpow2.f32 %v276_v51  ;;  %v275_v56 = vsub.f32 %v148_v33, %v542_v53  ;;  %vm158_vm4 = vcmp.eq.f32.partialorder %v148_v33, %v542_v53 }
 0x2b1   :  { %411 = vrcp.f32 %v542_v53  ;;  %v165_v57 = vcvt.s32.f32 %v163_v54  ;;  %v160_v58 = vsel %vm158_vm4, %v150_v47, 4  ;;  %v366_v59 = vsel %vm158_vm4, 1.0, %v467_v26 }
 0x2b2   :  { %v278_v60 = vmul.f32 1.442695, %v275_v56  ;;  %v176_v62 = vsel %vm126_vm1, %v160_v58, 2147483647  ;;  %v249_v63 = vsel %vm126_vm1, %v366_v59, 0.0  ;;  %v164_v32 = vcvt.s32.f32 %v162_v28 }
 0x2b3   :  { %166 = vmin.xlane.f32.xlu0 %v165_v57  ;;  %v178_v0 = vshra.s32 %v176_v62, 16  ;;  %v250_v1 = vadd.f32 %v249_v63, %v248_v61  ;;  %v177_v33 = vand.u32 65535, %v176_v62  ;;  %v292_v58 = vld [vmem:[#allocation4] sm:$0x1] }
 0x2b4   :  { %413 = vpow2.f32 %v278_v60 }
 0x2b5   :  { %v180_v2 = vcvt.s32.f32 %v178_v0  ;;  %v251_v3 = vrot.slane %v250_v1, 4  ;;  %v179_v38 = vcvt.s32.f32 %v177_v33 }
 0x2b6   :  { %v408_v6 = vpop.eup %407 }
 0x2b7   :  { %181 = vmin.xlane.f32.xlu1 %v180_v2  ;;  %v252_v7 = vadd.f32 %v251_v3, %v250_v1  ;;  %v192_v10 = vmul.f32 %v408_v6, %v536_v48 }
 0x2b9   :  { %v253_v8 = vrot.slane %v252_v7, 2  ;;  %v220_v20 = vrot.slane %v192_v10, %v553_v11 }
 0x2ba   :  { %v410_v9 = vpop.eup %409 }
 0x2bb   :  { %v412_v13 = vpop.eup %411  ;;  %v254_v14 = vadd.f32 %v253_v8, %v252_v7  ;;  %v280_v15 = vsel %vm126_vm1, %v410_v9, 0.0 }
 0x2bc   :  { %v194_v16 = vmul.f32 %v412_v13, %v542_v53  ;;  %281 = vadd.xlane.f32.xlu0 %v280_v15 }
 0x2bd   :  { %v255_v17 = vrot.slane %v254_v14, 1 }
 0x2be   :  { %v414_v18 = vpop.eup %413  ;;  %v224_v21 = vrot.slane %v194_v16, %v555_v12 }
 0x2bf   :  { %v256_v22 = vadd.f32 %v255_v17, %v254_v14  ;;  %v283_v23 = vsel %vm126_vm1, %v414_v18, 0.0 }
 0x2c0   :  { %284 = vadd.xlane.f32.xlu1 %v283_v23  ;;  %v225_v24 = vsel %vm210_vm5, %v224_v21, %v220_v20 }
 0x2c1   :  { %v257_v25 = vadd.f32 %v256_v22, %v247_v19  ;;  %227 = vst.msk [vmem:[%s611_s4] sm:$0x1] %vm213_vm6, %v225_v24  ;;  %s346_s4 = sshll.u32 %s468_s2, 4  ;;  %s347_s4 = int_to_ptr.vmem [resolvable:$true] %s346_s4 }
 0x2c2   :  { %s419_s9 = scalar_lea.vmem %s347_s4, 16  ;;  %s423_s10 = scalar_lea.vmem %s347_s4, 32 }
 0x2c3   :  { %259 = vst.msk [vmem:[#allocation2] sm:$0x1] %vm24_vm2, %v257_v25  ;;  %p420_p0 = scmp.ne.s32.totalorder %s347_s4, %s419_s9  ;;  %p424_p1 = scmp.lt.s32.totalorder %s347_s4, %s347_s4 }
 0x2c4   :  { %p425_p2 = scmp.lt.s32.totalorder %s423_s10, %s419_s9 }
 0x2c6   :  { %p426_p3 = por %p425_p2, %p424_p1 }
 0x2c8   :  { %p427_p4 = pnand %p426_p3, %p420_p0 }
 0x2ca   :  { %v310_v27 = vld [vmem:[#allocation2] sm:$0x1] }
 0x2cb   :  { %v311_v30 = vmul.f32 0.0625, %v310_v27 }
 0x2cd   :  { %v314_v36 = vmul.f32 %v313_v34, %v311_v30 }
 0x2cf   :  { %v315_v40 = vsel %vm24_vm2, %v314_v36, 0.0 }
 0x340   :  { %v167_v31 = vpop.xlane.xlu0 %166 }
 0x341   :  { %vm168_vm8 = vcmp.eq.f32.partialorder %v165_v57, %v167_v31 }
 0x342   :  { %v169_v35 = vsel %vm168_vm8, %v164_v32, inf }
 0x343   :  { %170 = vmin.xlane.f32.xlu0 %v169_v35 }
 0x344   :  { %v182_v37 = vpop.xlane.xlu1 %181 }
 0x345   :  { %vm183_vm9 = vcmp.eq.f32.partialorder %v180_v2, %v182_v37 }
 0x346   :  { %v184_v39 = vsel %vm183_vm9, %v179_v38, inf }
 0x347   :  { %185 = vmin.xlane.f32.xlu1 %v184_v39  ;;  %316 = vadd.xlane.f32.xlu0 %v315_v40 }
 0x349   :  { %v282_v26 = vpop.xlane.xlu0 %281 }
 0x34a   :  { %415 = vlog2.f32 %v282_v26 }
 0x34d   :  { %v285_v41 = vpop.xlane.xlu1 %284 }
 0x34e   :  { %417 = vlog2.f32 %v285_v41 }
 0x354   :  { %v416_v42 = vpop.eup %415 }
 0x355   :  { %v287_v43 = vmul.f32 0.6931472, %v416_v42 }
 0x357   :  { %v290_v45 = vadd.f32 %v287_v43, %v536_v48 }
 0x358   :  { %v418_v44 = vpop.eup %417 }
 0x359   :  { %v289_v46 = vmul.f32 0.6931472, %v418_v44  ;;  %v293_v49 = vmul.f32 %v290_v45, %v290_v45 }
 0x35b   :  { %v291_v47 = vadd.f32 %v289_v46, %v542_v53 }
 0x35d   :  { %v294_v50 = vmul.f32 %v291_v47, %v291_v47 }
 0x35f   :  { %v297_v51 = vadd.f32 %v294_v50, %v293_v49 }
 0x361   :  { %v298_v52 = vrot.slane %v297_v51, 4 }
 0x363   :  { %v299_v54 = vadd.f32 %v298_v52, %v297_v51 }
 0x365   :  { %v300_v55 = vrot.slane %v299_v54, 2 }
 0x367   :  { %v301_v56 = vadd.f32 %v300_v55, %v299_v54 }
 0x369   :  { %v302_v57 = vrot.slane %v301_v56, 1 }
 0x36b   :  { %v303_v59 = vadd.f32 %v302_v57, %v301_v56 }
 0x36d   :  { %v304_v60 = vadd.f32 %v303_v59, %v292_v58 }
 0x36f   :  { %306 = vst.msk [vmem:[#allocation4] sm:$0x1] %vm27_vm7, %v304_v60 }
 0x376   :  { %v322_v61 = vld [vmem:[#allocation4] sm:$0x1] }
 0x377   :  { %v323_v48 = vmul.f32 0.1, %v322_v61 }
 0x379   :  { %v324_v62 = vmul.f32 0.0625, %v323_v48 }
 0x37b   :  { %325 = vst.msk [vmem:[#allocation7] sm:$0x1] %vm27_vm7, %v324_v62 }
 0x37c   :  { %430 = shalt.err (!%p427_p4)
}
 0x37d   :  { %s431_s13 = scalar_lea.hbm %s613_s6, 16 }
 0x37e   :  { %p432_p5 = scmp.ne.s32.totalorder %s613_s6, %s431_s13  ;;  %p435_p6 = scmp.lt.u32.totalorder %s431_s13, %s613_s6 }
 0x380   :  { %p437_p7 = pnand %p435_p6, %p432_p5 }
 0x382   :  { %440 = shalt.err (!%p437_p7)
}
 0x383   :  { %349 = dma.vmem_to_hbm [thread:$0]  %s347_s4, 16, %s613_s6, [#allocation8]   ;;  %v173_v53 = vcvt.f32.s32 %v167_v31  ;;  %v188_v1 = vcvt.f32.s32 %v182_v37 }
 0x384   :  { %s469_s20 = smov [#allocation5]  }
 0x385   :  { %v174_v0 = vshll.u32 %v173_v53, 16  ;;  %s336_s21 = sshll.u32 %s469_s20, 4  ;;  %v189_v6 = vshll.u32 %v188_v1, 16  ;;  %s337_s21 = int_to_ptr.vmem [resolvable:$true] %s336_s21 }
 0x386   :  { %s441_s6 = scalar_lea.vmem %s337_s21, 16  ;;  %s445_s22 = scalar_lea.vmem %s337_s21, 32 }
 0x387   :  { %p442_p8 = scmp.ne.s32.totalorder %s337_s21, %s441_s6  ;;  %p446_p9 = scmp.lt.s32.totalorder %s337_s21, %s337_s21 }
 0x388   :  { %p447_p10 = scmp.lt.s32.totalorder %s445_s22, %s441_s6 }
 0x38a   :  { %p448_p11 = por %p447_p10, %p446_p9 }
 0x38c   :  { %p449_p12 = pnand %p448_p11, %p442_p8 }
 0x3d0   :  { %v171_v63 = vpop.xlane.xlu0 %170 }
 0x3d1   :  { %v172_v2 = vcvt.f32.s32 %v171_v63 }
 0x3d3   :  { %v175_v3 = vadd.s32 %v174_v0, %v172_v2 }
 0x3d4   :  { %v186_v4 = vpop.xlane.xlu1 %185  ;;  %v317_v5 = vpop.xlane.xlu0 %316 }
 0x3d5   :  { %v187_v7 = vcvt.f32.s32 %v186_v4  ;;  %v319_v8 = vmul.f32 0.25, %v317_v5  ;;  %v197_v9 = vcvt.s32.f32 %v175_v3 }
 0x3d7   :  { %v190_v10 = vadd.s32 %v189_v6, %v187_v7  ;;  %v320_v13 = vmul.f32 0.01, %v319_v8 }
 0x3d9   :  { %v198_v14 = vcvt.s32.f32 %v190_v10  ;;  %321 = vst.msk [vmem:[#allocation5] sm:$0x1] %vm27_vm7, %v320_v13 }
 0x3da   :  { %452 = shalt.err (!%p449_p12)
}
 0x3db   :  { %s453_s25 = scalar_lea.hbm %s612_s5, 16 }
 0x3dc   :  { %p454_p13 = scmp.ne.s32.totalorder %s612_s5, %s453_s25  ;;  %p457_p0 = scmp.lt.u32.totalorder %s453_s25, %s612_s5 }
 0x3de   :  { %p459_p1 = pnand %p457_p0, %p454_p13 }
 0x3e0   :  { %462 = shalt.err (!%p459_p1)
}
 0x3e1   :  { %339 = dma.vmem_to_hbm [thread:$0]  %s337_s21, 16, %s612_s5, [#allocation6]   ;;  %v204_v15 = vrot.slane %v197_v9, %v553_v11  ;;  %v209_v16 = vrot.slane %v198_v14, %v555_v12 }
 0x3e3   :  { %v211_v17 = vsel %vm210_vm5, %v209_v16, %v204_v15 }
 0x3e4   :  { %214 = vst.msk [vmem:[%s610_s3] sm:$0x1] %vm213_vm6, %v211_v17 }
 0x3e5   :  { %463 = dma.done.wait [#allocation6], 16  }
 0x3e6   :  { %464 = vsyncadd [#allocation6], 4294967280 }
 0x3e7   :  { %465 = dma.done.wait [#allocation8], 16  }
 0x3e8   :  { %466 = vsyncadd [#allocation8], 4294967280 }
 0x3e9   :  { %360 = vsyncpa [#allocation6], 1 }
 0x3ea   :  { %361 = vsyncpa [#allocation8], 1 }

// kernel: sparse_moe_forward.3
= control target key start
LH: loop header
LB: loop body
LE: loop exit
PB: predicated region body
PF: predicated region fallthrough
CT: control target
= control target key end

     0   :  { %s4366_s0 = inlined_call_operand.hbm [shape: s32[4], index: 0, kind: input, shape index: {}]   ;;  %s4367_s2 = inlined_call_operand.hbm [shape: bf16[1024,32], index: 2, kind: input, shape index: {}]   ;;  %s4368_s3 = inlined_call_operand.hbm [shape: f32[1024,1], index: 3, kind: input, shape index: {}]   ;;  %s4369_s4 = inlined_call_operand.hbm [shape: bf16[4,32,64], index: 4, kind: input, shape index: {}]   ;;  %s4370_s5 = inlined_call_operand.hbm [shape: f32[4,1,64], index: 5, kind: input, shape index: {}]   ;;  %s4371_s6 = inlined_call_operand.hbm [shape: bf16[4,64,32], index: 6, kind: input, shape index: {}]   ;;  %s4372_s7 = inlined_call_operand.hbm [shape: f32[4,1,32], index: 7, kind: input, shape index: {}]   ;;  %s4373_s8 = inlined_call_operand.hbm [shape: f32[1024,32], index: 8, kind: output, shape index: {}]   ;;  %s4374_s1 = inlined_call_operand.hbm [shape: s32[4], index: 1, kind: input, shape index: {}]  }
   0x1   :  { %4410 = sst [smem:[#allocation51_spill]] %s4367_s2  ;;  %s2592_s29 = scalar_lea.hbm %s4366_s0, 16 }
   0x2   :  { %4411 = sst [smem:[#allocation52_spill]] %s4368_s3  ;;  %p2593_p0 = scmp.ne.s32.totalorder %s4366_s0, %s2592_s29 }
   0x3   :  { %4412 = sst [smem:[#allocation53_spill]] %s4369_s4  ;;  %p2596_p1 = scmp.lt.u32.totalorder %s2592_s29, %s4366_s0 }
   0x4   :  { %4413 = sst [smem:[#allocation54_spill]] %s4370_s5 }
   0x5   :  { %4414 = sst [smem:[#allocation55_spill]] %s4371_s6  ;;  %p2598_p2 = pnand %p2596_p1, %p2593_p0 }
   0x6   :  { %4415 = sst [smem:[#allocation56_spill]] %s4372_s7 }
   0x7   :  { %4416 = sst [smem:[#allocation57_spill]] %s4373_s8 }
   0x8   :  { %2601 = shalt.err (!%p2598_p2)  }
   0x9   :  { %s2994_s12 = smov [#allocation4]   ;;  %s2602_s17 = scalar_lea.hbm %s4374_s1, 16 }
   0xa   :  { %14 = dma.hbm_to_smem %s4366_s0, 16, %s2994_s12, [#allocation3] }
   0xb   :  { %p2603_p3 = scmp.ne.s32.totalorder %s4374_s1, %s2602_s17  ;;  %p2606_p4 = scmp.lt.u32.totalorder %s2602_s17, %s4374_s1 }
   0xd   :  { %p2608_p5 = pnand %p2606_p4, %p2603_p3 }
   0xf   :  { %2611 = shalt.err (!%p2608_p5)  }
  0x10   :  { %s2995_s22 = smov [#allocation5]  }
  0x11   :  { %16 = dma.hbm_to_smem %s4374_s1, 16, %s2995_s22, [#allocation3] }
  0x12   :  { %2892 = dma.done.wait [#allocation3], 32 }
  0x13   :  { %2893 = vsyncadd [#allocation3], 4294967264 }
  0x14   :  { %18 = sfence }
  0x15   :  { %19 = vsyncpa [#allocation7], 0 }
  0x16   :  { %21 = vsyncpa [#allocation7 + $0x1], 0 }
  0x17   :  { %22 = vsyncpa [#allocation10], 0 }
  0x18   :  { %24 = vsyncpa [#allocation10 + $0x1], 0 }
  0x19   :  { %25 = vsyncpa [#allocation13], 0 }
  0x1a   :  { %27 = vsyncpa [#allocation13 + $0x1], 0 }
  0x1b   :  { %28 = vsyncpa [#allocation16], 0 }
  0x1c   :  { %30 = vsyncpa [#allocation16 + $0x1], 0 }
  0x1d   :  { %31 = vsyncpa [#allocation8], 0 }
  0x1e   :  { %33 = vsyncpa [#allocation8 + $0x1], 0  ;;  %s3080_s0 = smov 0   ;;  %s3082_s25 = smov 0  }
  0x1f   :  { %s3084_s26 = smov 0   ;;  %s3086_s1 = smov 0  }
  0x20   :  { %s3088_s27 = smov 0   ;;  %s3090_s28 = smov 0  }
  0x21   :  { %s3092_s29 = smov 0   ;;  %s3094_s30 = smov 0  }
  0x22   :  { %s3096_s9 = smov 0   ;;  %s3098_s10 = smov 0  }
  0x23   :  { %s3100_s11 = smov 0   ;;  %s3102_s12 = smov 0  }
  0x24   :  { %s3104_s13 = smov 0   ;;  %s3106_s14 = smov 0  }
  0x25   :  { %s3108_s15 = smov 0   ;;  %s3110_s16 = smov 0  }
  0x26   :  { %4417 = sst [smem:[#allocation34_spill]] %s3110_s16  ;;  %s3112_s17 = smov 0  }
  0x27   :  { %s3114_s18 = smov 0  }
  0x28 LB: > { %s4419_s16 = sld [smem:[#allocation34_spill]]  ;;  %4421 = sst [smem:[#allocation35_spill]] %s2928_s25  ;;  %s2992_s18 = sphi %s3114_s18, %s39_s18   ;;  %s2988_s17 = sphi %s3112_s17, %s4535_s17   ;;  %s2980_s15 = sphi %s3108_s15, %s4533_s15   ;;  %s2976_s14 = sphi %s3106_s14, %s4523_s14   ;;  %s2972_s13 = sphi %s3104_s13, %s4522_s13   ;;  %s2968_s12 = sphi %s3102_s12, %s4532_s12   ;;  %s2964_s11 = sphi %s3100_s11, %s4531_s11   ;;  %s2960_s10 = sphi %s3098_s10, %s4530_s10   ;;  %s2956_s9 = sphi %s3096_s9, %s4520_s9   ;;  %s2952_s30 = sphi %s3094_s30, %s4519_s30   ;;  %s2948_s29 = sphi %s3092_s29, %s4518_s29   ;;  %s2944_s28 = sphi %s3090_s28, %s4529_s28   ;;  %s2940_s27 = sphi %s3088_s27, %s4528_s27   ;;  %s2936_s1 = sphi %s3086_s1, %s4527_s1   ;;  %s2932_s26 = sphi %s3084_s26, %s4526_s26   ;;  %s2928_s25 = sphi %s3082_s25, %s4525_s25   ;;  %s2924_s0 = sphi %s3080_s0, %s4515_s0  }
  0x29   : > { %4420 = sst [smem:[#allocation34_spill]] %s2924_s0  ;;  %s3171_s19 = sadd.s32 4294967295, %s2992_s18  }
  0x2a   : > { %4422 = sst [smem:[#allocation36_spill]] %s2932_s26  ;;  %s2091_s20 = sadd.s32 4294967294, %s2992_s18  }
  0x2b   : > { %4423 = sst [smem:[#allocation37_spill]] %s2952_s30  ;;  %s51_s21 = sadd.s32 1, %s2988_s17 }
  0x2c   : > { %4424 = sst [smem:[#allocation38_spill]] %s2956_s9  ;;  %s58_s22 = sadd.s32 1, %s2980_s15 }
  0x2d   : > { %4425 = sst [smem:[#allocation39_spill]] %s2972_s13  ;;  %p53_p6 = scmp.ge.s32.totalorder %s51_s21, 4 }
  0x2e   : > { %4426 = sst [smem:[#allocation40_spill]] %s2976_s14  ;;  %p65_p7 = scmp.ne.s32.totalorder %s2980_s15, %s2976_s14 }
  0x2f   : > { %4427 = sst [smem:[#allocation41_spill]] %s2980_s15  ;;  %p4390_p8 = scmp.eq.s32.totalorder %s2992_s18, 0 }
  0x30   : > { %4428 = sst [smem:[#allocation42_spill]] %s4419_s16  ;;  %p71_p9 = scmp.ne.s32.totalorder %s2976_s14, %s2972_s13 }
  0x31   : > { %s4537_s21 = smov (%p53_p6, %s51_s21), 0  ;;  %p3185_p10 = por %p4390_p8, %p65_p7 }
  0x32   : > { %p4389_p11 = scmp.eq.s32.totalorder %s3171_s19, 0  ;;  %s55_s24 = ssub.s32 %s2988_s17, %s4537_s21 }
  0x33   : > { %p251_p12 = scmp.eq.s32.totalorder %s3171_s19, 3  ;;  %p56_p13 = scmp.eq.s32.totalorder %s55_s24, 0 }
  0x34   : > { %p3195_p0 = por %p4389_p11, %p71_p9  ;;  %p257_p2 = scmp.eq.s32.totalorder %s2091_s20, 3 }
  0x35   : > { %p3199_p1 = por %p251_p12, %p65_p7  ;;  %p4388_p4 = scmp.lt.s32.totalorder %s2992_s18, 4 }
  0x36   : > { %s4430_s8 = scalar_select %p3195_p0, 1, 0 }
  0x37   : > { %s4432_s13 = scalar_select %p3199_p1, 1, 0 }
  0x38   : > { %4431 = sst [smem:[#allocation43_spill]] %s4430_s8  ;;  %p3206_p3 = por %p257_p2, %p71_p9 }
  0x39   : > { %4433 = sst [smem:[#allocation44_spill]] %s4432_s13  ;;  %s3212_s7 = sand.u32 1, %s2980_s15  }
  0x3a   : > { %s3204_s16 = scalar_select %p56_p13, %s2980_s15, %s58_s22  }
  0x3b   : > { %s4435_s14 = scalar_select %p3206_p3, 1, 0 }
  0x3c   : > { %4434 = sst [smem:[#allocation45_spill]] %s3204_s16  ;;  %s2097_s6 = sshll.u32 %s3212_s7, 8 }
  0x3d   : > { %4436 = sst [smem:[#allocation46_spill]] %s4435_s14  ;;  %p3220_p5 = pnand %p4388_p4, %p3185_p10 }
  0x3e   : > { %s2177_s20 = sshll.u32 %s2988_s17, 12  ;;  %s4438_s3 = sld [smem:[#allocation52_spill]] }
  0x3f   : > { %s302_s24 = scalar_lea.vmem [#allocation9], %s2097_s6  ;;  %s4439_s23 = sand.u32 1, %s2992_s18  }
  0x40   : > { %s309_s15 = sshll.u32 %s302_s24, 4  ;;  %s3234_s14 = scalar_lea.sflag [#allocation10], %s4439_s23  ;;  %s3230_s15 = int_to_ptr.vmem [resolvable:$true] %s309_s15 }
  0x41   : > { %4440 = sst [smem:[#allocation47_spill]] %s3234_s14  ;;  %p4400_p7 = pneg %p3220_p5 }
  0x44   : > { %s3228_s13 = scalar_lea.hbm %s4438_s3, %s2177_s20  ;;  %s2617_s22 = scalar_lea.hbm %s4438_s3, 16384 }
  0x45   : > { %s2612_s0 = scalar_lea.hbm %s3228_s13, 4096  ;;  %p2618_p12 = scmp.lt.u32.totalorder %s3228_s13, %s4438_s3 }
  0x46   : > { %p2613_p6 = scmp.ne.s32.totalorder %s3228_s13, %s2612_s0  ;;  %p2619_p13 = scmp.lt.u32.totalorder %s2617_s22, %s2612_s0 }
  0x47   : > { %p2621_p4 = scmp.lt.u32.totalorder %s2612_s0, %s3228_s13 }
  0x48   : > { %p2615_p9 = pnand %p4400_p7, %p2613_p6  ;;  %p2620_p2 = por %p2619_p13, %p2618_p12 }
  0x4a   : > { %p2616_p10 = pneg %p2615_p9  ;;  %p2622_p11 = por %p2621_p4, %p2620_p2 }
  0x4c   : > { %p2623_p8 = pnand %p2622_p11, %p2616_p10 }
  0x4e   : > { %2626 = shalt.err (!%p2623_p8)
}
  0x4f   : > { %s2627_s24 = scalar_lea.vmem %s3230_s15, 4096  ;;  %s2996_s23 = smov [#allocation9]  }
  0x50   : > { %p2628_p6 = scmp.ne.s32.totalorder %s3230_s15, %s2627_s24  ;;  %s2632_s16 = sshll.u32 %s2996_s23, 4  ;;  %s2633_s16 = int_to_ptr.vmem [resolvable:$false] %s2632_s16 }
  0x51   : > { %s2634_s26 = scalar_lea.vmem %s2633_s16, 8192  ;;  %p2635_p1 = scmp.lt.s32.totalorder %s3230_s15, %s2633_s16 }
  0x52   : > { %p2630_p9 = pnand %p2628_p6, %p4400_p7  ;;  %p2636_p12 = scmp.lt.s32.totalorder %s2634_s26, %s2627_s24 }
  0x54   : > { %p2631_p3 = pneg %p2630_p9  ;;  %p2637_p13 = por %p2636_p12, %p2635_p1 }
  0x56   : > { %p2638_p4 = pnand %p2637_p13, %p2631_p3 }
  0x58   : > { %2641 = shalt.err (!%p2638_p4)
}
  0x59   : > { %s2997_s0 = smov 128   ;;  %s2998_s20 = smov 8  }
  0x5a   : > { %2323 = dma.hbm_to_vmem [thread:$0]  (!%p3220_p5), %s3228_s13, 4096, %s3230_s15, %s3234_s14, %s2997_s0, %s2997_s0, %s2998_s20  }
  0x5b   : > { %p2108_p8 = scmp.ge.s32.totalorder %s2992_s18, 1  ;;  %p407_p11 = scmp.lt.s32.totalorder %s2992_s18, 5 }
  0x5c   : > { %s141_s6 = sld [smem:[#allocation4 + %s2988_s17]]  ;;  %s152_s23 = sadd.s32 1, %s2956_s9 }
  0x5d   : > { %p3264_p1 = pnand %p2108_p8, %p407_p11  ;;  %s144_s24 = sld [smem:[#allocation4 + %s4537_s21]] }
  0x5e   : > { %p159_p3 = scmp.ne.s32.totalorder %s2956_s9, %s2952_s30  ;;  %p165_p10 = scmp.ne.s32.totalorder %s2952_s30, %s2948_s29 }
  0x5f   : > { %s4441_s22 = scalar_select %p3264_p1, 1, 0 }
  0x60   : > { %s346_s16 = sand.u32 1, %s2956_s9   ;;  %p4443_p2 = scmp.eq.s32.totalorder %s2992_s18, 0 }
  0x61   : > { %4442 = sst [smem:[#allocation48_spill]] %s4441_s22  ;;  %p4444_p9 = scmp.eq.s32.totalorder %s3171_s19, 0 }
  0x62   : > { %p161_p6 = por %p159_p3, %p4443_p2  ;;  %s347_s0 = scalar_lea.vmem [#allocation12], %s346_s16 }
  0x63   : > { %p3280_p12 = por %p165_p10, %p4444_p9  ;;  %s147_s26 = ssub.s32 %s141_s6, %s144_s24 }
  0x64   : > { %s2300_s15 = scalar_select %p161_p6, [#allocation4], [#allocation19] }
  0x65   : > { %s4445_s13 = scalar_select %p3280_p12, 1, 0 }
  0x66   : > { %s358_s20 = sshll.u32 %s347_s0, 4  ;;  %p150_p13 = scmp.eq.s32.totalorder %s147_s26, 0  ;;  %s3284_s20 = int_to_ptr.vmem [resolvable:$true] %s358_s20 }
  0x67   : > { %4446 = sst [smem:[#allocation49_spill]] %s4445_s13  ;;  %p4448_p4 = scmp.lt.s32.totalorder %s2992_s18, 4 }
  0x68   : > { %s2301_s3 = scalar_select %p161_p6, %s2988_s17, 0 }
  0x69   : > { %s3288_s29 = scalar_select %p150_p13, %s2956_s9, %s152_s23  }
  0x6a   : > { %s4539_s15 = smov (!%p4448_p4, %s2300_s15), [#allocation23]  ;;  %p4449_p8 = pmov %p4448_p4 }
  0x6b   : > { %4447 = sst [smem:[#allocation50_spill]] %s3288_s29  ;;  %p4450_p11 = pmov %p4448_p4 }
  0x6c   : > { %s4541_s3 = smov (!%p4449_p8, %s2301_s3), 0  ;;  %s2094_s24 = sshll.u32 %s3212_s7, 7 }
  0x6d   : > { %p3296_p3 = pnand %p4450_p11, %p161_p6  ;;  %s348_s6 = sld [smem:[%s4539_s15 + %s4541_s3]] }
  0x6e   : > { %s2176_s16 = sshll.u32 %s2988_s17, 11  ;;  %s4452_s2 = sld [smem:[#allocation51_spill]] }
  0x6f   : > { %s281_s23 = scalar_lea.vmem [#allocation6], %s2094_s24  ;;  %s4453_s5 = sld [smem:[#allocation54_spill]] }
  0x70   : > { %s288_s29 = sshll.u32 %s281_s23, 4  ;;  %s4454_s4 = sand.u32 1, %s2992_s18   ;;  %s3307_s29 = int_to_ptr.vmem [resolvable:$true] %s288_s29 }
  0x71   : > { %s3316_s3 = scalar_lea.sflag [#allocation13], %s4454_s4  ;;  %p2644_p2 = pneg %p3296_p3 }
  0x73   : > { %s2103_s9 = sshll.u32 %s348_s6, 4 }
  0x74   : > { %s3305_s13 = scalar_lea.hbm %s4452_s2, %s2176_s16 }
  0x75   : > { %s3312_s14 = scalar_lea.hbm %s4453_s5, %s2103_s9  ;;  %s2647_s25 = scalar_lea.hbm %s4453_s5, 64 }
  0x76   : > { %s2642_s15 = scalar_lea.hbm %s3312_s14, 16  ;;  %p2648_p13 = scmp.lt.u32.totalorder %s3312_s14, %s4453_s5 }
  0x77   : > { %p2643_p10 = scmp.ne.s32.totalorder %s3312_s14, %s2642_s15  ;;  %p2649_p4 = scmp.lt.u32.totalorder %s2647_s25, %s2642_s15 }
  0x78   : > { %p2651_p11 = scmp.lt.u32.totalorder %s2642_s15, %s3312_s14 }
  0x79   : > { %p2645_p6 = pnand %p2644_p2, %p2643_p10  ;;  %p2650_p8 = por %p2649_p4, %p2648_p13 }
  0x7b   : > { %p2646_p9 = pneg %p2645_p6  ;;  %p2652_p7 = por %p2651_p11, %p2650_p8 }
  0x7d   : > { %p2653_p12 = pnand %p2652_p7, %p2646_p9 }
  0x7f   : > { %2656 = shalt.err (!%p2653_p12)
}
  0x80   : > { %s2657_s4 = scalar_lea.vmem %s3284_s20, 16  ;;  %s2999_s16 = smov [#allocation12]  }
  0x81   : > { %p2658_p10 = scmp.ne.s32.totalorder %s3284_s20, %s2657_s4  ;;  %s2662_s26 = sshll.u32 %s2999_s16, 4  ;;  %s2663_s26 = int_to_ptr.vmem [resolvable:$false] %s2662_s26 }
  0x82   : > { %s2664_s0 = scalar_lea.vmem %s2663_s26, 32  ;;  %p2665_p1 = scmp.lt.s32.totalorder %s3284_s20, %s2663_s26 }
  0x83   : > { %p2660_p6 = pnand %p2658_p10, %p2644_p2  ;;  %p2666_p13 = scmp.lt.s32.totalorder %s2664_s0, %s2657_s4 }
  0x85   : > { %p2661_p0 = pneg %p2660_p6  ;;  %p2667_p4 = por %p2666_p13, %p2665_p1 }
  0x87   : > { %p2668_p8 = pnand %p2667_p4, %p2661_p0 }
  0x89   : > { %2671 = shalt.err (!%p2668_p8)
}
  0x8a   : > { %2333 = dma.hbm_to_vmem [thread:$0]  (!%p3296_p3), %s3312_s14, 16, %s3284_s20, %s3316_s3  }
  0x8b   : > { %s278_s23 = scalar_lea.sflag [#allocation7], %s3212_s7  ;;  %s2672_s15 = scalar_lea.hbm %s3305_s13, 2048 }
  0x8c   : > { %p2673_p7 = scmp.ne.s32.totalorder %s3305_s13, %s2672_s15  ;;  %p4455_p12 = pneg %p3220_p5 }
  0x8d   : > { %s2677_s30 = scalar_lea.hbm %s4452_s2, 8192  ;;  %p2678_p2 = scmp.lt.u32.totalorder %s3305_s13, %s4452_s2 }
  0x8e   : > { %p2675_p1 = pnand %p2673_p7, %p4455_p12  ;;  %p2679_p9 = scmp.lt.u32.totalorder %s2677_s30, %s2672_s15 }
  0x8f   : > { %p2681_p10 = scmp.lt.u32.totalorder %s2672_s15, %s3305_s13 }
  0x90   : > { %p2676_p0 = pneg %p2675_p1  ;;  %p2680_p11 = por %p2679_p9, %p2678_p2 }
  0x92   : > { %p2682_p6 = por %p2681_p10, %p2680_p11 }
  0x94   : > { %p2683_p3 = pnand %p2682_p6, %p2676_p0 }
  0x96   : > { %2686 = shalt.err (!%p2683_p3)
}
  0x97   : > { %s2687_s14 = scalar_lea.vmem %s3307_s29, 2048  ;;  %p4456_p4 = pmov %p4455_p12 }
  0x98   : > { %p2688_p13 = scmp.ne.s32.totalorder %s3307_s29, %s2687_s14  ;;  %s3000_s20 = smov [#allocation6]  }
  0x99   : > { %s2692_s22 = sshll.u32 %s3000_s20, 4  ;;  %s2693_s22 = int_to_ptr.vmem [resolvable:$false] %s2692_s22 }
  0x9a   : > { %p2690_p8 = pnand %p2688_p13, %p4456_p4  ;;  %s2694_s4 = scalar_lea.vmem %s2693_s22, 4096 }
  0x9b   : > { %p2695_p12 = scmp.lt.s32.totalorder %s3307_s29, %s2693_s22  ;;  %p2696_p1 = scmp.lt.s32.totalorder %s2694_s4, %s2687_s14 }
  0x9c   : > { %p2691_p7 = pneg %p2690_p8 }
  0x9d   : > { %p2697_p2 = por %p2696_p1, %p2695_p12 }
  0x9f   : > { %p2698_p9 = pnand %p2697_p2, %p2691_p7 }
  0xa1   : > { %2701 = shalt.err (!%p2698_p9)
}
  0xa2   : > { %s4403_s16 = smov 64   ;;  %s4405_s26 = smov 4  }
  0xa3   : > { %2320 = dma.hbm_to_vmem [thread:$0]  (!%p3220_p5), %s3305_s13, 2048, %s3307_s29, %s278_s23, %s4403_s16, %s4403_s16, %s4405_s26  }
  0xa4   : > { %s107_s0 = sld [smem:[#allocation4 + %s2988_s17]]  ;;  %p125_p0 = scmp.ne.s32.totalorder %s2968_s12, %s2964_s11 }
  0xa5   : > { %s110_s15 = sld [smem:[#allocation4 + %s4537_s21]]  ;;  %p131_p11 = scmp.ne.s32.totalorder %s2964_s11, %s2960_s10 }
  0xa6   : > { %s118_s6 = sadd.s32 1, %s2968_s12  ;;  %s321_s24 = sand.u32 1, %s2968_s12  }
  0xa7   : > { %p4457_p10 = scmp.eq.s32.totalorder %s3171_s19, 0  ;;  %p4459_p3 = scmp.eq.s32.totalorder %s2992_s18, 0 }
  0xa8   : > { %s2100_s7 = sshll.u32 %s321_s24, 4  ;;  %p4460_p5 = scmp.lt.s32.totalorder %s2992_s18, 4 }
  0xa9   : > { %p3383_p6 = por %p131_p11, %p4457_p10  ;;  %p127_p13 = por %p125_p0, %p4459_p3 }
  0xaa   : > { %s323_s29 = scalar_lea.vmem [#allocation11], %s2100_s7  ;;  %p4462_p7 = pmov %p4460_p5 }
  0xab   : > { %s4458_s8 = scalar_select %p3383_p6, 1, 0 }
  0xac   : > { %s113_s13 = ssub.s32 %s107_s0, %s110_s15  ;;  %p3391_p4 = pnand %p4460_p5, %p127_p13 }
  0xad   : > { %p116_p8 = scmp.eq.s32.totalorder %s113_s13, 0  ;;  %s334_s23 = sshll.u32 %s323_s29, 4  ;;  %s3409_s23 = int_to_ptr.vmem [resolvable:$true] %s334_s23 }
  0xae   : > { %s2297_s30 = scalar_select %p127_p13, [#allocation4], [#allocation18] }
  0xaf   : > { %s3396_s25 = scalar_select %p116_p8, %s2968_s12, %s118_s6  }
  0xb0   : > { %s2298_s9 = scalar_select %p127_p13, %s2988_s17, 0 }
  0xb1   : > { %s4543_s30 = smov (!%p4462_p7, %s2297_s30), [#allocation22]  ;;  %p4463_p12 = pmov %p4460_p5 }
  0xb2   : > { %s3404_s20 = sld [smem:[#allocation4 + %s2988_s17]]  ;;  %p193_p1 = scmp.ne.s32.totalorder %s2944_s28, %s2940_s27 }
  0xb3   : > { %s4545_s9 = smov (!%p4463_p12, %s2298_s9), 0  ;;  %s3407_s22 = sld [smem:[#allocation4 + %s4537_s21]] }
  0xb4   : > { %s324_s14 = sld [smem:[%s4543_s30 + %s4545_s9]]  ;;  %p199_p2 = scmp.ne.s32.totalorder %s2940_s27, %s2936_s1 }
  0xb5   : > { %s367_s4 = sand.u32 1, %s2944_s28   ;;  %p4464_p9 = pmov %p4459_p3 }
  0xb6   : > { %s3422_s15 = sshll.u32 %s367_s4, 5  ;;  %p4466_p11 = pmov %p4457_p10 }
  0xb7   : > { %p3418_p0 = por %p193_p1, %p4464_p9  ;;  %s4468_s29 = sld [smem:[#allocation53_spill]] }
  0xb8   : > { %p3426_p10 = por %p199_p2, %p4466_p11  ;;  %p2704_p13 = pneg %p3391_p4 }
  0xba   : > { %s2178_s6 = sshll.u32 %s324_s14, 8 }
  0xbb   : > { %s4467_s24 = scalar_select %p3426_p10, 1, 0 }
  0xbd   : > { %s4469_s16 = smov %s4468_s29  ;;  %s3433_s30 = scalar_lea.hbm %s4468_s29, %s2178_s6 }
  0xbe   : > { %s2702_s1 = scalar_lea.hbm %s3433_s30, 256  ;;  %s2707_s4 = scalar_lea.hbm %s4469_s16, 1024 }
  0xbf   : > { %p2703_p3 = scmp.ne.s32.totalorder %s3433_s30, %s2702_s1  ;;  %p2708_p7 = scmp.lt.u32.totalorder %s3433_s30, %s4469_s16 }
  0xc0   : > { %p2709_p12 = scmp.lt.u32.totalorder %s2707_s4, %s2702_s1  ;;  %p2711_p2 = scmp.lt.u32.totalorder %s2702_s1, %s3433_s30 }
  0xc1   : > { %p2705_p5 = pnand %p2704_p13, %p2703_p3 }
  0xc2   : > { %p2710_p1 = por %p2709_p12, %p2708_p7 }
  0xc3   : > { %p2706_p8 = pneg %p2705_p5 }
  0xc4   : > { %p2712_p9 = por %p2711_p2, %p2710_p1 }
  0xc6   : > { %p2713_p11 = pnand %p2712_p9, %p2706_p8 }
  0xc8   : > { %2716 = shalt.err (!%p2713_p11)
}
  0xc9   : > { %s2717_s6 = scalar_lea.vmem %s3409_s23, 256  ;;  %s3003_s13 = smov [#allocation11]  }
  0xca   : > { %p2718_p3 = scmp.ne.s32.totalorder %s3409_s23, %s2717_s6  ;;  %s2722_s29 = sshll.u32 %s3003_s13, 4  ;;  %s2723_s29 = int_to_ptr.vmem [resolvable:$false] %s2722_s29 }
  0xcb   : > { %s2724_s26 = scalar_lea.vmem %s2723_s29, 512  ;;  %p2725_p6 = scmp.lt.s32.totalorder %s3409_s23, %s2723_s29 }
  0xcc   : > { %p2720_p5 = pnand %p2718_p3, %p2704_p13  ;;  %p2726_p7 = scmp.lt.s32.totalorder %s2724_s26, %s2717_s6 }
  0xce   : > { %p2721_p10 = pneg %p2720_p5  ;;  %p2727_p12 = por %p2726_p7, %p2725_p6 }
  0xd0   : > { %p2728_p1 = pnand %p2727_p12, %p2721_p10 }
  0xd2   : > { %2731 = shalt.err (!%p2728_p1)
}
  0xd3   : > { %s4470_s1 = smov 4   ;;  %s4471_s9 = smov 64  }
  0xd4   : > { %s4472_s14 = sld [smem:[#allocation47_spill]]  ;;  %s4473_s10 = sld [smem:[#allocation35_spill]] }
  0xd5   : > { %s4474_s4 = sld [smem:[#allocation36_spill]]  ;;  %s181_s7 = ssub.s32 %s3404_s20, %s3407_s22 }
  0xd6   : > { %s4475_s6 = sld [smem:[#allocation34_spill]]  ;;  %s186_s13 = sadd.s32 1, %s2944_s28 }
  0xd7   : > { %p184_p6 = scmp.eq.s32.totalorder %s181_s7, 0  ;;  %s369_s29 = scalar_lea.vmem [#allocation14], %s3422_s15 }
  0xd8   : > { %s381_s26 = sshll.u32 %s369_s29, 4  ;;  %p4477_p10 = scmp.lt.s32.totalorder %s2992_s18, 4  ;;  %s3491_s26 = int_to_ptr.vmem [resolvable:$true] %s381_s26 }
  0xd9   : > { %s2303_s2 = scalar_select %p3418_p0, [#allocation4], [#allocation20] }
  0xda   : > { %2328 = dma.hbm_to_vmem [thread:$0]  (!%p3391_p4), %s3433_s30, 256, %s3409_s23, %s4472_s14, %s4471_s9, %s4471_s9, %s4470_s1  }
  0xdb   : > { %s3471_s5 = scalar_select %p184_p6, %s2944_s28, %s186_s13  }
  0xdc   : > { %s2304_s16 = scalar_select %p3418_p0, %s2988_s17, 0 }
  0xdd   : > { %4476 = sst [smem:[#allocation34_spill]] %s3471_s5  ;;  %s4547_s2 = smov (!%p4477_p10, %s2303_s2), [#allocation24] }
  0xde   : > { %p4478_p13 = pmov %p4477_p10  ;;  %p4479_p4 = pmov %p4477_p10 }
  0xdf   : > { %s3489_s22 = sld [smem:[#allocation4 + %s2988_s17]]  ;;  %p221_p2 = scmp.ne.s32.totalorder %s4474_s4, %s4473_s10 }
  0xe0   : > { %s4549_s16 = smov (!%p4478_p13, %s2304_s16), 0  ;;  %p3484_p8 = pnand %p4479_p4, %p3418_p0 }
  0xe1   : > { %s370_s20 = sld [smem:[%s4547_s2 + %s4549_s16]]  ;;  %p4483_p0 = scmp.eq.s32.totalorder %s2992_s18, 0 }
  0xe2   : > { %s3494_s15 = sld [smem:[#allocation4 + %s4537_s21]]  ;;  %p2734_p5 = pneg %p3484_p8 }
  0xe3   : > { %s4481_s0 = sld [smem:[#allocation55_spill]]  ;;  %p3507_p11 = por %p221_p2, %p4483_p0 }
  0xe7   : > { %s2179_s30 = sshll.u32 %s370_s20, 9 }
  0xe9   : > { %s4482_s5 = smov %s4481_s0  ;;  %s3503_s13 = scalar_lea.hbm %s4481_s0, %s2179_s30 }
  0xea   : > { %s2732_s16 = scalar_lea.hbm %s3503_s13, 512  ;;  %s2737_s30 = scalar_lea.hbm %s4482_s5, 2048 }
  0xeb   : > { %p2733_p3 = scmp.ne.s32.totalorder %s3503_s13, %s2732_s16  ;;  %p2738_p1 = scmp.lt.u32.totalorder %s3503_s13, %s4482_s5 }
  0xec   : > { %p2739_p6 = scmp.lt.u32.totalorder %s2737_s30, %s2732_s16  ;;  %p2741_p13 = scmp.lt.u32.totalorder %s2732_s16, %s3503_s13 }
  0xed   : > { %p2735_p7 = pnand %p2734_p5, %p2733_p3 }
  0xee   : > { %p2740_p10 = por %p2739_p6, %p2738_p1 }
  0xef   : > { %p2736_p12 = pneg %p2735_p7 }
  0xf0   : > { %p2742_p4 = por %p2741_p13, %p2740_p10 }
  0xf2   : > { %p2743_p2 = pnand %p2742_p4, %p2736_p12 }
  0xf4   : > { %2746 = shalt.err (!%p2743_p2)
}
  0xf5   : > { %s2747_s0 = scalar_lea.vmem %s3491_s26, 512  ;;  %s3004_s29 = smov [#allocation14]  }
  0xf6   : > { %p2748_p0 = scmp.ne.s32.totalorder %s3491_s26, %s2747_s0  ;;  %s2752_s20 = sshll.u32 %s3004_s29, 4  ;;  %s2753_s20 = int_to_ptr.vmem [resolvable:$false] %s2752_s20 }
  0xf7   : > { %s2754_s14 = scalar_lea.vmem %s2753_s20, 1024  ;;  %p2755_p9 = scmp.lt.s32.totalorder %s3491_s26, %s2753_s20 }
  0xf8   : > { %p2750_p3 = pnand %p2748_p0, %p2734_p5  ;;  %p2756_p1 = scmp.lt.s32.totalorder %s2754_s14, %s2747_s0 }
  0xfa   : > { %p2751_p7 = pneg %p2750_p3  ;;  %p2757_p6 = por %p2756_p1, %p2755_p9 }
  0xfc   : > { %p2758_p10 = pnand %p2757_p6, %p2751_p7 }
  0xfe   : > { %2761 = shalt.err (!%p2758_p10)
}
  0xff   : > { %2338 = dma.hbm_to_vmem [thread:$0]  (!%p3484_p8), %s3503_s13, 512, %s3491_s26, %s3316_s3, %s4471_s9, %s4471_s9, %s4470_s1  }
 0x100   : > { %p4485_p9 = scmp.eq.s32.totalorder %s3171_s19, 0  ;;  %p4486_p5 = scmp.ne.s32.totalorder %s4473_s10, %s4475_s6 }
 0x101   : > { %s211_s16 = ssub.s32 %s3489_s22, %s3494_s15  ;;  %s214_s30 = sadd.s32 1, %s4474_s4 }
 0x102   : > { %p3545_p12 = por %p4486_p5, %p4485_p9  ;;  %p212_p13 = scmp.eq.s32.totalorder %s211_s16, 0 }
 0x103   : > { %s391_s7 = sand.u32 1, %s4474_s4   ;;  %p4488_p4 = scmp.lt.s32.totalorder %s2992_s18, 4 }
 0x104   : > { %s2306_s0 = scalar_select %p3507_p11, [#allocation4], [#allocation21] }
 0x105   : > { %s4551_s4 = smov (!%p212_p13, %s4474_s4), %s214_s30  ;;  %p4489_p2 = pmov %p4488_p4 }
 0x106   : > { %s2307_s29 = scalar_select %p3507_p11, %s2988_s17, 0 }
 0x107   : > { %s4553_s0 = smov (!%p4488_p4, %s2306_s0), [#allocation25]  ;;  %p4490_p8 = pmov %p4489_p2 }
 0x108   : > { %s4555_s29 = smov (!%p4489_p2, %s2307_s29), 0  ;;  %s394_s9 = scalar_lea.vmem [#allocation15], %s391_s7 }
 0x109   : > { %p3569_p0 = pnand %p4490_p8, %p3507_p11  ;;  %s395_s1 = sld [smem:[%s4553_s0 + %s4555_s29]] }
 0x10a   : > { %s402_s10 = sshll.u32 %s394_s9, 4  ;;  %s4492_s15 = sld [smem:[#allocation56_spill]]  ;;  %s3573_s10 = int_to_ptr.vmem [resolvable:$true] %s402_s10 }
 0x10b   : > { %s392_s2 = scalar_lea.sflag [#allocation16], %s391_s7  ;;  %p2764_p3 = pneg %p3569_p0 }
 0x10f   : > { %s2107_s6 = sshll.u32 %s395_s1, 4 }
 0x110   : > { %s4493_s20 = smov %s4492_s15  ;;  %s3578_s13 = scalar_lea.hbm %s4492_s15, %s2107_s6 }
 0x111   : > { %s2762_s14 = scalar_lea.hbm %s3578_s13, 16  ;;  %s2767_s0 = scalar_lea.hbm %s4493_s20, 64 }
 0x112   : > { %p2763_p11 = scmp.ne.s32.totalorder %s3578_s13, %s2762_s14  ;;  %p2768_p6 = scmp.lt.u32.totalorder %s3578_s13, %s4493_s20 }
 0x113   : > { %p2769_p10 = scmp.lt.u32.totalorder %s2767_s0, %s2762_s14  ;;  %p2771_p5 = scmp.lt.u32.totalorder %s2762_s14, %s3578_s13 }
 0x114   : > { %p2765_p7 = pnand %p2764_p3, %p2763_p11 }
 0x115   : > { %p2770_p9 = por %p2769_p10, %p2768_p6 }
 0x116   : > { %p2766_p1 = pneg %p2765_p7 }
 0x117   : > { %p2772_p13 = por %p2771_p5, %p2770_p9 }
 0x119   : > { %p2773_p4 = pnand %p2772_p13, %p2766_p1 }
 0x11b   : > { %2776 = shalt.err (!%p2773_p4)
}
 0x11c   : > { %s2777_s7 = scalar_lea.vmem %s3573_s10, 16  ;;  %s3005_s9 = smov [#allocation15]  }
 0x11d   : > { %p2778_p2 = scmp.ne.s32.totalorder %s3573_s10, %s2777_s7  ;;  %s2782_s6 = sshll.u32 %s3005_s9, 4  ;;  %s2783_s6 = int_to_ptr.vmem [resolvable:$false] %s2782_s6 }
 0x11e   : > { %s2784_s26 = scalar_lea.vmem %s2783_s6, 32  ;;  %p2785_p7 = scmp.lt.s32.totalorder %s3573_s10, %s2783_s6 }
 0x11f   : > { %p2780_p8 = pnand %p2778_p2, %p2764_p3  ;;  %p2786_p6 = scmp.lt.s32.totalorder %s2784_s26, %s2777_s7 }
 0x121   : > { %p2781_p11 = pneg %p2780_p8  ;;  %p2787_p10 = por %p2786_p6, %p2785_p7 }
 0x123   : > { %p2788_p9 = pnand %p2787_p10, %p2781_p11 }
 0x125   : > { %2791 = shalt.err (!%p2788_p9)
}
 0x126   : > { %2343 = dma.hbm_to_vmem [thread:$0]  (!%p3569_p0), %s3578_s13, 16, %s3573_s10, %s392_s2  }
 0x127   : > { %s4494_s22 = sld [smem:[#allocation48_spill]] }
 0x12d   : > { %p4495_p1 = scmp.ne.s32.totalorder %s4494_s22, 0 }
 0x12e   : > { %s4496_s15 = sld [smem:[#allocation40_spill]] (!%p4495_p1)  ;;  %s4497_s14 = sld [smem:[#allocation43_spill]] (!%p4495_p1) }
 0x12f   : > { %411 = sbr.rel (%p4495_p1) target bundleno = 943 (0x3af), region = 44 }
 0x134   : > { %s3608_s16 = sand.u32 (!%p4495_p1), 1, %s4496_s15   ;;  %p4498_p3 = scmp.ne.s32.totalorder (!%p4495_p1), %s4497_s14, 0 }
 0x135   : > { %s2109_s30 = sshll.u32 (!%p4495_p1), %s3608_s16, 7  ;;  %s414_s0 = scalar_lea.sflag (!%p4495_p1), [#allocation7], %s3608_s16 }
 0x136   : > { %s3612_s29 = scalar_lea.vmem [#allocation6], %s2109_s30 }
 0x137   : > { %2895 = dma.done.wait (%p4498_p3), %s414_s0, 2048  }
 0x138   : > { %2897 = vsyncadd (%p4498_p3), %s414_s0, 4294965248  ;;  %s422_s3 = sand.u32 1, %s3171_s19   ;;  %s2110_s10 = sshll.u32 %s3608_s16, 8 }
 0x139   : > { %s423_s13 = scalar_lea.sflag [#allocation10], %s422_s3  ;;  %s3620_s2 = scalar_lea.vmem [#allocation9], %s2110_s10 }
 0x13a   : > { %2899 = dma.done.wait (%p4498_p3), %s423_s13, 4096  }
 0x13b   : > { %2901 = vsyncadd (%p4498_p3), %s423_s13, 4294963200  ;;  %s433_s1 = sand.u32 1, %s2964_s11   ;;  %p4499_p0 = scmp.ne.s32.totalorder %s4458_s8, 0 }
 0x13c   : > { %s2111_s7 = sshll.u32 %s433_s1, 4 }
 0x13d   : > { %s435_s9 = scalar_lea.vmem [#allocation11], %s2111_s7 }
 0x13e   : > { %2903 = dma.done.wait (%p4499_p0), %s423_s13, 256  }
 0x13f   : > { %2905 = vsyncadd (%p4499_p0), %s423_s13, 4294967040  ;;  %s4500_s19 = sld [smem:[#allocation37_spill]]  ;;  %s4501_s6 = sld [smem:[#allocation49_spill]] }
 0x140   : > { %s441_s22 = scalar_lea.sflag [#allocation13], %s422_s3 }
 0x145   : > { %s442_s26 = sand.u32 1, %s4500_s19   ;;  %p4502_p5 = scmp.ne.s32.totalorder %s4501_s6, 0 }
 0x146   : > { %s3632_s15 = scalar_lea.vmem [#allocation12], %s442_s26 }
 0x147   : > { %2907 = dma.done.wait (%p4502_p5), %s441_s22, 16  }
 0x148   : > { %2909 = vsyncadd (%p4502_p5), %s441_s22, 4294967280  ;;  %s450_s14 = sand.u32 1, %s2940_s27   ;;  %p4503_p13 = scmp.ne.s32.totalorder %s4467_s24, 0 }
 0x149   : > { %s2112_s30 = sshll.u32 %s450_s14, 5 }
 0x14a   : > { %s3639_s0 = scalar_lea.vmem [#allocation14], %s2112_s30 }
 0x14b   : > { %2911 = dma.done.wait (%p4503_p13), %s441_s22, 512  }
 0x14c   : > { %2913 = vsyncadd (%p4503_p13), %s441_s22, 4294966784  ;;  %s4504_s8 = sld [smem:[#allocation35_spill]] }
 0x152   : > { %s457_s3 = sand.u32 1, %s4504_s8  }
 0x153   : > { %s458_s13 = scalar_lea.sflag [#allocation16], %s457_s3  ;;  %s3646_s1 = scalar_lea.vmem [#allocation15], %s457_s3 }
 0x154   : > { %2915 = dma.done.wait (%p3545_p12), %s458_s13, 16  }
 0x155   : > { %2917 = vsyncadd (%p3545_p12), %s458_s13, 4294967280  ;;  %s4505_s7 = sld [smem:[#allocation42_spill]]  ;;  %s3653_s6 = scalar_lea.vmem [#allocation17], %s2110_s10 }
 0x15b   : > { %s527_s19 = sld [smem:[#allocation5 + %s4505_s7]] }
 0x161   : > { %p2114_p4 = scmp.le.s32.totalorder %s527_s19, 0 }
 0x162   : > { %v2506_v0 = vld [vmem:[%s435_s9] sm:$0xff] (!%p2114_p4)   ;;  %v2507_v1 = vld [vmem:[%s435_s9 + $0x8] sm:$0xff] (!%p2114_p4)   ;;  %vm536_vm0 = vcmask (!%p2114_p4), 261120   ;;  %v3006_v22 = vmov (!%p2114_p4), 0   ;;  %vm1282_vm1 = vcmask (!%p2114_p4), 523264  }
 0x163   : > { %531 = sbr.rel (%p2114_p4) target bundleno = 915 (0x393), region = 72  ;;  %2219 = vmatprep.subr.bf16.mxu0 (!%p2114_p4), %v2506_v0  ;;  %v2508_v2 = vld [vmem:[%s3612_s29] sm:$0xff] (!%p2114_p4)   ;;  %v2509_v3 = vld [vmem:[%s3612_s29 + $0x8] sm:$0xff] (!%p2114_p4)   ;;  %v2510_v4 = vld [vmem:[%s3612_s29 + $0x10] sm:$0xff] (!%p2114_p4)   ;;  %2505 = vset.pattern.permute.xlu1 (!%p2114_p4), %v3006_v22 }
 0x164   : > { %2220 = vmatpush3.bf16.msra.mxu0 (!%p2114_p4), %v2506_v0  ;;  %2223 = vmatprep.mubr.msk.bf16.mxu0 (!%p2114_p4), %vm536_vm0, %v2508_v2  ;;  %v2511_v5 = vld [vmem:[%s3612_s29 + $0x18] sm:$0xff] (!%p2114_p4)   ;;  %v2512_v6 = vld [vmem:[%s3612_s29 + $0x20] sm:$0xff] (!%p2114_p4)   ;;  %v2513_v7 = vld [vmem:[%s3612_s29 + $0x28] sm:$0xff] (!%p2114_p4)  }
 0x165   : > { %2221 = vmatprep.subr.bf16.mxu0 (!%p2114_p4), %v2507_v1  ;;  %v2514_v8 = vld [vmem:[%s3612_s29 + $0x30] sm:$0xff] (!%p2114_p4)   ;;  %v2515_v9 = vld [vmem:[%s3612_s29 + $0x38] sm:$0xff] (!%p2114_p4)   ;;  %v2516_v10 = vld [vmem:[%s3612_s29 + $0x40] sm:$0xff] (!%p2114_p4)   ;;  %2504 = vset.pattern.permute.xlu0 (!%p2114_p4), %v3006_v22 }
 0x166   : > { %v2517_v11 = vld [vmem:[%s3612_s29 + $0x48] sm:$0xff] (!%p2114_p4)   ;;  %v2518_v12 = vld [vmem:[%s3612_s29 + $0x50] sm:$0xff] (!%p2114_p4)   ;;  %v2519_v13 = vld [vmem:[%s3612_s29 + $0x58] sm:$0xff] (!%p2114_p4)  }
 0x167   : > { %v2520_v14 = vld [vmem:[%s3612_s29 + $0x60] sm:$0xff] (!%p2114_p4)   ;;  %v2521_v15 = vld [vmem:[%s3612_s29 + $0x68] sm:$0xff] (!%p2114_p4)   ;;  %v2522_v16 = vld [vmem:[%s3612_s29 + $0x70] sm:$0xff] (!%p2114_p4)  }
 0x168   : > { %2222 = vmatpush3.bf16.msra.mxu0 (!%p2114_p4), %v2507_v1  ;;  %v2523_v17 = vld [vmem:[%s3612_s29 + $0x78] sm:$0xff] (!%p2114_p4)   ;;  %v2524_v18 = vld [vmem:[%s3639_s0] sm:$0xff] (!%p2114_p4)   ;;  %v2525_v19 = vld [vmem:[%s3639_s0 + $0x8] sm:$0xff] (!%p2114_p4)  }
 0x169   : > { %2255 = vmatprep.subr.bf16.mxu1 (!%p2114_p4), %v2524_v18  ;;  %v2526_v20 = vld [vmem:[%s3639_s0 + $0x10] sm:$0xff] (!%p2114_p4)   ;;  %v2527_v21 = vld [vmem:[%s3639_s0 + $0x18] sm:$0xff] (!%p2114_p4)   ;;  %v1631_v26 = vld [vmem:[%s3620_s2 + $0x8] sm:$0xff] (!%p2114_p4) }
 0x16a   : > { %2256 = vmatpush3.bf16.msra.mxu1 %v2524_v18  ;;  %v1632_v23 = vld [vmem:[%s3620_s2 + $0x10] sm:$0xff]  ;;  %v1630_v24 = vld [vmem:[%s3620_s2] sm:$0xff]  ;;  %v1633_v25 = vld [vmem:[%s3620_s2 + $0x18] sm:$0xff] }
 0x16b   : > { %2224 = vmatmul.mubr.msk.bf16.vlgmr.msra.gmra.mrb[0].mxu0 %vm536_vm0, %v2509_v3  ;;  %2257 = vmatprep.subr.bf16.mxu1 %v2525_v19  ;;  %v1635_v27 = vld [vmem:[%s3620_s2 + $0x28] sm:$0xff]  ;;  %v1634_v28 = vld [vmem:[%s3620_s2 + $0x20] sm:$0xff]  ;;  %v1637_v29 = vld [vmem:[%s3620_s2 + $0x38] sm:$0xff] }
 0x16c   : > { %2227 = vmatprep.mubr.msk.bf16.mxu0 %vm536_vm0, %v2510_v4  ;;  %1674 = vperm.xlu1 %2505, %v1632_v23   ;;  %v1636_v30 = vld [vmem:[%s3620_s2 + $0x30] sm:$0xff]  ;;  %v1639_v31 = vld [vmem:[%s3620_s2 + $0x48] sm:$0xff]  ;;  %v1638_v32 = vld [vmem:[%s3620_s2 + $0x40] sm:$0xff] }
 0x16d   : > { %1664 = vperm.xlu0 %2504, %v1630_v24   ;;  %v1641_v33 = vld [vmem:[%s3620_s2 + $0x58] sm:$0xff]  ;;  %v1640_v34 = vld [vmem:[%s3620_s2 + $0x50] sm:$0xff]  ;;  %v1643_v35 = vld [vmem:[%s3620_s2 + $0x68] sm:$0xff] }
 0x16e   : > { %2258 = vmatpush3.bf16.msra.mxu1 %v2525_v19  ;;  %v1642_v36 = vld [vmem:[%s3620_s2 + $0x60] sm:$0xff]  ;;  %v1645_v37 = vld [vmem:[%s3620_s2 + $0x78] sm:$0xff]  ;;  %v1644_v38 = vld [vmem:[%s3620_s2 + $0x70] sm:$0xff] }
 0x16f   : > { %2259 = vmatprep.subr.bf16.mxu1 %v2526_v20  ;;  %v1647_v39 = vld [vmem:[%s3620_s2 + $0x88] sm:$0xff]  ;;  %v1646_v40 = vld [vmem:[%s3620_s2 + $0x80] sm:$0xff]  ;;  %v1649_v41 = vld [vmem:[%s3620_s2 + $0x98] sm:$0xff] }
 0x170   : > { %1679 = vperm.xlu1 %2505, %v1633_v25   ;;  %v1648_v42 = vld [vmem:[%s3620_s2 + $0x90] sm:$0xff]  ;;  %v3712_v43 = vld [vmem:[%s3632_s15] ss:$0 sm:$0xff]  ;;  %v1651_v47 = vld [vmem:[%s3620_s2 + $0xa8] sm:$0xff] }
 0x171   : > { %1669 = vperm.xlu0 %2504, %v1631_v26   ;;  %v1650_v48 = vld [vmem:[%s3620_s2 + $0xa0] sm:$0xff]  ;;  %v1653_v58 = vld [vmem:[%s3620_s2 + $0xb8] sm:$0xff]  ;;  %v1652_v59 = vld [vmem:[%s3620_s2 + $0xb0] sm:$0xff] }
 0x172   : > { %2260 = vmatpush3.bf16.msra.mxu1 %v2526_v20  ;;  %v1657_v25 = vld [vmem:[%s3620_s2 + $0xd8] sm:$0xff]  ;;  %v1656_v26 = vld [vmem:[%s3620_s2 + $0xd0] sm:$0xff] }
 0x173   : > { %2228 = vmatmul.mubr.msk.bf16.gmra.mrb[4].mxu0 %vm536_vm0, %v2511_v5  ;;  %2261 = vmatprep.subr.bf16.mxu1 %v2527_v21 }
 0x174   : > { %2231 = vmatprep.mubr.msk.bf16.mxu0 %vm536_vm0, %v2512_v6  ;;  %1689 = vperm.xlu1 %2505, %v1635_v27  }
 0x175   : > { %1684 = vperm.xlu0 %2504, %v1634_v28  }
 0x176   : > { %2262 = vmatpush3.bf16.msra.mxu1 %v2527_v21 }
 0x178   : > { %1699 = vperm.xlu1 %2505, %v1637_v29  }
 0x179   : > { %1694 = vperm.xlu0 %2504, %v1636_v30  }
 0x17b   : > { %2232 = vmatmul.mubr.msk.bf16.gmra.mrb[8].mxu0 %vm536_vm0, %v2513_v7  ;;  %v1655_v7 = vld [vmem:[%s3620_s2 + $0xc8] sm:$0xff] }
 0x17c   : > { %2235 = vmatprep.mubr.msk.bf16.mxu0 %vm536_vm0, %v2514_v8  ;;  %1709 = vperm.xlu1 %2505, %v1639_v31   ;;  %v1654_v8 = vld [vmem:[%s3620_s2 + $0xc0] sm:$0xff] }
 0x17d   : > { %1704 = vperm.xlu0 %2504, %v1638_v32  }
 0x180   : > { %1719 = vperm.xlu1 %2505, %v1641_v33  }
 0x181   : > { %1714 = vperm.xlu0 %2504, %v1640_v34  }
 0x183   : > { %2236 = vmatmul.mubr.msk.bf16.gmra.mrb[12].mxu0 %vm536_vm0, %v2515_v9 }
 0x184   : > { %2239 = vmatprep.mubr.msk.bf16.mxu0 %vm536_vm0, %v2516_v10  ;;  %1729 = vperm.xlu1 %2505, %v1643_v35   ;;  %v3007_v35 = vmov 0.0  }
 0x185   : > { %1724 = vperm.xlu0 %2504, %v1642_v36   ;;  %539 = vst.msk [vmem:[#allocation2 + $0x10] sm:$0xff] %vm536_vm0, %v3007_v35  ;;  %537 = vst.msk [vmem:[#allocation2] sm:$0xff] %vm536_vm0, %v3007_v35 }
 0x186   : > { %538 = vst.msk [vmem:[#allocation2 + $0x8] sm:$0xff] %vm536_vm0, %v3007_v35  ;;  %540 = vst.msk [vmem:[#allocation2 + $0x18] sm:$0xff] %vm536_vm0, %v3007_v35 }
 0x187   : > { %541 = vst.msk [vmem:[#allocation2 + $0x20] sm:$0xff] %vm536_vm0, %v3007_v35  ;;  %542 = vst.msk [vmem:[#allocation2 + $0x28] sm:$0xff] %vm536_vm0, %v3007_v35 }
 0x188   : > { %1739 = vperm.xlu1 %2505, %v1645_v37   ;;  %543 = vst.msk [vmem:[#allocation2 + $0x30] sm:$0xff] %vm536_vm0, %v3007_v35  ;;  %544 = vst.msk [vmem:[#allocation2 + $0x38] sm:$0xff] %vm536_vm0, %v3007_v35 }
 0x189   : > { %1734 = vperm.xlu0 %2504, %v1644_v38   ;;  %545 = vst.msk [vmem:[#allocation2 + $0x40] sm:$0xff] %vm536_vm0, %v3007_v35  ;;  %546 = vst.msk [vmem:[#allocation2 + $0x48] sm:$0xff] %vm536_vm0, %v3007_v35 }
 0x18a   : > { %547 = vst.msk [vmem:[#allocation2 + $0x50] sm:$0xff] %vm536_vm0, %v3007_v35  ;;  %548 = vst.msk [vmem:[#allocation2 + $0x58] sm:$0xff] %vm536_vm0, %v3007_v35 }
 0x18b   : > { %2240 = vmatmul.mubr.msk.bf16.gmra.mrb[16].mxu0 %vm536_vm0, %v2517_v11  ;;  %549 = vst.msk [vmem:[#allocation2 + $0x60] sm:$0xff] %vm536_vm0, %v3007_v35  ;;  %550 = vst.msk [vmem:[#allocation2 + $0x68] sm:$0xff] %vm536_vm0, %v3007_v35 }
 0x18c   : > { %2243 = vmatprep.mubr.msk.bf16.mxu0 %vm536_vm0, %v2518_v12  ;;  %1749 = vperm.xlu1 %2505, %v1647_v39   ;;  %551 = vst.msk [vmem:[#allocation2 + $0x70] sm:$0xff] %vm536_vm0, %v3007_v35  ;;  %552 = vst.msk [vmem:[#allocation2 + $0x78] sm:$0xff] %vm536_vm0, %v3007_v35 }
 0x18d   : > { %1744 = vperm.xlu0 %2504, %v1646_v40   ;;  %553 = vst.msk [vmem:[#allocation2 + $0x80] sm:$0xff] %vm536_vm0, %v3007_v35  ;;  %554 = vst.msk [vmem:[#allocation2 + $0x88] sm:$0xff] %vm536_vm0, %v3007_v35  ;;  %v1659_v40 = vld [vmem:[%s3620_s2 + $0xe8] sm:$0xff] }
 0x18e   : > { %555 = vst.msk [vmem:[#allocation2 + $0x90] sm:$0xff] %vm536_vm0, %v3007_v35  ;;  %556 = vst.msk [vmem:[#allocation2 + $0x98] sm:$0xff] %vm536_vm0, %v3007_v35 }
 0x18f   : > { %557 = vst.msk [vmem:[#allocation2 + $0xa0] sm:$0xff] %vm536_vm0, %v3007_v35  ;;  %558 = vst.msk [vmem:[#allocation2 + $0xa8] sm:$0xff] %vm536_vm0, %v3007_v35 }
 0x190   : > { %1759 = vperm.xlu1 %2505, %v1649_v41   ;;  %559 = vst.msk [vmem:[#allocation2 + $0xb0] sm:$0xff] %vm536_vm0, %v3007_v35  ;;  %560 = vst.msk [vmem:[#allocation2 + $0xb8] sm:$0xff] %vm536_vm0, %v3007_v35  ;;  %v1658_v41 = vld [vmem:[%s3620_s2 + $0xe0] sm:$0xff] }
 0x191   : > { %1754 = vperm.xlu0 %2504, %v1648_v42   ;;  %561 = vst.msk [vmem:[#allocation2 + $0xc0] sm:$0xff] %vm536_vm0, %v3007_v35  ;;  %562 = vst.msk [vmem:[#allocation2 + $0xc8] sm:$0xff] %vm536_vm0, %v3007_v35 }
 0x192   : > { %563 = vst.msk [vmem:[#allocation2 + $0xd0] sm:$0xff] %vm536_vm0, %v3007_v35  ;;  %564 = vst.msk [vmem:[#allocation2 + $0xd8] sm:$0xff] %vm536_vm0, %v3007_v35 }
 0x193   : > { %2244 = vmatmul.mubr.msk.bf16.gmra.mrb[20].mxu0 %vm536_vm0, %v2519_v13  ;;  %565 = vst.msk [vmem:[#allocation2 + $0xe0] sm:$0xff] %vm536_vm0, %v3007_v35  ;;  %566 = vst.msk [vmem:[#allocation2 + $0xe8] sm:$0xff] %vm536_vm0, %v3007_v35 }
 0x194   : > { %2247 = vmatprep.mubr.msk.bf16.mxu0 %vm536_vm0, %v2520_v14  ;;  %1769 = vperm.xlu1 %2505, %v1651_v47   ;;  %567 = vst.msk [vmem:[#allocation2 + $0xf0] sm:$0xff] %vm536_vm0, %v3007_v35  ;;  %568 = vst.msk [vmem:[#allocation2 + $0xf8] sm:$0xff] %vm536_vm0, %v3007_v35 }
 0x195   : > { %1764 = vperm.xlu0 %2504, %v1650_v48  }
 0x198   : > { %1779 = vperm.xlu1 %2505, %v1653_v58  }
 0x199   : > { %1774 = vperm.xlu0 %2504, %v1652_v59  }
 0x19b   : > { %2248 = vmatmul.mubr.msk.bf16.gmra.mrb[24].mxu0 %vm536_vm0, %v2521_v15 }
 0x19c   : > { %2251 = vmatprep.mubr.msk.bf16.mxu0 %vm536_vm0, %v2522_v16  ;;  %1789 = vperm.xlu1 %2505, %v1655_v7  }
 0x19d   : > { %1784 = vperm.xlu0 %2504, %v1654_v8  }
 0x1a0   : > { %1799 = vperm.xlu1 %2505, %v1657_v25  }
 0x1a1   : > { %1794 = vperm.xlu0 %2504, %v1656_v26  }
 0x1a3   : > { %2252 = vmatmul.mubr.msk.bf16.gmra.mrb[28].mxu0 %vm536_vm0, %v2523_v17 }
 0x1a4   : > { %1809 = vperm.xlu1 %2505, %v1659_v40  }
 0x1a5   : > { %1804 = vperm.xlu0 %2504, %v1658_v41  }
 0x23e   : > { %v2225_v44 = vpop.f32.mrb[0].mxu0 }
 0x23f   : > { %v3715_v45 = vadd.f32 %v2225_v44, %v3712_v43  ;;  %v787_v46 = vpop.f32.mrb[1].mxu0 }
 0x240   : > { %v3720_v49 = vadd.f32 %v3712_v43, %v787_v46  ;;  %v2226_v50 = vpop.f32.mrb[2].mxu0 }
 0x241   : > { %v916_v51 = vmul.f32 %v3715_v45, %v3715_v45  ;;  %v3725_v52 = vadd.f32 %v2226_v50, %v3712_v43  ;;  %v790_v53 = vpop.f32.mrb[3].mxu0 }
 0x242   : > { %v914_v54 = vmul.f32 %v3720_v49, %v3720_v49  ;;  %v3730_v55 = vadd.f32 %v3712_v43, %v790_v53 }
 0x243   : > { %v948_v56 = vmul.f32 %v916_v51, %v3715_v45  ;;  %v917_v57 = vmul.f32 %v3725_v52, %v3725_v52 }
 0x244   : > { %v946_v60 = vmul.f32 %v914_v54, %v3720_v49  ;;  %v915_v61 = vmul.f32 %v3730_v55, %v3730_v55 }
 0x245   : > { %v980_v62 = vmul.f32 0.044715, %v948_v56  ;;  %v949_v63 = vmul.f32 %v917_v57, %v3725_v52 }
 0x246   : > { %v978_v0 = vmul.f32 0.044715, %v946_v60  ;;  %v947_v1 = vmul.f32 %v915_v61, %v3730_v55  ;;  %v2229_v2 = vpop.f32.mrb[4].mxu0 }
 0x247   : > { %v1012_v3 = vadd.f32 %v980_v62, %v3715_v45  ;;  %v981_v4 = vmul.f32 0.044715, %v949_v63  ;;  %v3744_v5 = vadd.f32 %v2229_v2, %v3712_v43  ;;  %v803_v6 = vpop.f32.mrb[5].mxu0  ;;  %v1661_v63 = vld [vmem:[%s3620_s2 + $0xf8] sm:$0xff] }
 0x248   : > { %v1010_v9 = vadd.f32 %v978_v0, %v3720_v49  ;;  %v979_v10 = vmul.f32 0.044715, %v947_v1  ;;  %v3750_v11 = vadd.f32 %v3712_v43, %v803_v6  ;;  %v2230_v12 = vpop.f32.mrb[6].mxu0  ;;  %v1660_v0 = vld [vmem:[%s3620_s2 + $0xf0] sm:$0xff]  ;;  %1819 = vperm.xlu1 %2505, %v1661_v63  }
 0x249   : > { %v1044_v13 = vmul.f32 0.7978846, %v1012_v3  ;;  %v1013_v14 = vadd.f32 %v981_v4, %v3725_v52  ;;  %v920_v15 = vmul.f32 %v3744_v5, %v3744_v5  ;;  %v3756_v16 = vadd.f32 %v2230_v12, %v3712_v43  ;;  %v806_v17 = vpop.f32.mrb[7].mxu0  ;;  %1814 = vperm.xlu0 %2504, %v1660_v0  }
 0x24a   : > { %v1042_v18 = vmul.f32 0.7978846, %v1010_v9  ;;  %v1011_v19 = vadd.f32 %v979_v10, %v3730_v55  ;;  %v918_v20 = vmul.f32 %v3750_v11, %v3750_v11  ;;  %v3762_v21 = vadd.f32 %v3712_v43, %v806_v17 }
 0x24b   : > { %2528 = vtanh.f32 %v1044_v13  ;;  %v1045_v22 = vmul.f32 0.7978846, %v1013_v14  ;;  %v952_v23 = vmul.f32 %v920_v15, %v3744_v5  ;;  %v921_v24 = vmul.f32 %v3756_v16, %v3756_v16 }
 0x24c   : > { %v1043_v27 = vmul.f32 0.7978846, %v1011_v19  ;;  %v950_v28 = vmul.f32 %v918_v20, %v3750_v11  ;;  %v919_v29 = vmul.f32 %v3762_v21, %v3762_v21  ;;  %2530 = vtanh.f32 %v1042_v18 }
 0x24d   : > { %2532 = vtanh.f32 %v1045_v22  ;;  %v984_v30 = vmul.f32 0.044715, %v952_v23  ;;  %v953_v31 = vmul.f32 %v921_v24, %v3756_v16 }
 0x24e   : > { %v982_v32 = vmul.f32 0.044715, %v950_v28  ;;  %v951_v33 = vmul.f32 %v919_v29, %v3762_v21  ;;  %v2233_v34 = vpop.f32.mrb[8].mxu0  ;;  %2534 = vtanh.f32 %v1043_v27 }
 0x24f   : > { %v1016_v36 = vadd.f32 %v984_v30, %v3744_v5  ;;  %v985_v37 = vmul.f32 0.044715, %v953_v31  ;;  %v3808_v38 = vadd.f32 %v2233_v34, %v3712_v43  ;;  %v819_v39 = vpop.f32.mrb[9].mxu0 }
 0x250   : > { %v1014_v42 = vadd.f32 %v982_v32, %v3750_v11  ;;  %v983_v44 = vmul.f32 0.044715, %v951_v33  ;;  %v3814_v46 = vadd.f32 %v3712_v43, %v819_v39  ;;  %v2234_v47 = vpop.f32.mrb[10].mxu0 }
 0x251   : > { %v1048_v48 = vmul.f32 0.7978846, %v1016_v36  ;;  %v1017_v50 = vadd.f32 %v985_v37, %v3756_v16  ;;  %v924_v51 = vmul.f32 %v3808_v38, %v3808_v38  ;;  %v3820_v53 = vadd.f32 %v2234_v47, %v3712_v43  ;;  %v822_v54 = vpop.f32.mrb[11].mxu0 }
 0x252   : > { %v1046_v56 = vmul.f32 0.7978846, %v1014_v42  ;;  %v1015_v57 = vadd.f32 %v983_v44, %v3762_v21  ;;  %v922_v58 = vmul.f32 %v3814_v46, %v3814_v46  ;;  %v3826_v59 = vadd.f32 %v3712_v43, %v822_v54 }
 0x253   : > { %2536 = vtanh.f32 %v1048_v48  ;;  %v1049_v60 = vmul.f32 0.7978846, %v1017_v50  ;;  %v956_v61 = vmul.f32 %v924_v51, %v3808_v38  ;;  %v925_v62 = vmul.f32 %v3820_v53, %v3820_v53 }
 0x254   : > { %2538 = vtanh.f32 %v1046_v56  ;;  %v1047_v1 = vmul.f32 0.7978846, %v1015_v57  ;;  %v954_v2 = vmul.f32 %v922_v58, %v3814_v46  ;;  %v923_v3 = vmul.f32 %v3826_v59, %v3826_v59 }
 0x255   : > { %v2529_v4 = vpop.eup %2528  ;;  %2540 = vtanh.f32 %v1049_v60  ;;  %v988_v6 = vmul.f32 0.044715, %v956_v61  ;;  %v957_v7 = vmul.f32 %v925_v62, %v3820_v53 }
 0x256   : > { %v2531_v8 = vpop.eup %2530  ;;  %v1108_v9 = vadd.f32 1.0, %v2529_v4  ;;  %2542 = vtanh.f32 %v1047_v1  ;;  %v986_v10 = vmul.f32 0.044715, %v954_v2  ;;  %v955_v12 = vmul.f32 %v923_v3, %v3826_v59  ;;  %v2237_v13 = vpop.f32.mrb[12].mxu0 }
 0x257   : > { %v2533_v14 = vpop.eup %2532  ;;  %v1020_v15 = vadd.f32 %v988_v6, %v3808_v38  ;;  %v989_v17 = vmul.f32 0.044715, %v957_v7  ;;  %v3840_v18 = vadd.f32 %v2237_v13, %v3712_v43  ;;  %v835_v19 = vpop.f32.mrb[13].mxu0  ;;  %v3842_v20 = vadd.f32 1.0, %v2531_v8 }
 0x258   : > { %v1140_v22 = vmul.f32 0.5, %v1108_v9  ;;  %v1109_v23 = vadd.f32 1.0, %v2533_v14  ;;  %v1018_v24 = vadd.f32 %v986_v10, %v3814_v46  ;;  %v987_v25 = vmul.f32 0.044715, %v955_v12  ;;  %v2238_v26 = vpop.f32.mrb[14].mxu0  ;;  %v2535_v32 = vpop.eup %2534 }
 0x259   : > { %v1052_v27 = vmul.f32 0.7978846, %v1020_v15  ;;  %v1021_v28 = vadd.f32 %v989_v17, %v3820_v53  ;;  %v928_v29 = vmul.f32 %v3840_v18, %v3840_v18  ;;  %v3849_v30 = vadd.f32 %v3712_v43, %v835_v19  ;;  %v838_v31 = vpop.f32.mrb[15].mxu0 }
 0x25a   : > { %v3852_v33 = vmul.f32 %v1140_v22, %v3715_v45  ;;  %v1141_v34 = vmul.f32 0.5, %v1109_v23  ;;  %v1050_v35 = vmul.f32 0.7978846, %v1018_v24  ;;  %v1019_v36 = vadd.f32 %v987_v25, %v3826_v59 }
 0x25b   : > { %2544 = vtanh.f32 %v1052_v27  ;;  %v1053_v37 = vmul.f32 0.7978846, %v1021_v28  ;;  %v960_v39 = vmul.f32 %v928_v29, %v3840_v18  ;;  %v926_v40 = vmul.f32 %v3849_v30, %v3849_v30 }
 0x25c   : > { %v3859_v41 = vmul.f32 %v1141_v34, %v3725_v52  ;;  %2546 = vtanh.f32 %v1050_v35  ;;  %v1051_v42 = vmul.f32 0.7978846, %v1019_v36  ;;  %v3862_v44 = vadd.f32 %v2238_v26, %v3712_v43 }
 0x25d   : > { %v2537_v45 = vpop.eup %2536  ;;  %2548 = vtanh.f32 %v1053_v37  ;;  %v992_v47 = vmul.f32 0.044715, %v960_v39  ;;  %v958_v48 = vmul.f32 %v926_v40, %v3849_v30  ;;  %v3866_v50 = vadd.f32 %v3712_v43, %v838_v31 }
 0x25e   : > { %v2539_v51 = vpop.eup %2538  ;;  %v1112_v54 = vadd.f32 1.0, %v2537_v45  ;;  %2550 = vtanh.f32 %v1051_v42  ;;  %v929_v52 = vmul.f32 %v3862_v44, %v3862_v44  ;;  %v2241_v56 = vpop.f32.mrb[16].mxu0  ;;  %v3870_v57 = vadd.f32 1.0, %v2535_v32 }
 0x25f   : > { %v2541_v58 = vpop.eup %2540  ;;  %v1110_v60 = vadd.f32 1.0, %v2539_v51  ;;  %v1024_v61 = vadd.f32 %v992_v47, %v3840_v18  ;;  %v990_v62 = vmul.f32 0.044715, %v958_v48  ;;  %v927_v63 = vmul.f32 %v3866_v50, %v3866_v50  ;;  %v851_v0 = vpop.f32.mrb[17].mxu0 }
 0x260   : > { %v2543_v1 = vpop.eup %2542  ;;  %v1144_v2 = vmul.f32 0.5, %v1112_v54  ;;  %v1113_v3 = vadd.f32 1.0, %v2541_v58  ;;  %v961_v4 = vmul.f32 %v929_v52, %v3862_v44  ;;  %v3877_v6 = vadd.f32 %v2241_v56, %v3712_v43  ;;  %v2242_v7 = vpop.f32.mrb[18].mxu0 }
 0x261   : > { %v1142_v8 = vmul.f32 0.5, %v1110_v60  ;;  %v1111_v9 = vadd.f32 1.0, %v2543_v1  ;;  %v1056_v10 = vmul.f32 0.7978846, %v1024_v61  ;;  %v1022_v12 = vadd.f32 %v990_v62, %v3849_v30  ;;  %v854_v13 = vpop.f32.mrb[19].mxu0 }
 0x262   : > { %v3881_v14 = vmul.f32 %v1144_v2, %v3744_v5  ;;  %v1145_v15 = vmul.f32 0.5, %v1113_v3  ;;  %v993_v17 = vmul.f32 0.044715, %v961_v4  ;;  %v959_v19 = vmul.f32 %v927_v63, %v3866_v50 }
 0x263   : > { %v3885_v22 = vmul.f32 %v1142_v8, %v3750_v11  ;;  %v1143_v23 = vmul.f32 0.5, %v1111_v9  ;;  %2552 = vtanh.f32 %v1056_v10  ;;  %v1054_v24 = vmul.f32 0.7978846, %v1022_v12 }
 0x264   : > { %v3888_v25 = vmul.f32 %v1145_v15, %v3756_v16  ;;  %v1025_v26 = vadd.f32 %v993_v17, %v3862_v44  ;;  %v991_v27 = vmul.f32 0.044715, %v959_v19  ;;  %v932_v5 = vmul.f32 %v3877_v6, %v3877_v6 }
 0x265   : > { %v2545_v28 = vpop.eup %2544  ;;  %v3894_v29 = vmul.f32 %v1143_v23, %v3762_v21  ;;  %2554 = vtanh.f32 %v1054_v24  ;;  %v3897_v11 = vadd.f32 %v3712_v43, %v851_v0  ;;  %v3900_v31 = vadd.f32 %v2242_v7, %v3712_v43 }
 0x266   : > { %v2547_v32 = vpop.eup %2546  ;;  %v1116_v16 = vadd.f32 1.0, %v2545_v28  ;;  %v1057_v34 = vmul.f32 0.7978846, %v1025_v26  ;;  %v1023_v35 = vadd.f32 %v991_v27, %v3866_v50  ;;  %v964_v36 = vmul.f32 %v932_v5, %v3877_v6  ;;  %v2245_v37 = vpop.f32.mrb[20].mxu0 }
 0x267   : > { %v2549_v39 = vpop.eup %2548  ;;  %v1114_v40 = vadd.f32 1.0, %v2547_v32  ;;  %v930_v21 = vmul.f32 %v3897_v11, %v3897_v11  ;;  %v933_v42 = vmul.f32 %v3900_v31, %v3900_v31  ;;  %v3909_v45 = vadd.f32 %v3712_v43, %v854_v13  ;;  %v867_v47 = vpop.f32.mrb[21].mxu0 }
 0x268   : > { %v2551_v48 = vpop.eup %2550  ;;  %v1148_v51 = vmul.f32 0.5, %v1116_v16  ;;  %v1117_v54 = vadd.f32 1.0, %v2549_v39  ;;  %2556 = vtanh.f32 %v1057_v34  ;;  %v1055_v52 = vmul.f32 0.7978846, %v1023_v35  ;;  %v2246_v56 = vpop.f32.mrb[22].mxu0 }
 0x269   : > { %v1146_v58 = vmul.f32 0.5, %v1114_v40  ;;  %v1115_v60 = vadd.f32 1.0, %v2551_v48  ;;  %v996_v61 = vmul.f32 0.044715, %v964_v36  ;;  %v962_v62 = vmul.f32 %v930_v21, %v3897_v11  ;;  %v870_v63 = vpop.f32.mrb[23].mxu0 }
 0x26a   : > { %v3913_v0 = vmul.f32 %v1148_v51, %v3808_v38  ;;  %v1149_v1 = vmul.f32 0.5, %v1117_v54  ;;  %2558 = vtanh.f32 %v1055_v52  ;;  %v965_v2 = vmul.f32 %v933_v42, %v3900_v31 }
 0x26b   : > { %v3917_v3 = vmul.f32 %v1146_v58, %v3814_v46  ;;  %v1147_v4 = vmul.f32 0.5, %v1115_v60  ;;  %v1028_v7 = vadd.f32 %v996_v61, %v3877_v6  ;;  %v994_v8 = vmul.f32 0.044715, %v962_v62 }
 0x26c   : > { %v3921_v9 = vmul.f32 %v1149_v1, %v3820_v53  ;;  %v997_v10 = vmul.f32 0.044715, %v965_v2  ;;  %v931_v12 = vmul.f32 %v3909_v45, %v3909_v45  ;;  %v1138_v38 = vmul.f32 0.5, %v3842_v20 }
 0x26d   : > { %v2553_v13 = vpop.eup %2552  ;;  %v3927_v15 = vmul.f32 %v1147_v4, %v3826_v59  ;;  %v1060_v17 = vmul.f32 0.7978846, %v1028_v7  ;;  %v1026_v46 = vadd.f32 %v994_v8, %v3897_v11  ;;  %v1139_v19 = vmul.f32 0.5, %v3870_v57 }
 0x26e   : > { %v1120_v23 = vadd.f32 1.0, %v2553_v13  ;;  %v1029_v24 = vadd.f32 %v997_v10, %v3900_v31  ;;  %v963_v53 = vmul.f32 %v931_v12, %v3909_v45  ;;  %v1170_v26 = vmul.f32 %v1138_v38, %v3720_v49  ;;  %v2249_v27 = vpop.f32.mrb[24].mxu0 }
 0x26f   : > { %v2555_v5 = vpop.eup %2554  ;;  %2560 = vtanh.f32 %v1060_v17  ;;  %v1058_v20 = vmul.f32 0.7978846, %v1026_v46  ;;  %v1171_v28 = vmul.f32 %v1139_v19, %v3730_v55  ;;  %v1235_v59 = vpack.c.bf16 %v3859_v41, %v3852_v33  ;;  %v883_v32 = vpop.f32.mrb[25].mxu0 }
 0x270   : > { %v1152_v16 = vmul.f32 0.5, %v1120_v23  ;;  %v1118_v34 = vadd.f32 1.0, %v2555_v5  ;;  %v1061_v57 = vmul.f32 0.7978846, %v1029_v24  ;;  %v995_v35 = vmul.f32 0.044715, %v963_v53 }
 0x271   : > { %2562 = vtanh.f32 %v1058_v20  ;;  %v1234_v36 = vpack.c.bf16 %v1171_v28, %v1170_v26  ;;  %v3938_v39 = vadd.f32 %v2245_v37, %v3712_v43  ;;  %v3941_v49 = vadd.f32 %v3712_v43, %v867_v47  ;;  %v2250_v40 = vpop.f32.mrb[26].mxu0 }
 0x272   : > { %v2557_v21 = vpop.eup %2556  ;;  %v3944_v55 = vmul.f32 %v1152_v16, %v3840_v18  ;;  %v1150_v42 = vmul.f32 0.5, %v1118_v34  ;;  %2564 = vtanh.f32 %v1061_v57  ;;  %v1027_v33 = vadd.f32 %v995_v35, %v3909_v45  ;;  %v3947_v41 = vpop.f32.mrb[27].mxu0 }
 0x273   : > { %v1121_v48 = vadd.f32 1.0, %v2557_v21  ;;  %2263 = vmatprep.mubr.msk.bf16.mxu1 %vm1282_vm1, %v1234_v36  ;;  %v936_v37 = vmul.f32 %v3938_v39, %v3938_v39  ;;  %v934_v47 = vmul.f32 %v3941_v49, %v3941_v49  ;;  %v3955_v51 = vadd.f32 %v2246_v56, %v3712_v43 }
 0x274   : > { %v2559_v18 = vpop.eup %2558  ;;  %v3958_v54 = vmul.f32 %v1150_v42, %v3849_v30  ;;  %v1059_v52 = vmul.f32 0.7978846, %v1027_v33  ;;  %2264 = vmatmul.mubr.msk.bf16.vlgmr.msra.gmra.mrb[0].mxu1 %vm1282_vm1, %v1235_v59  ;;  %v3962_v58 = vadd.f32 %v3712_v43, %v870_v63  ;;  %v1236_v60 = vpack.c.bf16 %v3894_v29, %v3885_v22 }
 0x275   : > { %v1153_v61 = vmul.f32 0.5, %v1121_v48  ;;  %v1119_v62 = vadd.f32 1.0, %v2559_v18  ;;  %v968_v1 = vmul.f32 %v936_v37, %v3938_v39  ;;  %v966_v56 = vmul.f32 %v934_v47, %v3941_v49 }
 0x276   : > { %2566 = vtanh.f32 %v1059_v52  ;;  %v937_v30 = vmul.f32 %v3955_v51, %v3955_v51  ;;  %v935_v2 = vmul.f32 %v3962_v58, %v3962_v58  ;;  %2267 = vmatprep.mubr.msk.bf16.mxu1 %vm1282_vm1, %v1236_v60  ;;  %v1237_v63 = vpack.c.bf16 %v3888_v25, %v3881_v14  ;;  %v2253_v4 = vpop.f32.mrb[28].mxu0 }
 0x277   : > { %v3976_v22 = vmul.f32 %v1153_v61, %v3862_v44  ;;  %v1151_v29 = vmul.f32 0.5, %v1119_v62  ;;  %v1000_v7 = vmul.f32 0.044715, %v968_v1  ;;  %v998_v8 = vmul.f32 0.044715, %v966_v56  ;;  %v899_v10 = vpop.f32.mrb[29].mxu0 }
 0x278   : > { %v969_v12 = vmul.f32 %v937_v30, %v3955_v51  ;;  %v967_v38 = vmul.f32 %v935_v2, %v3962_v58  ;;  %v3981_v13 = vadd.f32 %v2249_v27, %v3712_v43  ;;  %v3984_v17 = vadd.f32 %v3712_v43, %v883_v32  ;;  %v2254_v46 = vpop.f32.mrb[30].mxu0 }
 0x279   : > { %v2561_v14 = vpop.eup %2560  ;;  %v3987_v25 = vmul.f32 %v1151_v29, %v3866_v50  ;;  %v1032_v44 = vadd.f32 %v1000_v7, %v3938_v39  ;;  %v1030_v19 = vadd.f32 %v998_v8, %v3941_v49  ;;  %v3992_v23 = vadd.f32 %v2250_v40, %v3712_v43  ;;  %v902_v24 = vpop.f32.mrb[31].mxu0 }
 0x27a   : > { %v1124_v53 = vadd.f32 1.0, %v2561_v14  ;;  %v1001_v26 = vmul.f32 0.044715, %v969_v12  ;;  %v999_v27 = vmul.f32 0.044715, %v967_v38  ;;  %v940_v5 = vmul.f32 %v3981_v13, %v3981_v13 }
 0x27b   : > { %v2563_v20 = vpop.eup %2562  ;;  %v1064_v28 = vmul.f32 0.7978846, %v1032_v44  ;;  %v1062_v59 = vmul.f32 0.7978846, %v1030_v19  ;;  %v938_v50 = vmul.f32 %v3984_v17, %v3984_v17  ;;  %v941_v32 = vmul.f32 %v3992_v23, %v3992_v23 }
 0x27c   : > { %v2565_v16 = vpop.eup %2564  ;;  %v1156_v34 = vmul.f32 0.5, %v1124_v53  ;;  %v1122_v57 = vadd.f32 1.0, %v2563_v20  ;;  %v1033_v35 = vadd.f32 %v1001_v26, %v3955_v51  ;;  %v1031_v36 = vadd.f32 %v999_v27, %v3962_v58  ;;  %2268 = vmatmul.mubr.msk.bf16.gmra.mrb[4].mxu1 %vm1282_vm1, %v1237_v63 }
 0x27d   : > { %v1125_v40 = vadd.f32 1.0, %v2565_v16  ;;  %2568 = vtanh.f32 %v1064_v28  ;;  %v972_v21 = vmul.f32 %v940_v5, %v3981_v13  ;;  %v970_v42 = vmul.f32 %v938_v50, %v3984_v17 }
 0x27e   : > { %v4006_v33 = vmul.f32 %v1156_v34, %v3877_v6  ;;  %v1154_v48 = vmul.f32 0.5, %v1122_v57  ;;  %2570 = vtanh.f32 %v1062_v59  ;;  %v1065_v37 = vmul.f32 0.7978846, %v1033_v35 }
 0x27f   : > { %v1157_v47 = vmul.f32 0.5, %v1125_v40  ;;  %v1063_v18 = vmul.f32 0.7978846, %v1031_v36  ;;  %v1004_v52 = vmul.f32 0.044715, %v972_v21  ;;  %v973_v60 = vmul.f32 %v941_v32, %v3992_v23 }
 0x280   : > { %v2567_v61 = vpop.eup %2566  ;;  %v4010_v62 = vmul.f32 %v1154_v48, %v3897_v11  ;;  %2572 = vtanh.f32 %v1065_v37  ;;  %v1002_v1 = vmul.f32 0.044715, %v970_v42  ;;  %v4014_v56 = vadd.f32 %v3712_v43, %v3947_v41 }
 0x281   : > { %v4017_v6 = vmul.f32 %v1157_v47, %v3900_v31  ;;  %v1123_v30 = vadd.f32 1.0, %v2567_v61  ;;  %2574 = vtanh.f32 %v1063_v18  ;;  %v1036_v2 = vadd.f32 %v1004_v52, %v3981_v13 }
 0x282   : > { %v1034_v63 = vadd.f32 %v1002_v1, %v3984_v17  ;;  %v1005_v29 = vmul.f32 0.044715, %v973_v60  ;;  %v939_v11 = vmul.f32 %v4014_v56, %v4014_v56  ;;  %v1238_v7 = vpack.c.bf16 %v3927_v15, %v3917_v3 }
 0x283   : > { %v1155_v8 = vmul.f32 0.5, %v1123_v30  ;;  %v1068_v12 = vmul.f32 0.7978846, %v1036_v2  ;;  %v1239_v41 = vpack.c.bf16 %v3921_v9, %v3913_v0  ;;  %v4028_v31 = vadd.f32 %v2253_v4, %v3712_v43 }
 0x284   : > { %v1066_v38 = vmul.f32 0.7978846, %v1034_v63  ;;  %v1037_v14 = vadd.f32 %v1005_v29, %v3992_v23  ;;  %v971_v44 = vmul.f32 %v939_v11, %v4014_v56  ;;  %2271 = vmatprep.mubr.msk.bf16.mxu1 %vm1282_vm1, %v1238_v7  ;;  %v4034_v19 = vadd.f32 %v3712_v43, %v899_v10 }
 0x285   : > { %v1187_v3 = vmul.f32 %v1155_v8, %v3909_v45  ;;  %2576 = vtanh.f32 %v1068_v12  ;;  %2272 = vmatmul.mubr.msk.bf16.gmra.mrb[8].mxu1 %vm1282_vm1, %v1239_v41  ;;  %v944_v0 = vmul.f32 %v4028_v31, %v4028_v31  ;;  %v4041_v9 = vadd.f32 %v2254_v46, %v3712_v43 }
 0x286   : > { %2578 = vtanh.f32 %v1066_v38  ;;  %v1069_v15 = vmul.f32 0.7978846, %v1037_v14  ;;  %v1003_v4 = vmul.f32 0.044715, %v971_v44  ;;  %v942_v53 = vmul.f32 %v4034_v19, %v4034_v19 }
 0x287   : > { %v2569_v26 = vpop.eup %2568  ;;  %v976_v10 = vmul.f32 %v944_v0, %v4028_v31  ;;  %v945_v45 = vmul.f32 %v4041_v9, %v4041_v9  ;;  %v4049_v27 = vadd.f32 %v3712_v43, %v902_v24  ;;  %v1240_v5 = vpack.c.bf16 %v3987_v25, %v3958_v54 }
 0x288   : > { %v2571_v46 = vpop.eup %2570  ;;  %v1128_v20 = vadd.f32 1.0, %v2569_v26  ;;  %2580 = vtanh.f32 %v1069_v15  ;;  %v1035_v28 = vadd.f32 %v1003_v4, %v4014_v56  ;;  %v974_v59 = vmul.f32 %v942_v53, %v4034_v19 }
 0x289   : > { %v1126_v50 = vadd.f32 1.0, %v2571_v46  ;;  %v1008_v32 = vmul.f32 0.044715, %v976_v10  ;;  %v977_v16 = vmul.f32 %v945_v45, %v4041_v9  ;;  %v943_v34 = vmul.f32 %v4049_v27, %v4049_v27  ;;  %2275 = vmatprep.mubr.msk.bf16.mxu1 %vm1282_vm1, %v1240_v5 }
 0x28a   : > { %v2573_v43 = vpop.eup %2572  ;;  %v1160_v24 = vmul.f32 0.5, %v1128_v20  ;;  %v1067_v57 = vmul.f32 0.7978846, %v1035_v28  ;;  %v1006_v54 = vmul.f32 0.044715, %v974_v59  ;;  %v1241_v25 = vpack.c.bf16 %v3976_v22, %v3944_v55 }
 0x28b   : > { %v2575_v35 = vpop.eup %2574  ;;  %v1158_v36 = vmul.f32 0.5, %v1126_v50  ;;  %v1129_v40 = vadd.f32 1.0, %v2573_v43  ;;  %v1040_v21 = vadd.f32 %v1008_v32, %v4028_v31  ;;  %v1009_v42 = vmul.f32 0.044715, %v977_v16 }
 0x28c   : > { %v1192_v48 = vmul.f32 %v1160_v24, %v3938_v39  ;;  %v1127_v37 = vadd.f32 1.0, %v2575_v35  ;;  %2582 = vtanh.f32 %v1067_v57  ;;  %v1038_v47 = vadd.f32 %v1006_v54, %v4034_v19 }
 0x28d   : > { %v1190_v18 = vmul.f32 %v1158_v36, %v3941_v49  ;;  %v1161_v52 = vmul.f32 0.5, %v1129_v40  ;;  %v1072_v60 = vmul.f32 0.7978846, %v1040_v21  ;;  %v1041_v61 = vadd.f32 %v1009_v42, %v4041_v9  ;;  %2276 = vmatmul.mubr.msk.bf16.gmra.mrb[12].mxu1 %vm1282_vm1, %v1241_v25  ;;  %v1665_v36 = vpop.permute.xlu0 %1664  ;;  %v1675_v40 = vpop.permute.xlu1 %1674 }
 0x28e   : > { %v1159_v55 = vmul.f32 0.5, %v1127_v37  ;;  %v1070_v22 = vmul.f32 0.7978846, %v1038_v47  ;;  %v975_v1 = vmul.f32 %v943_v34, %v4049_v27  ;;  %v1242_v30 = vpack.c.bf16 %v1187_v3, %v4010_v62 }
 0x28f   : > { %v2577_v2 = vpop.eup %2576  ;;  %v1193_v39 = vmul.f32 %v1161_v52, %v3955_v51  ;;  %2584 = vtanh.f32 %v1072_v60  ;;  %v1073_v63 = vmul.f32 0.7978846, %v1041_v61  ;;  %v1243_v49 = vpack.c.bf16 %v4017_v6, %v4006_v33  ;;  %v1203_v61 = vld [vmem:[#allocation2 + $0x8] sm:$0xff] }
 0x290   : > { %v2579_v29 = vpop.eup %2578  ;;  %v1191_v11 = vmul.f32 %v1159_v55, %v3962_v58  ;;  %v1132_v7 = vadd.f32 1.0, %v2577_v2  ;;  %2586 = vtanh.f32 %v1070_v22  ;;  %v1007_v8 = vmul.f32 0.044715, %v975_v1  ;;  %2279 = vmatprep.mubr.msk.bf16.mxu1 %vm1282_vm1, %v1242_v30 }
 0x291   : > { %2588 = vtanh.f32 %v1073_v63  ;;  %v1245_v12 = vpack.c.bf16 %v1193_v39, %v1192_v48  ;;  %v1130_v14 = vadd.f32 1.0, %v2579_v29  ;;  %v1680_v21 = vpop.permute.xlu1 %1679  ;;  %v1206_v29 = vld [vmem:[#allocation2 + $0x20] sm:$0xff] }
 0x292   : > { %v2581_v41 = vpop.eup %2580  ;;  %v1039_v62 = vadd.f32 %v1007_v8, %v4049_v27  ;;  %v1244_v38 = vpack.c.bf16 %v1191_v11, %v1190_v18  ;;  %v1164_v51 = vmul.f32 0.5, %v1132_v7  ;;  %v1205_v18 = vld [vmem:[#allocation2 + $0x18] sm:$0xff]  ;;  %v4107_v11 = vld [vmem:[%s3646_s1] ss:$0 sm:$0xff] }
 0x293   : > { %v1133_v44 = vadd.f32 1.0, %v2581_v41  ;;  %v1162_v6 = vmul.f32 0.5, %v1130_v14  ;;  %v1209_v8 = vld [vmem:[#allocation2 + $0x38] sm:$0xff] }
 0x294   : > { %v1071_v3 = vmul.f32 0.7978846, %v1039_v62  ;;  %v1196_v58 = vmul.f32 %v1164_v51, %v3981_v13 }
 0x295   : > { %v1165_v0 = vmul.f32 0.5, %v1133_v44  ;;  %2280 = vmatmul.mubr.msk.bf16.gmra.mrb[16].mxu1 %vm1282_vm1, %v1243_v49  ;;  %v1194_v20 = vmul.f32 %v1162_v6, %v3984_v17  ;;  %v4092_v42 = vpop.permute.xlu1 %1689  ;;  %v1208_v49 = vld [vmem:[#allocation2 + $0x30] sm:$0xff] }
 0x296   : > { %v2583_v33 = vpop.eup %2582  ;;  %2590 = vtanh.f32 %v1071_v3  ;;  %2283 = vmatprep.mubr.msk.bf16.mxu1 %vm1282_vm1, %v1244_v38  ;;  %v1207_v38 = vld [vmem:[#allocation2 + $0x28] sm:$0xff] }
 0x297   : > { %v1197_v15 = vmul.f32 %v1165_v0, %v3992_v23  ;;  %v1131_v4 = vadd.f32 1.0, %v2583_v33 }
 0x299   : > { %v2585_v53 = vpop.eup %2584  ;;  %v1163_v26 = vmul.f32 0.5, %v1131_v4  ;;  %v1247_v10 = vpack.c.bf16 %v1197_v15, %v1196_v58  ;;  %v4096_v37 = vpop.permute.xlu1 %1699 }
 0x29a   : > { %v2587_v45 = vpop.eup %2586  ;;  %v1136_v5 = vadd.f32 1.0, %v2585_v53 }
 0x29b   : > { %v2589_v46 = vpop.eup %2588  ;;  %v1195_v28 = vmul.f32 %v1163_v26, %v4014_v56  ;;  %v1134_v32 = vadd.f32 1.0, %v2587_v45 }
 0x29c   : > { %v1168_v59 = vmul.f32 0.5, %v1136_v5  ;;  %v1137_v50 = vadd.f32 1.0, %v2589_v46 }
 0x29d   : > { %2284 = vmatmul.mubr.msk.bf16.gmra.mrb[20].mxu1 %vm1282_vm1, %v1245_v12  ;;  %v1246_v13 = vpack.c.bf16 %v1195_v28, %v1194_v20  ;;  %v1166_v24 = vmul.f32 0.5, %v1134_v32  ;;  %v4102_v63 = vpop.permute.xlu1 %1709  ;;  %v1210_v32 = vld [vmem:[#allocation2 + $0x40] sm:$0xff] }
 0x29e   : > { %v1169_v16 = vmul.f32 0.5, %v1137_v50  ;;  %v1200_v34 = vmul.f32 %v1168_v59, %v4028_v31  ;;  %v1670_v31 = vpop.permute.xlu0 %1669  ;;  %v1212_v59 = vld [vmem:[#allocation2 + $0x50] sm:$0xff] }
 0x29f   : > { %2287 = vmatprep.mubr.msk.bf16.mxu1 %vm1282_vm1, %v1246_v13  ;;  %v1198_v56 = vmul.f32 %v1166_v24, %v4034_v19  ;;  %v1204_v19 = vld [vmem:[#allocation2 + $0x10] sm:$0xff] }
 0x2a0   : > { %v2591_v23 = vpop.eup %2590  ;;  %v1201_v43 = vmul.f32 %v1169_v16, %v4041_v9 }
 0x2a1   : > { %v1135_v57 = vadd.f32 1.0, %v2591_v23  ;;  %v4111_v3 = vpop.permute.xlu1 %1719  ;;  %v1213_v23 = vld [vmem:[#allocation2 + $0x58] sm:$0xff] }
 0x2a2   : > { %v1249_v54 = vpack.c.bf16 %v1201_v43, %v1200_v34  ;;  %v4090_v9 = vpop.permute.xlu0 %1684 }
 0x2a3   : > { %v1167_v17 = vmul.f32 0.5, %v1135_v57  ;;  %v1211_v57 = vld [vmem:[#allocation2 + $0x48] sm:$0xff] }
 0x2a5   : > { %v1199_v25 = vmul.f32 %v1167_v17, %v4049_v27  ;;  %2288 = vmatmul.mubr.msk.bf16.gmra.mrb[24].mxu1 %vm1282_vm1, %v1247_v10  ;;  %v1202_v27 = vld [vmem:[#allocation2] sm:$0xff]  ;;  %v4127_v13 = vpop.permute.xlu1 %1729 }
 0x2a6   : > { %v4094_v48 = vpop.permute.xlu0 %1694 }
 0x2a7   : > { %v1248_v35 = vpack.c.bf16 %v1199_v25, %v1198_v56 }
 0x2a9   : > { %2291 = vmatprep.mubr.msk.bf16.mxu1 %vm1282_vm1, %v1248_v35 }
 0x2aa   : > { %v4098_v1 = vpop.permute.xlu0 %1704 }
 0x2ad   : > { %2292 = vmatmul.mubr.msk.bf16.gmra.mrb[28].mxu1 %vm1282_vm1, %v1249_v54 }
 0x2ae   : > { %v4109_v12 = vpop.permute.xlu0 %1714 }
 0x2b2   : > { %v4121_v20 = vpop.permute.xlu0 %1724 }
 0x347   : > { %v2265_v47 = vpop.f32.mrb[0].mxu1 }
 0x348   : > { %v1494_v52 = vadd.f32 %v2265_v47, %v1204_v19  ;;  %v1365_v60 = vpop.f32.mrb[1].mxu1 }
 0x349   : > { %v1492_v55 = vadd.f32 %v1365_v60, %v1202_v27  ;;  %v2266_v22 = vpop.f32.mrb[2].mxu1 }
 0x34a   : > { %1526 = vst.msk [vmem:[#allocation2 + $0x10] sm:$0xff] %vm536_vm0, %v1494_v52  ;;  %v1495_v30 = vadd.f32 %v2266_v22, %v1205_v18  ;;  %v1368_v2 = vpop.f32.mrb[3].mxu1 }
 0x34b   : > { %1524 = vst.msk [vmem:[#allocation2] sm:$0xff] %vm536_vm0, %v1492_v55  ;;  %v1493_v39 = vadd.f32 %v1368_v2, %v1203_v61  ;;  %v4144_v61 = vpop.permute.xlu1 %1739  ;;  %v1216_v55 = vld [vmem:[#allocation2 + $0x70] sm:$0xff]  ;;  %v1217_v2 = vld [vmem:[#allocation2 + $0x78] sm:$0xff] }
 0x34c   : > { %1527 = vst.msk [vmem:[#allocation2 + $0x18] sm:$0xff] %vm536_vm0, %v1495_v30  ;;  %v1214_v30 = vld [vmem:[#allocation2 + $0x60] sm:$0xff] }
 0x34d   : > { %1525 = vst.msk [vmem:[#allocation2 + $0x8] sm:$0xff] %vm536_vm0, %v1493_v39 }
 0x34f   : > { %v2269_v7 = vpop.f32.mrb[4].mxu1 }
 0x350   : > { %v1498_v41 = vadd.f32 %v2269_v7, %v1208_v49  ;;  %v1381_v62 = vpop.f32.mrb[5].mxu1 }
 0x351   : > { %v1561_v51 = vld [vmem:[#allocation2 + $0x10] sm:$0xff]  ;;  %v1496_v14 = vadd.f32 %v1381_v62, %v1206_v29  ;;  %v2270_v44 = vpop.f32.mrb[6].mxu1  ;;  %v1215_v29 = vld [vmem:[#allocation2 + $0x68] sm:$0xff] }
 0x352   : > { %v1600_v0 = vadd.f32 %v4107_v11, %v1561_v51  ;;  %v1559_v33 = vld [vmem:[#allocation2] sm:$0xff]  ;;  %1530 = vst.msk [vmem:[#allocation2 + $0x30] sm:$0xff] %vm536_vm0, %v1498_v41  ;;  %v1499_v58 = vadd.f32 %v2270_v44, %v1209_v8  ;;  %v1384_v6 = vpop.f32.mrb[7].mxu1 }
 0x353   : > { %v1598_v15 = vadd.f32 %v4107_v11, %v1559_v33  ;;  %v1562_v4 = vld [vmem:[#allocation2 + $0x18] sm:$0xff]  ;;  %1528 = vst.msk [vmem:[#allocation2 + $0x20] sm:$0xff] %vm536_vm0, %v1496_v14  ;;  %v1497_v53 = vadd.f32 %v1384_v6, %v1207_v38  ;;  %v4161_v14 = vpop.permute.xlu1 %1749 }
 0x354   : > { %v1824_v26 = vmul.f32 %v1675_v40, %v1600_v0  ;;  %v1601_v10 = vadd.f32 %v4107_v11, %v1562_v4  ;;  %v1560_v45 = vld [vmem:[#allocation2 + $0x8] sm:$0xff]  ;;  %1531 = vst.msk [vmem:[#allocation2 + $0x38] sm:$0xff] %vm536_vm0, %v1499_v58 }
 0x355   : > { %v1822_v5 = vmul.f32 %v1665_v36, %v1598_v15  ;;  %v1599_v46 = vadd.f32 %v4107_v11, %v1560_v45  ;;  %1529 = vst.msk [vmem:[#allocation2 + $0x28] sm:$0xff] %vm536_vm0, %v1497_v53  ;;  %v1218_v45 = vld [vmem:[#allocation2 + $0x80] sm:$0xff] }
 0x356   : > { %1856 = vst.msk [vmem:[%s3653_s6 + $0x10] sm:$0xff] %vm536_vm0, %v1824_v26  ;;  %v1825_v28 = vmul.f32 %v1680_v21, %v1601_v10  ;;  %v4136_v21 = vpop.permute.xlu0 %1734  ;;  %v1220_v26 = vld [vmem:[#allocation2 + $0x90] sm:$0xff] }
 0x357   : > { %1854 = vst.msk [vmem:[%s3653_s6] sm:$0xff] %vm536_vm0, %v1822_v5  ;;  %v1823_v50 = vmul.f32 %v1670_v31, %v1599_v46 }
 0x358   : > { %1857 = vst.msk [vmem:[%s3653_s6 + $0x18] sm:$0xff] %vm536_vm0, %v1825_v28  ;;  %v2273_v16 = vpop.f32.mrb[8].mxu1  ;;  %v1221_v28 = vld [vmem:[#allocation2 + $0x98] sm:$0xff] }
 0x359   : > { %1855 = vst.msk [vmem:[%s3653_s6 + $0x8] sm:$0xff] %vm536_vm0, %v1823_v50  ;;  %v1565_v34 = vld [vmem:[#allocation2 + $0x30] sm:$0xff]  ;;  %v1502_v43 = vadd.f32 %v2273_v16, %v1212_v59  ;;  %v1397_v24 = vpop.f32.mrb[9].mxu1  ;;  %v1219_v50 = vld [vmem:[#allocation2 + $0x88] sm:$0xff] }
 0x35a   : > { %v1604_v54 = vadd.f32 %v4107_v11, %v1565_v34  ;;  %v1563_v17 = vld [vmem:[#allocation2 + $0x20] sm:$0xff]  ;;  %v1500_v56 = vadd.f32 %v1397_v24, %v1210_v32  ;;  %v2274_v25 = vpop.f32.mrb[10].mxu1  ;;  %v4157_v7 = vpop.permute.xlu0 %1744 }
 0x35b   : > { %v1602_v35 = vadd.f32 %v4107_v11, %v1563_v17  ;;  %v1566_v36 = vld [vmem:[#allocation2 + $0x38] sm:$0xff]  ;;  %1534 = vst.msk [vmem:[#allocation2 + $0x50] sm:$0xff] %vm536_vm0, %v1502_v43  ;;  %v1503_v40 = vadd.f32 %v2274_v25, %v1213_v23  ;;  %v1400_v31 = vpop.f32.mrb[11].mxu1  ;;  %v1760_v32 = vpop.permute.xlu1 %1759 }
 0x35c   : > { %v1828_v19 = vmul.f32 %v4094_v48, %v1604_v54  ;;  %v1605_v27 = vadd.f32 %v4107_v11, %v1566_v36  ;;  %v1564_v47 = vld [vmem:[#allocation2 + $0x28] sm:$0xff]  ;;  %1532 = vst.msk [vmem:[#allocation2 + $0x40] sm:$0xff] %vm536_vm0, %v1500_v56  ;;  %v1501_v18 = vadd.f32 %v1400_v31, %v1211_v57 }
 0x35d   : > { %v1826_v52 = vmul.f32 %v4090_v9, %v1602_v35  ;;  %v1603_v60 = vadd.f32 %v4107_v11, %v1564_v47  ;;  %1535 = vst.msk [vmem:[#allocation2 + $0x58] sm:$0xff] %vm536_vm0, %v1503_v40 }
 0x35e   : > { %1860 = vst.msk [vmem:[%s3653_s6 + $0x30] sm:$0xff] %vm536_vm0, %v1828_v19  ;;  %v1829_v48 = vmul.f32 %v4096_v37, %v1605_v27  ;;  %1533 = vst.msk [vmem:[#allocation2 + $0x48] sm:$0xff] %vm536_vm0, %v1501_v18  ;;  %v1224_v19 = vld [vmem:[#allocation2 + $0xb0] sm:$0xff]  ;;  %v1222_v27 = vld [vmem:[#allocation2 + $0xa0] sm:$0xff] }
 0x35f   : > { %1858 = vst.msk [vmem:[%s3653_s6 + $0x20] sm:$0xff] %vm536_vm0, %v1826_v52  ;;  %v1827_v22 = vmul.f32 %v4092_v42, %v1603_v60  ;;  %v4196_v47 = vpop.permute.xlu1 %1769  ;;  %v1225_v60 = vld [vmem:[#allocation2 + $0xb8] sm:$0xff] }
 0x360   : > { %1861 = vst.msk [vmem:[%s3653_s6 + $0x38] sm:$0xff] %vm536_vm0, %v1829_v48  ;;  %v2277_v9 = vpop.f32.mrb[12].mxu1 }
 0x361   : > { %1859 = vst.msk [vmem:[%s3653_s6 + $0x28] sm:$0xff] %vm536_vm0, %v1827_v22  ;;  %v1506_v39 = vadd.f32 %v2277_v9, %v1216_v55  ;;  %v1413_v49 = vpop.f32.mrb[13].mxu1  ;;  %v1223_v55 = vld [vmem:[#allocation2 + $0xa8] sm:$0xff] }
 0x362   : > { %v1569_v37 = vld [vmem:[#allocation2 + $0x50] sm:$0xff]  ;;  %v1504_v8 = vadd.f32 %v1413_v49, %v1214_v30  ;;  %v2278_v41 = vpop.f32.mrb[14].mxu1 }
 0x363   : > { %v1608_v62 = vadd.f32 %v4107_v11, %v1569_v37  ;;  %v1567_v38 = vld [vmem:[#allocation2 + $0x40] sm:$0xff]  ;;  %1538 = vst.msk [vmem:[#allocation2 + $0x70] sm:$0xff] %vm536_vm0, %v1506_v39  ;;  %v1507_v42 = vadd.f32 %v2278_v41, %v1217_v2  ;;  %v1416_v51 = vpop.f32.mrb[15].mxu1 }
 0x364   : > { %v1606_v44 = vadd.f32 %v4107_v11, %v1567_v38  ;;  %v1570_v0 = vld [vmem:[#allocation2 + $0x58] sm:$0xff]  ;;  %1536 = vst.msk [vmem:[#allocation2 + $0x60] sm:$0xff] %vm536_vm0, %v1504_v8  ;;  %v1505_v33 = vadd.f32 %v1416_v51, %v1215_v29 }
 0x365   : > { %v1832_v58 = vmul.f32 %v4109_v12, %v1608_v62  ;;  %v1609_v6 = vadd.f32 %v4107_v11, %v1570_v0  ;;  %v1568_v15 = vld [vmem:[#allocation2 + $0x48] sm:$0xff]  ;;  %1539 = vst.msk [vmem:[#allocation2 + $0x78] sm:$0xff] %vm536_vm0, %v1507_v42  ;;  %v1755_v12 = vpop.permute.xlu0 %1754  ;;  %v1780_v42 = vpop.permute.xlu1 %1779  ;;  %v1228_v0 = vld [vmem:[#allocation2 + $0xd0] sm:$0xff] }
 0x366   : > { %v1830_v4 = vmul.f32 %v4098_v1, %v1606_v44  ;;  %v1607_v53 = vadd.f32 %v4107_v11, %v1568_v15  ;;  %1537 = vst.msk [vmem:[#allocation2 + $0x68] sm:$0xff] %vm536_vm0, %v1505_v33 }
 0x367   : > { %1864 = vst.msk [vmem:[%s3653_s6 + $0x50] sm:$0xff] %vm536_vm0, %v1832_v58  ;;  %v1833_v10 = vmul.f32 %v4111_v3, %v1609_v6  ;;  %v1226_v58 = vld [vmem:[#allocation2 + $0xc0] sm:$0xff] }
 0x368   : > { %1862 = vst.msk [vmem:[%s3653_s6 + $0x40] sm:$0xff] %vm536_vm0, %v1830_v4  ;;  %v1831_v5 = vmul.f32 %v4102_v63, %v1607_v53  ;;  %v2281_v46 = vpop.f32.mrb[16].mxu1  ;;  %v1229_v4 = vld [vmem:[#allocation2 + $0xd8] sm:$0xff] }
 0x369   : > { %1865 = vst.msk [vmem:[%s3653_s6 + $0x58] sm:$0xff] %vm536_vm0, %v1833_v10  ;;  %v1510_v1 = vadd.f32 %v2281_v46, %v1220_v26  ;;  %v1429_v59 = vpop.f32.mrb[17].mxu1  ;;  %v4188_v36 = vpop.permute.xlu0 %1764  ;;  %v1227_v26 = vld [vmem:[#allocation2 + $0xc8] sm:$0xff] }
 0x36a   : > { %1863 = vst.msk [vmem:[%s3653_s6 + $0x48] sm:$0xff] %vm536_vm0, %v1831_v5  ;;  %v1573_v16 = vld [vmem:[#allocation2 + $0x70] sm:$0xff]  ;;  %v1508_v23 = vadd.f32 %v1429_v59, %v1218_v45  ;;  %v2282_v34 = vpop.f32.mrb[18].mxu1  ;;  %v1790_v59 = vpop.permute.xlu1 %1789 }
 0x36b   : > { %v1612_v3 = vadd.f32 %v4107_v11, %v1573_v16  ;;  %v1571_v43 = vld [vmem:[#allocation2 + $0x60] sm:$0xff]  ;;  %1542 = vst.msk [vmem:[#allocation2 + $0x90] sm:$0xff] %vm536_vm0, %v1510_v1  ;;  %v1511_v63 = vadd.f32 %v2282_v34, %v1221_v28  ;;  %v1432_v24 = vpop.f32.mrb[19].mxu1 }
 0x36c   : > { %v1610_v57 = vadd.f32 %v4107_v11, %v1571_v43  ;;  %v1574_v54 = vld [vmem:[#allocation2 + $0x78] sm:$0xff]  ;;  %1540 = vst.msk [vmem:[#allocation2 + $0x80] sm:$0xff] %vm536_vm0, %v1508_v23  ;;  %v1509_v17 = vadd.f32 %v1432_v24, %v1219_v50  ;;  %v1232_v24 = vld [vmem:[#allocation2 + $0xf0] sm:$0xff] }
 0x36d   : > { %v1836_v56 = vmul.f32 %v4136_v21, %v1612_v3  ;;  %v1613_v25 = vadd.f32 %v4107_v11, %v1574_v54  ;;  %v1572_v35 = vld [vmem:[#allocation2 + $0x68] sm:$0xff]  ;;  %1543 = vst.msk [vmem:[#allocation2 + $0x98] sm:$0xff] %vm536_vm0, %v1511_v63  ;;  %v1775_v49 = vpop.permute.xlu0 %1774  ;;  %v1230_v54 = vld [vmem:[#allocation2 + $0xe0] sm:$0xff] }
 0x36e   : > { %v1834_v40 = vmul.f32 %v4121_v20, %v1610_v57  ;;  %v1611_v31 = vadd.f32 %v4107_v11, %v1572_v35  ;;  %1541 = vst.msk [vmem:[#allocation2 + $0x88] sm:$0xff] %vm536_vm0, %v1509_v17  ;;  %v1233_v35 = vld [vmem:[#allocation2 + $0xf8] sm:$0xff] }
 0x36f   : > { %1868 = vst.msk [vmem:[%s3653_s6 + $0x70] sm:$0xff] %vm536_vm0, %v1836_v56  ;;  %v1837_v21 = vmul.f32 %v4144_v61, %v1613_v25 }
 0x370   : > { %1866 = vst.msk [vmem:[%s3653_s6 + $0x60] sm:$0xff] %vm536_vm0, %v1834_v40  ;;  %v1835_v18 = vmul.f32 %v4127_v13, %v1611_v31  ;;  %v2285_v52 = vpop.f32.mrb[20].mxu1  ;;  %v1231_v31 = vld [vmem:[#allocation2 + $0xe8] sm:$0xff] }
 0x371   : > { %1869 = vst.msk [vmem:[%s3653_s6 + $0x78] sm:$0xff] %vm536_vm0, %v1837_v21  ;;  %v1514_v20 = vadd.f32 %v2285_v52, %v1224_v19  ;;  %v1445_v48 = vpop.f32.mrb[21].mxu1  ;;  %v1785_v10 = vpop.permute.xlu0 %1784 }
 0x372   : > { %1867 = vst.msk [vmem:[%s3653_s6 + $0x68] sm:$0xff] %vm536_vm0, %v1835_v18  ;;  %v1577_v22 = vld [vmem:[#allocation2 + $0x90] sm:$0xff]  ;;  %v1512_v30 = vadd.f32 %v1445_v48, %v1222_v27  ;;  %v2286_v9 = vpop.f32.mrb[22].mxu1  ;;  %v1800_v19 = vpop.permute.xlu1 %1799 }
 0x373   : > { %v1616_v61 = vadd.f32 %v4107_v11, %v1577_v22  ;;  %v1575_v2 = vld [vmem:[#allocation2 + $0x80] sm:$0xff]  ;;  %1546 = vst.msk [vmem:[#allocation2 + $0xb0] sm:$0xff] %vm536_vm0, %v1514_v20  ;;  %v1515_v39 = vadd.f32 %v2286_v9, %v1225_v60  ;;  %v1448_v13 = vpop.f32.mrb[23].mxu1 }
 0x374   : > { %v1614_v29 = vadd.f32 %v4107_v11, %v1575_v2  ;;  %v1578_v37 = vld [vmem:[#allocation2 + $0x98] sm:$0xff]  ;;  %1544 = vst.msk [vmem:[#allocation2 + $0xa0] sm:$0xff] %vm536_vm0, %v1512_v30  ;;  %v1513_v8 = vadd.f32 %v1448_v13, %v1223_v55 }
 0x375   : > { %v1840_v41 = vmul.f32 %v1755_v12, %v1616_v61  ;;  %v1617_v62 = vadd.f32 %v4107_v11, %v1578_v37  ;;  %v1576_v38 = vld [vmem:[#allocation2 + $0x88] sm:$0xff]  ;;  %1547 = vst.msk [vmem:[#allocation2 + $0xb8] sm:$0xff] %vm536_vm0, %v1515_v39  ;;  %v1795_v17 = vpop.permute.xlu0 %1794 }
 0x376   : > { %v1838_v51 = vmul.f32 %v4157_v7, %v1614_v29  ;;  %v1615_v44 = vadd.f32 %v4107_v11, %v1576_v38  ;;  %1545 = vst.msk [vmem:[#allocation2 + $0xa8] sm:$0xff] %vm536_vm0, %v1513_v8  ;;  %v1810_v29 = vpop.permute.xlu1 %1809 }
 0x377   : > { %1872 = vst.msk [vmem:[%s3653_s6 + $0x90] sm:$0xff] %vm536_vm0, %v1840_v41  ;;  %v1841_v33 = vmul.f32 %v1760_v32, %v1617_v62 }
 0x378   : > { %1870 = vst.msk [vmem:[%s3653_s6 + $0x80] sm:$0xff] %vm536_vm0, %v1838_v51  ;;  %v1839_v6 = vmul.f32 %v4161_v14, %v1615_v44  ;;  %v2289_v15 = vpop.f32.mrb[24].mxu1 }
 0x379   : > { %1873 = vst.msk [vmem:[%s3653_s6 + $0x98] sm:$0xff] %vm536_vm0, %v1841_v33  ;;  %v1518_v53 = vadd.f32 %v2289_v15, %v1228_v0  ;;  %v1461_v7 = vpop.f32.mrb[25].mxu1  ;;  %v1805_v2 = vpop.permute.xlu0 %1804 }
 0x37a   : > { %1871 = vst.msk [vmem:[%s3653_s6 + $0x88] sm:$0xff] %vm536_vm0, %v1839_v6  ;;  %v1581_v45 = vld [vmem:[#allocation2 + $0xb0] sm:$0xff]  ;;  %v1516_v12 = vadd.f32 %v1461_v7, %v1226_v58  ;;  %v2290_v5 = vpop.f32.mrb[26].mxu1  ;;  %v1820_v58 = vpop.permute.xlu1 %1819 }
 0x37b   : > { %v1620_v46 = vadd.f32 %v4107_v11, %v1581_v45  ;;  %v1579_v28 = vld [vmem:[#allocation2 + $0xa0] sm:$0xff]  ;;  %1550 = vst.msk [vmem:[#allocation2 + $0xd0] sm:$0xff] %vm536_vm0, %v1518_v53  ;;  %v1519_v14 = vadd.f32 %v2290_v5, %v1229_v4  ;;  %v1464_v1 = vpop.f32.mrb[27].mxu1 }
 0x37c   : > { %v1618_v50 = vadd.f32 %v4107_v11, %v1579_v28  ;;  %v1582_v32 = vld [vmem:[#allocation2 + $0xb8] sm:$0xff]  ;;  %1548 = vst.msk [vmem:[#allocation2 + $0xc0] sm:$0xff] %vm536_vm0, %v1516_v12  ;;  %v1517_v16 = vadd.f32 %v1464_v1, %v1227_v26 }
 0x37d   : > { %v1844_v23 = vmul.f32 %v1775_v49, %v1620_v46  ;;  %v1621_v34 = vadd.f32 %v4107_v11, %v1582_v32  ;;  %v1580_v3 = vld [vmem:[#allocation2 + $0xa8] sm:$0xff]  ;;  %1551 = vst.msk [vmem:[#allocation2 + $0xd8] sm:$0xff] %vm536_vm0, %v1519_v14  ;;  %v1815_v38 = vpop.permute.xlu0 %1814 }
 0x37e   : > { %v1842_v43 = vmul.f32 %v4188_v36, %v1618_v50  ;;  %v1619_v63 = vadd.f32 %v4107_v11, %v1580_v3  ;;  %1549 = vst.msk [vmem:[#allocation2 + $0xc8] sm:$0xff] %vm536_vm0, %v1517_v16 }
 0x37f   : > { %1876 = vst.msk [vmem:[%s3653_s6 + $0xb0] sm:$0xff] %vm536_vm0, %v1844_v23  ;;  %v1845_v57 = vmul.f32 %v1780_v42, %v1621_v34 }
 0x380   : > { %1874 = vst.msk [vmem:[%s3653_s6 + $0xa0] sm:$0xff] %vm536_vm0, %v1842_v43  ;;  %v1843_v56 = vmul.f32 %v4196_v47, %v1619_v63  ;;  %v2293_v25 = vpop.f32.mrb[28].mxu1 }
 0x381   : > { %1877 = vst.msk [vmem:[%s3653_s6 + $0xb8] sm:$0xff] %vm536_vm0, %v1845_v57  ;;  %v1522_v36 = vadd.f32 %v2293_v25, %v1232_v24  ;;  %v1477_v40 = vpop.f32.mrb[29].mxu1 }
 0x382   : > { %1875 = vst.msk [vmem:[%s3653_s6 + $0xa8] sm:$0xff] %vm536_vm0, %v1843_v56  ;;  %v1585_v21 = vld [vmem:[#allocation2 + $0xd0] sm:$0xff]  ;;  %v1520_v27 = vadd.f32 %v1477_v40, %v1230_v54  ;;  %v2294_v18 = vpop.f32.mrb[30].mxu1 }
 0x383   : > { %v1624_v52 = vadd.f32 %v4107_v11, %v1585_v21  ;;  %v1583_v60 = vld [vmem:[#allocation2 + $0xc0] sm:$0xff]  ;;  %1554 = vst.msk [vmem:[#allocation2 + $0xf0] sm:$0xff] %vm536_vm0, %v1522_v36  ;;  %v1523_v47 = vadd.f32 %v2294_v18, %v1233_v35  ;;  %v1480_v20 = vpop.f32.mrb[31].mxu1 }
 0x384   : > { %v1622_v48 = vadd.f32 %v4107_v11, %v1583_v60  ;;  %v1586_v55 = vld [vmem:[#allocation2 + $0xd8] sm:$0xff]  ;;  %1552 = vst.msk [vmem:[#allocation2 + $0xe0] sm:$0xff] %vm536_vm0, %v1520_v27  ;;  %v1521_v22 = vadd.f32 %v1480_v20, %v1231_v31 }
 0x385   : > { %v1848_v30 = vmul.f32 %v1795_v17, %v1624_v52  ;;  %v1625_v9 = vadd.f32 %v4107_v11, %v1586_v55  ;;  %v1584_v61 = vld [vmem:[#allocation2 + $0xc8] sm:$0xff]  ;;  %1555 = vst.msk [vmem:[#allocation2 + $0xf8] sm:$0xff] %vm536_vm0, %v1523_v47 }
 0x386   : > { %v1846_v39 = vmul.f32 %v1785_v10, %v1622_v48  ;;  %v1623_v13 = vadd.f32 %v4107_v11, %v1584_v61  ;;  %1553 = vst.msk [vmem:[#allocation2 + $0xe8] sm:$0xff] %vm536_vm0, %v1521_v22 }
 0x387   : > { %1880 = vst.msk [vmem:[%s3653_s6 + $0xd0] sm:$0xff] %vm536_vm0, %v1848_v30  ;;  %v1849_v49 = vmul.f32 %v1800_v19, %v1625_v9 }
 0x388   : > { %1878 = vst.msk [vmem:[%s3653_s6 + $0xc0] sm:$0xff] %vm536_vm0, %v1846_v39  ;;  %v1847_v37 = vmul.f32 %v1790_v59, %v1623_v13 }
 0x389   : > { %1881 = vst.msk [vmem:[%s3653_s6 + $0xd8] sm:$0xff] %vm536_vm0, %v1849_v49 }
 0x38a   : > { %1879 = vst.msk [vmem:[%s3653_s6 + $0xc8] sm:$0xff] %vm536_vm0, %v1847_v37  ;;  %v1589_v8 = vld [vmem:[#allocation2 + $0xf0] sm:$0xff] }
 0x38b   : > { %v1628_v41 = vadd.f32 %v4107_v11, %v1589_v8  ;;  %v1587_v62 = vld [vmem:[#allocation2 + $0xe0] sm:$0xff] }
 0x38c   : > { %v1626_v42 = vadd.f32 %v4107_v11, %v1587_v62  ;;  %v1590_v51 = vld [vmem:[#allocation2 + $0xf8] sm:$0xff] }
 0x38d   : > { %v1852_v44 = vmul.f32 %v1815_v38, %v1628_v41  ;;  %v1629_v0 = vadd.f32 %v4107_v11, %v1590_v51  ;;  %v1588_v33 = vld [vmem:[#allocation2 + $0xe8] sm:$0xff] }
 0x38e   : > { %v1850_v6 = vmul.f32 %v1805_v2, %v1626_v42  ;;  %v1627_v15 = vadd.f32 %v4107_v11, %v1588_v33 }
 0x38f   : > { %1884 = vst.msk [vmem:[%s3653_s6 + $0xf0] sm:$0xff] %vm536_vm0, %v1852_v44  ;;  %v1853_v4 = vmul.f32 %v1820_v58, %v1629_v0 }
 0x390   : > { %1882 = vst.msk [vmem:[%s3653_s6 + $0xe0] sm:$0xff] %vm536_vm0, %v1850_v6  ;;  %v1851_v53 = vmul.f32 %v1810_v29, %v1627_v15 }
 0x391   : > { %1885 = vst.msk [vmem:[%s3653_s6 + $0xf8] sm:$0xff] %vm536_vm0, %v1853_v4 }
 0x392   : > { %1883 = vst.msk [vmem:[%s3653_s6 + $0xe8] sm:$0xff] %vm536_vm0, %v1851_v53 }
 0x393 PF: > { %s4506_s24 = sld [smem:[#allocation42_spill]]  ;;  %s4507_s23 = sld [smem:[#allocation44_spill]] }
 0x394   : > { %s4508_s9 = sld [smem:[#allocation57_spill]]  ;;  %s1900_s15 = sshll.u32 %s3653_s6, 4  ;;  %s4276_s15 = int_to_ptr.vmem [resolvable:$true] %s1900_s15 }
 0x395   : > { %s1887_s14 = scalar_lea.sflag [#allocation8], %s3608_s16  ;;  %s2792_s30 = scalar_lea.vmem %s4276_s15, 4096 }
 0x396   : > { %p2793_p12 = scmp.ne.s32.totalorder %s4276_s15, %s2792_s30  ;;  %s3008_s0 = smov [#allocation17]  }
 0x397   : > { %s2796_s8 = sshll.u32 %s3008_s0, 4  ;;  %s2797_s8 = int_to_ptr.vmem [resolvable:$false] %s2796_s8 }
 0x398   : > { %s2798_s3 = scalar_lea.vmem %s2797_s8, 8192  ;;  %p2799_p7 = scmp.lt.s32.totalorder %s4276_s15, %s2797_s8 }
 0x399   : > { %s2180_s29 = sshll.u32 %s4506_s24, 12  ;;  %p4510_p2 = scmp.ne.s32.totalorder %s4507_s23, 0 }
 0x39a   : > { %s4509_s22 = smov %s4508_s9  ;;  %s4273_s26 = scalar_lea.hbm %s4508_s9, %s2180_s29 }
 0x39b   : > { %p2794_p8 = pnand %p2793_p12, %p4510_p2  ;;  %p2800_p6 = scmp.lt.s32.totalorder %s2798_s3, %s2792_s30 }
 0x39d   : > { %p2795_p11 = pneg %p2794_p8  ;;  %p2801_p10 = por %p2800_p6, %p2799_p7 }
 0x39f   : > { %p2802_p9 = pnand %p2801_p10, %p2795_p11 }
 0x3a1   : > { %2805 = shalt.err (!%p2802_p9)
}
 0x3a2   : > { %s2806_s13 = scalar_lea.hbm %s4273_s26, 4096  ;;  %s2810_s19 = scalar_lea.hbm %s4509_s22, 16384 }
 0x3a3   : > { %p2807_p1 = scmp.ne.s32.totalorder %s4273_s26, %s2806_s13  ;;  %p2811_p5 = scmp.lt.u32.totalorder %s4273_s26, %s4509_s22 }
 0x3a4   : > { %p2812_p13 = scmp.lt.u32.totalorder %s2810_s19, %s2806_s13  ;;  %p2814_p12 = scmp.lt.u32.totalorder %s2806_s13, %s4273_s26 }
 0x3a5   : > { %p2808_p3 = pnand %p2807_p1, %p4510_p2 }
 0x3a6   : > { %p2813_p4 = por %p2812_p13, %p2811_p5 }
 0x3a7   : > { %p2809_p0 = pneg %p2808_p3 }
 0x3a8   : > { %p2815_p8 = por %p2814_p12, %p2813_p4 }
 0x3aa   : > { %p2816_p11 = pnand %p2815_p8, %p2809_p0 }
 0x3ac   : > { %2819 = shalt.err (!%p2816_p11)
}
 0x3ad   : > { %s3009_s29 = smov 128   ;;  %s3010_s10 = smov 8  }
 0x3ae   : > { %2315 = dma.vmem_to_hbm [thread:$0]  (%p4510_p2), %s4276_s15, 4096, %s4273_s26, %s1887_s14, %s3009_s29, %s3009_s29, %s3010_s10  }
 0x3af PF: > { %s4511_s2 = sld [smem:[#allocation39_spill]]  ;;  %s4512_s9 = sld [smem:[#allocation46_spill]] }
 0x3b0   : > { %p2349_p7 = scmp.ge.s32.totalorder %s2992_s18, 2 }
 0x3b5   : > { %s1915_s30 = sand.u32 1, %s4511_s2   ;;  %p4513_p6 = scmp.ne.s32.totalorder %s4512_s9, 0 }
 0x3b6   : > { %s1916_s0 = scalar_lea.sflag [#allocation8], %s1915_s30 }
 0x3b7   : > { %p2345_p10 = pnand %p2349_p7, %p4513_p6 }
 0x3b9   : > { %2919 = dma.done.wait (!%p2345_p10), %s1916_s0, 4096  }
 0x3ba   : > { %2921 = vsyncadd (!%p2345_p10), %s1916_s0, 4294963200  ;;  %s39_s18 = sadd.s32 1, %s2992_s18   ;;  %s4515_s0 = sld [smem:[#allocation35_spill]] }
 0x3bb   : > { %p4307_p9 = scmp.ge.s32.totalorder %s39_s18, 6   ;;  %s4516_s16 = sld [smem:[#allocation36_spill]] }
 0x3bc   : > { %s4517_s23 = sld [smem:[#allocation34_spill]]  ;;  %s4518_s29 = sld [smem:[#allocation37_spill]] }
 0x3bd   : > { %s4519_s30 = sld [smem:[#allocation38_spill]]  ;;  %s4520_s9 = sld [smem:[#allocation50_spill]] }
 0x3be   : > { %s4521_s15 = smov %s3396_s25  ;;  %s4522_s13 = sld [smem:[#allocation40_spill]] }
 0x3bf   : > { %s4523_s14 = sld [smem:[#allocation41_spill]]  ;;  %s4524_s3 = sld [smem:[#allocation45_spill]] }
 0x3c0   : > { %s4526_s26 = smov %s4551_s4  ;;  %s4527_s1 = smov %s2940_s27 }
 0x3c1   : > { %s4525_s25 = smov %s4516_s16  ;;  %s4528_s27 = smov %s2944_s28 }
 0x3c2   : > { %s4529_s28 = smov %s4517_s23  ;;  %s4530_s10 = smov %s2964_s11 }
 0x3c3   : > { %s4531_s11 = smov %s2968_s12  ;;  %s4532_s12 = smov %s4521_s15 }
 0x3c4   : > { %4534 = sst [smem:[#allocation34_spill]] %s2988_s17  ;;  %s4535_s17 = smov %s4537_s21 }
 0x3c5   : > { %s4533_s15 = smov %s4524_s3  ;;  %38 = sbr.rel (!%p4307_p9) target bundleno = 40 (0x28), region = 162 }
 0x3cc   :  { %1921 = vsyncpa [#allocation7], 1 }
 0x3cd   :  { %1923 = vsyncpa [#allocation7 + $0x1], 1 }
 0x3ce   :  { %1924 = vsyncpa [#allocation10], 1 }
 0x3cf   :  { %1926 = vsyncpa [#allocation10 + $0x1], 1 }
 0x3d0   :  { %1927 = vsyncpa [#allocation13], 1 }
 0x3d1   :  { %1929 = vsyncpa [#allocation13 + $0x1], 1 }
 0x3d2   :  { %1930 = vsyncpa [#allocation16], 1 }
 0x3d3   :  { %1932 = vsyncpa [#allocation16 + $0x1], 1 }
 0x3d4   :  { %1933 = vsyncpa [#allocation8], 1 }
 0x3d5   :  { %1935 = vsyncpa [#allocation8 + $0x1], 1 }

</bundles_post_ra>
